<compile_context>
chip_gen: v7x
topology: tpu7x:2x2x1
jax: 0.10.0
libtpu: 0.0.40
codegen_flags: <defaults>
</compile_context>

<pallas_src>
import functools
import math

import jax
import jax.numpy as jnp
from jax.experimental import pallas as pl
from jax.experimental.pallas import tpu as pltpu


def _round_up(x, m):
    return ((x + m - 1) // m) * m


# ------------------------------ fused kernel --------------------------------


def _fused_forward_kernel(*refs, num_layers, num_heads, B, S, hdp, n_valid, eps):
    # refs layout: x, emb(4), layers(12 each), tag(2), out, attn_scratch
    it = iter(refs)
    x_ref = next(it)
    emb_w1, emb_b1, emb_w2, emb_b2 = (next(it) for _ in range(4))
    layers = [tuple(next(it) for _ in range(12)) for _ in range(num_layers)]
    tag_w, tag_b = next(it), next(it)
    o_ref = next(it)
    attn_sc = next(it)  # (N, num_heads * hdp) VMEM scratch

    inv_n = jnp.float32(1.0 / n_valid)

    def layernorm(z, g, b):
        # Padded columns of z are exactly 0, so sums over the padded width equal sums
        # over the real n_valid features; divide by n_valid to get the true moments.
        mu = jnp.sum(z, axis=-1, keepdims=True) * inv_n
        var = jnp.sum(z * z, axis=-1, keepdims=True) * inv_n - mu * mu
        return (z - mu) * jax.lax.rsqrt(var + eps) * g + b

    # ---- set_embedding: Linear -> ReLU -> Linear -> ReLU ----
    x = x_ref[...]  # (N, Dp)
    h = jnp.maximum(
        jnp.dot(x, emb_w1[...], preferred_element_type=jnp.float32) + emb_b1[...], 0.0
    )
    x = jnp.maximum(
        jnp.dot(h, emb_w2[...], preferred_element_type=jnp.float32) + emb_b2[...], 0.0
    )

    # ---- additive attention mask, generated in-kernel ----
    # torch.triu(ones)==0 masks the strictly-lower triangle (attend to self + future).
    row = jax.lax.broadcasted_iota(jnp.int32, (S, S), 0)
    col = jax.lax.broadcasted_iota(jnp.int32, (S, S), 1)
    mask_add = jnp.where(row > col, jnp.float32(-1e30), jnp.float32(0.0))

    # ---- encoder layers (post-norm) ----
    for (ipw, ipb, opw, opb, g1, b1, fw1, fb1, fw2, fb2, g2, b2) in layers:
        qkv = jnp.dot(x, ipw[...], preferred_element_type=jnp.float32) + ipb[...]
        # padded qkv column layout: [Q_h0 | Q_h1 | K_h0 | K_h1 | V_h0 | V_h1], each hdp wide
        for bidx in range(B):          # static unroll; every slice is 8/128-aligned
            r0 = bidx * S
            for hidx in range(num_heads):
                q = qkv[r0:r0 + S, hidx * hdp:(hidx + 1) * hdp]
                k = qkv[r0:r0 + S, (num_heads + hidx) * hdp:(num_heads + hidx + 1) * hdp]
                v = qkv[r0:r0 + S, (2 * num_heads + hidx) * hdp:(2 * num_heads + hidx + 1) * hdp]
                s = jax.lax.dot_general(
                    q, k, (((1,), (1,)), ((), ())), preferred_element_type=jnp.float32
                )  # (S, S) = q @ k^T   (1/sqrt(hd) already folded into Q weights)
                s = s + mask_add
                m = jnp.max(s, axis=-1, keepdims=True)
                p = jnp.exp(s - m)
                denom = jnp.sum(p, axis=-1, keepdims=True)
                p = p * pl.reciprocal(denom, approx=True)
                attn_sc[r0:r0 + S, hidx * hdp:(hidx + 1) * hdp] = jnp.dot(
                    p, v, preferred_element_type=jnp.float32
                )

        # out_proj + residual + LayerNorm1
        z = x + jnp.dot(attn_sc[...], opw[...], preferred_element_type=jnp.float32) + opb[...]
        x = layernorm(z, g1[...], b1[...])

        # FFN + residual + LayerNorm2
        hmid = jnp.maximum(
            jnp.dot(x, fw1[...], preferred_element_type=jnp.float32) + fb1[...], 0.0
        )
        z = x + jnp.dot(hmid, fw2[...], preferred_element_type=jnp.float32) + fb2[...]
        x = layernorm(z, g2[...], b2[...])

    # ---- hidden2tag (lane-dense padded output slab) ----
    o_ref[...] = jnp.dot(x, tag_w[...], preferred_element_type=jnp.float32) + tag_b[...]


# ------------------------------ wrapper --------------------------------------


def _full_spec(shape):
    nd = len(shape)
    return pl.BlockSpec(shape, lambda i, _nd=nd: (0,) * _nd)


def pallas_transformer_forward(x_pad, flat_params, *, num_layers, num_heads,
                               B, S, hdp, Tp, n_valid, eps=1e-5):
    N = x_pad.shape[0]
    Cp = num_heads * hdp
    inputs = [x_pad] + list(flat_params)
    kernel = functools.partial(
        _fused_forward_kernel,
        num_layers=num_layers, num_heads=num_heads,
        B=B, S=S, hdp=hdp, n_valid=n_valid, eps=eps,
    )
    return pl.pallas_call(
        kernel,
        out_shape=jax.ShapeDtypeStruct((N, Tp), jnp.float32),
        grid=(1,),
        in_specs=[_full_spec(a.shape) for a in inputs],
        out_specs=_full_spec((N, Tp)),
        scratch_shapes=[pltpu.VMEM((N, Cp), jnp.float32)],
        compiler_params=pltpu.CompilerParams(dimension_semantics=("arbitrary",)),
    )(*inputs)


def transformer_model_forward(APIs, prepared):
    # APIs: (B, S, D=200) float32 -> (B, S, title_size)
    B, S, D = APIs.shape
    Dp = prepared["Dp"]
    x = APIs.reshape(B * S, D)
    x = jnp.pad(x, ((0, 0), (0, Dp - D)))  # one cheap pad; kernel works lane-dense
    out_pad = pallas_transformer_forward(
        x, prepared["flat"],
        num_layers=prepared["num_layers"], num_heads=prepared["num_heads"],
        B=B, S=S, hdp=prepared["hdp"], Tp=prepared["Tp"], n_valid=prepared["n_valid"],
    )
    t = prepared["title_size"]
    return out_pad[:, :t].reshape(B, S, t)


# ------------------------ parameters (host-side prep) ------------------------


def init_params(key, D, dff, title_size, n_layers=2, scale=0.05):
    keys = list(jax.random.split(key, 64))
    it = iter(keys)

    def w(shape):
        return scale * jax.random.normal(next(it), shape, jnp.float32)

    params = {
        "emb_w1": w((D, 2 * D)),
        "emb_b1": w((2 * D,)),
        "emb_w2": w((2 * D, D)),
        "emb_b2": w((D,)),
        "tag_w": w((D, title_size)),
        "tag_b": w((title_size,)),
        "layers": [],
    }
    for _ in range(n_layers):
        params["layers"].append(
            {
                "in_proj_w": w((D, 3 * D)),
                "in_proj_b": w((3 * D,)),
                "out_proj_w": w((D, D)),
                "out_proj_b": w((D,)),
                "ln1_g": jnp.ones((D,), jnp.float32),
                "ln1_b": jnp.zeros((D,), jnp.float32),
                "ff_w1": w((D, dff)),
                "ff_b1": w((dff,)),
                "ff_w2": w((dff, D)),
                "ff_b2": w((D,)),
                "ln2_g": jnp.ones((D,), jnp.float32),
                "ln2_b": jnp.zeros((D,), jnp.float32),
            }
        )
    return params


def prepare_params(params, D, dff, title_size, num_heads):
    """Pad / rearrange weights once on the host so every in-kernel slice is 128-aligned.

    NOTE: weights here follow the x @ W convention (shape (in, out)); weights imported
    from PyTorch (stored (out, in)) must be transposed before calling this.
    """
    hd = D // num_heads
    Dp = _round_up(D, 128)           # 200 -> 256
    hdp = _round_up(hd, 128)         # 100 -> 128
    Cp = num_heads * hdp             # padded multi-head context width
    Hp = _round_up(2 * D, 128)       # 400 -> 512  (embedding hidden)
    Fp = _round_up(dff, 128)         # 200 -> 256  (feed-forward)
    Tp = _round_up(title_size, 128)  # 10 -> 128
    scale = 1.0 / math.sqrt(hd)

    def pad2(w, rows, cols):
        return jnp.pad(w, ((0, rows - w.shape[0]), (0, cols - w.shape[1])))

    def pad_row(b, cols):
        return jnp.pad(b, (0, cols - b.shape[0])).reshape(1, cols)

    flat = [
        pad2(params["emb_w1"], Dp, Hp), pad_row(params["emb_b1"], Hp),
        pad2(params["emb_w2"], Hp, Dp), pad_row(params["emb_b2"], Dp),
    ]

    for layer in params["layers"]:
        # in_proj: rearrange to per-head 128-wide column blocks [Qh0|Qh1|Kh0|Kh1|Vh0|Vh1],
        # folding the 1/sqrt(hd) softmax scale into the Q columns.
        ipw = jnp.zeros((Dp, 3 * Cp), jnp.float32)
        ipb = jnp.zeros((1, 3 * Cp), jnp.float32)
        for t in range(3):  # 0=Q, 1=K, 2=V
            for h in range(num_heads):
                wblk = layer["in_proj_w"][:, t * D + h * hd: t * D + (h + 1) * hd]
                bblk = layer["in_proj_b"][t * D + h * hd: t * D + (h + 1) * hd]
                if t == 0:
                    wblk = wblk * scale
                    bblk = bblk * scale
                c0 = (t * num_heads + h) * hdp
                ipw = ipw.at[:D, c0:c0 + hd].set(wblk)
                ipb = ipb.at[0, c0:c0 + hd].set(bblk)

        # out_proj: rearrange input rows to match the padded per-head context layout.
        opw = jnp.zeros((Cp, Dp), jnp.float32)
        for h in range(num_heads):
            opw = opw.at[h * hdp: h * hdp + hd, :D].set(
                layer["out_proj_w"][h * hd:(h + 1) * hd, :]
            )

        flat += [
            ipw, ipb,
            opw, pad_row(layer["out_proj_b"], Dp),
            pad_row(layer["ln1_g"], Dp), pad_row(layer["ln1_b"], Dp),
            pad2(layer["ff_w1"], Dp, Fp), pad_row(layer["ff_b1"], Fp),
            pad2(layer["ff_w2"], Fp, Dp), pad_row(layer["ff_b2"], Dp),
            pad_row(layer["ln2_g"], Dp), pad_row(layer["ln2_b"], Dp),
        ]

    flat += [pad2(params["tag_w"], Dp, Tp), pad_row(params["tag_b"], Tp)]

    return {
        "flat": flat, "Dp": Dp, "hdp": hdp, "Tp": Tp,
        "num_layers": len(params["layers"]), "num_heads": num_heads,
        "n_valid": D, "title_size": title_size,
    }


# ----------------------------------- main ------------------------------------


if __name__ == "__main__":
    # d_model is fixed to 200 by the module (TransformerEncoderLayer(200, 2, ...)),
    # so APIsets_emsize must be 200; keep batch/seq small.
    B, S, D = 2, 8, 200
    TITLE_SIZE = 10   # len(title2idx)
    DFF = 200         # dim_feedforward
    NUM_HEADS = 2

    key = jax.random.PRNGKey(0)
    k_params, k_x = jax.random.split(key)
    params = init_params(k_params, D, DFF, TITLE_SIZE, n_layers=2)
    prepared = prepare_params(params, D, DFF, TITLE_SIZE, NUM_HEADS)
    APIs = jax.random.normal(k_x, (B, S, D), jnp.float32)

    fwd = jax.jit(lambda a: transformer_model_forward(a, prepared))
    out = fwd(APIs)
    jax.block_until_ready(out)
    assert out.shape == (B, S, TITLE_SIZE), out.shape
    assert jnp.all(jnp.isfinite(out))
    print("KERNEL_OK")
</pallas_src>

<mosaic_0001>
module attributes {stable_mosaic.version = 11 : i64} {
  func.func @_fused_forward_kernel(%arg0: i32, %arg1: memref<16x256xf32, #tpu.memory_space<vmem>>, %arg2: memref<256x512xf32, #tpu.memory_space<vmem>>, %arg3: memref<1x512xf32, #tpu.memory_space<vmem>>, %arg4: memref<512x256xf32, #tpu.memory_space<vmem>>, %arg5: memref<1x256xf32, #tpu.memory_space<vmem>>, %arg6: memref<256x768xf32, #tpu.memory_space<vmem>>, %arg7: memref<1x768xf32, #tpu.memory_space<vmem>>, %arg8: memref<256x256xf32, #tpu.memory_space<vmem>>, %arg9: memref<1x256xf32, #tpu.memory_space<vmem>>, %arg10: memref<1x256xf32, #tpu.memory_space<vmem>>, %arg11: memref<1x256xf32, #tpu.memory_space<vmem>>, %arg12: memref<256x256xf32, #tpu.memory_space<vmem>>, %arg13: memref<1x256xf32, #tpu.memory_space<vmem>>, %arg14: memref<256x256xf32, #tpu.memory_space<vmem>>, %arg15: memref<1x256xf32, #tpu.memory_space<vmem>>, %arg16: memref<1x256xf32, #tpu.memory_space<vmem>>, %arg17: memref<1x256xf32, #tpu.memory_space<vmem>>, %arg18: memref<256x768xf32, #tpu.memory_space<vmem>>, %arg19: memref<1x768xf32, #tpu.memory_space<vmem>>, %arg20: memref<256x256xf32, #tpu.memory_space<vmem>>, %arg21: memref<1x256xf32, #tpu.memory_space<vmem>>, %arg22: memref<1x256xf32, #tpu.memory_space<vmem>>, %arg23: memref<1x256xf32, #tpu.memory_space<vmem>>, %arg24: memref<256x256xf32, #tpu.memory_space<vmem>>, %arg25: memref<1x256xf32, #tpu.memory_space<vmem>>, %arg26: memref<256x256xf32, #tpu.memory_space<vmem>>, %arg27: memref<1x256xf32, #tpu.memory_space<vmem>>, %arg28: memref<1x256xf32, #tpu.memory_space<vmem>>, %arg29: memref<1x256xf32, #tpu.memory_space<vmem>>, %arg30: memref<256x128xf32, #tpu.memory_space<vmem>>, %arg31: memref<1x128xf32, #tpu.memory_space<vmem>>, %arg32: memref<16x128xf32, #tpu.memory_space<vmem>>, %arg33: memref<16x256xf32, #tpu.memory_space<vmem>>) attributes {dimension_semantics = [#tpu.dimension_semantics<arbitrary>], iteration_bounds = array<i64: 1>, scalar_prefetch = 0 : i64, scratch_operands = 1 : i64, tpu.core_type = #tpu.core_type<tc>, window_params = [{pipeline_mode = #tpu.pipeline_mode<synchronous>, transform_indices = @transform_0, window_bounds = array<i64: 16, 256>}, {pipeline_mode = #tpu.pipeline_mode<synchronous>, transform_indices = @transform_1, window_bounds = array<i64: 256, 512>}, {pipeline_mode = #tpu.pipeline_mode<synchronous>, transform_indices = @transform_2, window_bounds = array<i64: 1, 512>}, {pipeline_mode = #tpu.pipeline_mode<synchronous>, transform_indices = @transform_3, window_bounds = array<i64: 512, 256>}, {pipeline_mode = #tpu.pipeline_mode<synchronous>, transform_indices = @transform_4, window_bounds = array<i64: 1, 256>}, {pipeline_mode = #tpu.pipeline_mode<synchronous>, transform_indices = @transform_5, window_bounds = array<i64: 256, 768>}, {pipeline_mode = #tpu.pipeline_mode<synchronous>, transform_indices = @transform_6, window_bounds = array<i64: 1, 768>}, {pipeline_mode = #tpu.pipeline_mode<synchronous>, transform_indices = @transform_7, window_bounds = array<i64: 256, 256>}, {pipeline_mode = #tpu.pipeline_mode<synchronous>, transform_indices = @transform_8, window_bounds = array<i64: 1, 256>}, {pipeline_mode = #tpu.pipeline_mode<synchronous>, transform_indices = @transform_9, window_bounds = array<i64: 1, 256>}, {pipeline_mode = #tpu.pipeline_mode<synchronous>, transform_indices = @transform_10, window_bounds = array<i64: 1, 256>}, {pipeline_mode = #tpu.pipeline_mode<synchronous>, transform_indices = @transform_11, window_bounds = array<i64: 256, 256>}, {pipeline_mode = #tpu.pipeline_mode<synchronous>, transform_indices = @transform_12, window_bounds = array<i64: 1, 256>}, {pipeline_mode = #tpu.pipeline_mode<synchronous>, transform_indices = @transform_13, window_bounds = array<i64: 256, 256>}, {pipeline_mode = #tpu.pipeline_mode<synchronous>, transform_indices = @transform_14, window_bounds = array<i64: 1, 256>}, {pipeline_mode = #tpu.pipeline_mode<synchronous>, transform_indices = @transform_15, window_bounds = array<i64: 1, 256>}, {pipeline_mode = #tpu.pipeline_mode<synchronous>, transform_indices = @transform_16, window_bounds = array<i64: 1, 256>}, {pipeline_mode = #tpu.pipeline_mode<synchronous>, transform_indices = @transform_17, window_bounds = array<i64: 256, 768>}, {pipeline_mode = #tpu.pipeline_mode<synchronous>, transform_indices = @transform_18, window_bounds = array<i64: 1, 768>}, {pipeline_mode = #tpu.pipeline_mode<synchronous>, transform_indices = @transform_19, window_bounds = array<i64: 256, 256>}, {pipeline_mode = #tpu.pipeline_mode<synchronous>, transform_indices = @transform_20, window_bounds = array<i64: 1, 256>}, {pipeline_mode = #tpu.pipeline_mode<synchronous>, transform_indices = @transform_21, window_bounds = array<i64: 1, 256>}, {pipeline_mode = #tpu.pipeline_mode<synchronous>, transform_indices = @transform_22, window_bounds = array<i64: 1, 256>}, {pipeline_mode = #tpu.pipeline_mode<synchronous>, transform_indices = @transform_23, window_bounds = array<i64: 256, 256>}, {pipeline_mode = #tpu.pipeline_mode<synchronous>, transform_indices = @transform_24, window_bounds = array<i64: 1, 256>}, {pipeline_mode = #tpu.pipeline_mode<synchronous>, transform_indices = @transform_25, window_bounds = array<i64: 256, 256>}, {pipeline_mode = #tpu.pipeline_mode<synchronous>, transform_indices = @transform_26, window_bounds = array<i64: 1, 256>}, {pipeline_mode = #tpu.pipeline_mode<synchronous>, transform_indices = @transform_27, window_bounds = array<i64: 1, 256>}, {pipeline_mode = #tpu.pipeline_mode<synchronous>, transform_indices = @transform_28, window_bounds = array<i64: 1, 256>}, {pipeline_mode = #tpu.pipeline_mode<synchronous>, transform_indices = @transform_29, window_bounds = array<i64: 256, 128>}, {pipeline_mode = #tpu.pipeline_mode<synchronous>, transform_indices = @transform_30, window_bounds = array<i64: 1, 128>}, {pipeline_mode = #tpu.pipeline_mode<synchronous>, transform_indices = @transform_31, window_bounds = array<i64: 16, 128>}]} {
    %c0 = arith.constant 0 : index
    %c0_0 = arith.constant 0 : index
    %0 = vector.load %arg1[%c0, %c0_0] : memref<16x256xf32, #tpu.memory_space<vmem>>, vector<16x256xf32>
    %c0_1 = arith.constant 0 : index
    %c0_2 = arith.constant 0 : index
    %1 = vector.load %arg2[%c0_1, %c0_2] : memref<256x512xf32, #tpu.memory_space<vmem>>, vector<256x512xf32>
    %cst = arith.constant dense<0.000000e+00> : vector<16x512xf32>
    %2 = tpu.matmul %0, %1, %cst {dimension_numbers = #tpu.dot_dimension_numbers<[1], [0], [0], [1], [0, 0, 1, 1], [], []>} : vector<16x256xf32>, vector<256x512xf32>, vector<16x512xf32> -> vector<16x512xf32>
    %c0_3 = arith.constant 0 : index
    %c0_4 = arith.constant 0 : index
    %3 = vector.load %arg3[%c0_3, %c0_4] : memref<1x512xf32, #tpu.memory_space<vmem>>, vector<1x512xf32>
    %4 = vector.broadcast %3 : vector<1x512xf32> to vector<16x512xf32>
    %5 = arith.addf %2, %4 : vector<16x512xf32>
    %cst_5 = arith.constant 0.000000e+00 : f32
    %6 = vector.broadcast %cst_5 : f32 to vector<16x512xf32>
    %7 = arith.maximumf %5, %6 : vector<16x512xf32>
    %c0_6 = arith.constant 0 : index
    %c0_7 = arith.constant 0 : index
    %8 = vector.load %arg4[%c0_6, %c0_7] : memref<512x256xf32, #tpu.memory_space<vmem>>, vector<512x256xf32>
    %cst_8 = arith.constant dense<0.000000e+00> : vector<16x256xf32>
    %9 = tpu.matmul %7, %8, %cst_8 {dimension_numbers = #tpu.dot_dimension_numbers<[1], [0], [0], [1], [0, 0, 1, 1], [], []>} : vector<16x512xf32>, vector<512x256xf32>, vector<16x256xf32> -> vector<16x256xf32>
    %c0_9 = arith.constant 0 : index
    %c0_10 = arith.constant 0 : index
    %10 = vector.load %arg5[%c0_9, %c0_10] : memref<1x256xf32, #tpu.memory_space<vmem>>, vector<1x256xf32>
    %11 = vector.broadcast %10 : vector<1x256xf32> to vector<16x256xf32>
    %12 = arith.addf %9, %11 : vector<16x256xf32>
    %cst_11 = arith.constant 0.000000e+00 : f32
    %13 = vector.broadcast %cst_11 : f32 to vector<16x256xf32>
    %14 = arith.maximumf %12, %13 : vector<16x256xf32>
    %15 = tpu.iota {dimensions = array<i32: 0>} : vector<8x8xi32>
    %16 = tpu.iota {dimensions = array<i32: 1>} : vector<8x8xi32>
    %17 = arith.cmpi sgt, %15, %16 : vector<8x8xi32>
    %cst_12 = arith.constant -1.000000e+30 : f32
    %cst_13 = arith.constant 0.000000e+00 : f32
    %18 = vector.broadcast %cst_12 : f32 to vector<8x8xf32>
    %19 = vector.broadcast %cst_13 : f32 to vector<8x8xf32>
    %20 = arith.select %17, %18, %19 : vector<8x8xi1>, vector<8x8xf32>
    %c0_14 = arith.constant 0 : index
    %c0_15 = arith.constant 0 : index
    %21 = vector.load %arg6[%c0_14, %c0_15] : memref<256x768xf32, #tpu.memory_space<vmem>>, vector<256x768xf32>
    %cst_16 = arith.constant dense<0.000000e+00> : vector<16x768xf32>
    %22 = tpu.matmul %14, %21, %cst_16 {dimension_numbers = #tpu.dot_dimension_numbers<[1], [0], [0], [1], [0, 0, 1, 1], [], []>} : vector<16x256xf32>, vector<256x768xf32>, vector<16x768xf32> -> vector<16x768xf32>
    %c0_17 = arith.constant 0 : index
    %c0_18 = arith.constant 0 : index
    %23 = vector.load %arg7[%c0_17, %c0_18] : memref<1x768xf32, #tpu.memory_space<vmem>>, vector<1x768xf32>
    %24 = vector.broadcast %23 : vector<1x768xf32> to vector<16x768xf32>
    %25 = arith.addf %22, %24 : vector<16x768xf32>
    %26 = vector.extract_strided_slice %25 {offsets = [0, 0], sizes = [8, 128], strides = [1, 1]} : vector<16x768xf32> to vector<8x128xf32>
    %27 = vector.extract_strided_slice %25 {offsets = [0, 256], sizes = [8, 128], strides = [1, 1]} : vector<16x768xf32> to vector<8x128xf32>
    %28 = vector.extract_strided_slice %25 {offsets = [0, 512], sizes = [8, 128], strides = [1, 1]} : vector<16x768xf32> to vector<8x128xf32>
    %cst_19 = arith.constant dense<0.000000e+00> : vector<8x8xf32>
    %29 = tpu.matmul %26, %27, %cst_19 {dimension_numbers = #tpu.dot_dimension_numbers<[1], [1], [0], [0], [0, 0, 1, 0], [], []>} : vector<8x128xf32>, vector<8x128xf32>, vector<8x8xf32> -> vector<8x8xf32>
    %30 = arith.addf %29, %20 : vector<8x8xf32>
    %cst_20 = arith.constant dense<0xFF800000> : vector<8xf32>
    %31 = vector.multi_reduction <maximumf>, %30, %cst_20 [1] : vector<8x8xf32> to vector<8xf32>
    %32 = vector.shape_cast %31 : vector<8xf32> to vector<8x1xf32>
    %33 = vector.broadcast %32 : vector<8x1xf32> to vector<8x8xf32>
    %34 = arith.subf %30, %33 : vector<8x8xf32>
    %35 = math.exp %34 : vector<8x8xf32>
    %cst_21 = arith.constant dense<0.000000e+00> : vector<8xf32>
    %36 = vector.multi_reduction <add>, %35, %cst_21 [1] : vector<8x8xf32> to vector<8xf32>
    %37 = vector.shape_cast %36 : vector<8xf32> to vector<8x1xf32>
    %38 = tpu.reciprocal %37 {approx = true} : vector<8x1xf32> -> vector<8x1xf32>
    %39 = vector.broadcast %38 : vector<8x1xf32> to vector<8x8xf32>
    %40 = arith.mulf %35, %39 : vector<8x8xf32>
    %cst_22 = arith.constant dense<0.000000e+00> : vector<8x128xf32>
    %41 = tpu.matmul %40, %28, %cst_22 {dimension_numbers = #tpu.dot_dimension_numbers<[1], [0], [0], [1], [0, 0, 1, 1], [], []>} : vector<8x8xf32>, vector<8x128xf32>, vector<8x128xf32> -> vector<8x128xf32>
    %c0_23 = arith.constant 0 : index
    %c0_24 = arith.constant 0 : index
    %42 = vector.load %arg33[%c0_23, %c0_24] : memref<16x256xf32, #tpu.memory_space<vmem>>, vector<8x128xf32>
    tpu.vector_store %arg33[%c0_23, %c0_24], %41 {strides = array<i32>} : memref<16x256xf32, #tpu.memory_space<vmem>>, vector<8x128xf32>,
    %43 = vector.extract_strided_slice %25 {offsets = [0, 128], sizes = [8, 128], strides = [1, 1]} : vector<16x768xf32> to vector<8x128xf32>
    %44 = vector.extract_strided_slice %25 {offsets = [0, 384], sizes = [8, 128], strides = [1, 1]} : vector<16x768xf32> to vector<8x128xf32>
    %45 = vector.extract_strided_slice %25 {offsets = [0, 640], sizes = [8, 128], strides = [1, 1]} : vector<16x768xf32> to vector<8x128xf32>
    %cst_25 = arith.constant dense<0.000000e+00> : vector<8x8xf32>
    %46 = tpu.matmul %43, %44, %cst_25 {dimension_numbers = #tpu.dot_dimension_numbers<[1], [1], [0], [0], [0, 0, 1, 0], [], []>} : vector<8x128xf32>, vector<8x128xf32>, vector<8x8xf32> -> vector<8x8xf32>
    %47 = arith.addf %46, %20 : vector<8x8xf32>
    %cst_26 = arith.constant dense<0xFF800000> : vector<8xf32>
    %48 = vector.multi_reduction <maximumf>, %47, %cst_26 [1] : vector<8x8xf32> to vector<8xf32>
    %49 = vector.shape_cast %48 : vector<8xf32> to vector<8x1xf32>
    %50 = vector.broadcast %49 : vector<8x1xf32> to vector<8x8xf32>
    %51 = arith.subf %47, %50 : vector<8x8xf32>
    %52 = math.exp %51 : vector<8x8xf32>
    %cst_27 = arith.constant dense<0.000000e+00> : vector<8xf32>
    %53 = vector.multi_reduction <add>, %52, %cst_27 [1] : vector<8x8xf32> to vector<8xf32>
    %54 = vector.shape_cast %53 : vector<8xf32> to vector<8x1xf32>
    %55 = tpu.reciprocal %54 {approx = true} : vector<8x1xf32> -> vector<8x1xf32>
    %56 = vector.broadcast %55 : vector<8x1xf32> to vector<8x8xf32>
    %57 = arith.mulf %52, %56 : vector<8x8xf32>
    %cst_28 = arith.constant dense<0.000000e+00> : vector<8x128xf32>
    %58 = tpu.matmul %57, %45, %cst_28 {dimension_numbers = #tpu.dot_dimension_numbers<[1], [0], [0], [1], [0, 0, 1, 1], [], []>} : vector<8x8xf32>, vector<8x128xf32>, vector<8x128xf32> -> vector<8x128xf32>
    %c0_29 = arith.constant 0 : index
    %c128 = arith.constant 128 : index
    %59 = vector.load %arg33[%c0_29, %c128] : memref<16x256xf32, #tpu.memory_space<vmem>>, vector<8x128xf32>
    tpu.vector_store %arg33[%c0_29, %c128], %58 {strides = array<i32>} : memref<16x256xf32, #tpu.memory_space<vmem>>, vector<8x128xf32>,
    %60 = vector.extract_strided_slice %25 {offsets = [8, 0], sizes = [8, 128], strides = [1, 1]} : vector<16x768xf32> to vector<8x128xf32>
    %61 = vector.extract_strided_slice %25 {offsets = [8, 256], sizes = [8, 128], strides = [1, 1]} : vector<16x768xf32> to vector<8x128xf32>
    %62 = vector.extract_strided_slice %25 {offsets = [8, 512], sizes = [8, 128], strides = [1, 1]} : vector<16x768xf32> to vector<8x128xf32>
    %cst_30 = arith.constant dense<0.000000e+00> : vector<8x8xf32>
    %63 = tpu.matmul %60, %61, %cst_30 {dimension_numbers = #tpu.dot_dimension_numbers<[1], [1], [0], [0], [0, 0, 1, 0], [], []>} : vector<8x128xf32>, vector<8x128xf32>, vector<8x8xf32> -> vector<8x8xf32>
    %64 = arith.addf %63, %20 : vector<8x8xf32>
    %cst_31 = arith.constant dense<0xFF800000> : vector<8xf32>
    %65 = vector.multi_reduction <maximumf>, %64, %cst_31 [1] : vector<8x8xf32> to vector<8xf32>
    %66 = vector.shape_cast %65 : vector<8xf32> to vector<8x1xf32>
    %67 = vector.broadcast %66 : vector<8x1xf32> to vector<8x8xf32>
    %68 = arith.subf %64, %67 : vector<8x8xf32>
    %69 = math.exp %68 : vector<8x8xf32>
    %cst_32 = arith.constant dense<0.000000e+00> : vector<8xf32>
    %70 = vector.multi_reduction <add>, %69, %cst_32 [1] : vector<8x8xf32> to vector<8xf32>
    %71 = vector.shape_cast %70 : vector<8xf32> to vector<8x1xf32>
    %72 = tpu.reciprocal %71 {approx = true} : vector<8x1xf32> -> vector<8x1xf32>
    %73 = vector.broadcast %72 : vector<8x1xf32> to vector<8x8xf32>
    %74 = arith.mulf %69, %73 : vector<8x8xf32>
    %cst_33 = arith.constant dense<0.000000e+00> : vector<8x128xf32>
    %75 = tpu.matmul %74, %62, %cst_33 {dimension_numbers = #tpu.dot_dimension_numbers<[1], [0], [0], [1], [0, 0, 1, 1], [], []>} : vector<8x8xf32>, vector<8x128xf32>, vector<8x128xf32> -> vector<8x128xf32>
    %c8 = arith.constant 8 : index
    %c0_34 = arith.constant 0 : index
    %76 = vector.load %arg33[%c8, %c0_34] : memref<16x256xf32, #tpu.memory_space<vmem>>, vector<8x128xf32>
    tpu.vector_store %arg33[%c8, %c0_34], %75 {strides = array<i32>} : memref<16x256xf32, #tpu.memory_space<vmem>>, vector<8x128xf32>,
    %77 = vector.extract_strided_slice %25 {offsets = [8, 128], sizes = [8, 128], strides = [1, 1]} : vector<16x768xf32> to vector<8x128xf32>
    %78 = vector.extract_strided_slice %25 {offsets = [8, 384], sizes = [8, 128], strides = [1, 1]} : vector<16x768xf32> to vector<8x128xf32>
    %79 = vector.extract_strided_slice %25 {offsets = [8, 640], sizes = [8, 128], strides = [1, 1]} : vector<16x768xf32> to vector<8x128xf32>
    %cst_35 = arith.constant dense<0.000000e+00> : vector<8x8xf32>
    %80 = tpu.matmul %77, %78, %cst_35 {dimension_numbers = #tpu.dot_dimension_numbers<[1], [1], [0], [0], [0, 0, 1, 0], [], []>} : vector<8x128xf32>, vector<8x128xf32>, vector<8x8xf32> -> vector<8x8xf32>
    %81 = arith.addf %80, %20 : vector<8x8xf32>
    %cst_36 = arith.constant dense<0xFF800000> : vector<8xf32>
    %82 = vector.multi_reduction <maximumf>, %81, %cst_36 [1] : vector<8x8xf32> to vector<8xf32>
    %83 = vector.shape_cast %82 : vector<8xf32> to vector<8x1xf32>
    %84 = vector.broadcast %83 : vector<8x1xf32> to vector<8x8xf32>
    %85 = arith.subf %81, %84 : vector<8x8xf32>
    %86 = math.exp %85 : vector<8x8xf32>
    %cst_37 = arith.constant dense<0.000000e+00> : vector<8xf32>
    %87 = vector.multi_reduction <add>, %86, %cst_37 [1] : vector<8x8xf32> to vector<8xf32>
    %88 = vector.shape_cast %87 : vector<8xf32> to vector<8x1xf32>
    %89 = tpu.reciprocal %88 {approx = true} : vector<8x1xf32> -> vector<8x1xf32>
    %90 = vector.broadcast %89 : vector<8x1xf32> to vector<8x8xf32>
    %91 = arith.mulf %86, %90 : vector<8x8xf32>
    %cst_38 = arith.constant dense<0.000000e+00> : vector<8x128xf32>
    %92 = tpu.matmul %91, %79, %cst_38 {dimension_numbers = #tpu.dot_dimension_numbers<[1], [0], [0], [1], [0, 0, 1, 1], [], []>} : vector<8x8xf32>, vector<8x128xf32>, vector<8x128xf32> -> vector<8x128xf32>
    %c8_39 = arith.constant 8 : index
    %c128_40 = arith.constant 128 : index
    %93 = vector.load %arg33[%c8_39, %c128_40] : memref<16x256xf32, #tpu.memory_space<vmem>>, vector<8x128xf32>
    tpu.vector_store %arg33[%c8_39, %c128_40], %92 {strides = array<i32>} : memref<16x256xf32, #tpu.memory_space<vmem>>, vector<8x128xf32>,
    %c0_41 = arith.constant 0 : index
    %c0_42 = arith.constant 0 : index
    %94 = vector.load %arg33[%c0_41, %c0_42] : memref<16x256xf32, #tpu.memory_space<vmem>>, vector<16x256xf32>
    %c0_43 = arith.constant 0 : index
    %c0_44 = arith.constant 0 : index
    %95 = vector.load %arg8[%c0_43, %c0_44] : memref<256x256xf32, #tpu.memory_space<vmem>>, vector<256x256xf32>
    %cst_45 = arith.constant dense<0.000000e+00> : vector<16x256xf32>
    %96 = tpu.matmul %94, %95, %cst_45 {dimension_numbers = #tpu.dot_dimension_numbers<[1], [0], [0], [1], [0, 0, 1, 1], [], []>} : vector<16x256xf32>, vector<256x256xf32>, vector<16x256xf32> -> vector<16x256xf32>
    %97 = arith.addf %14, %96 : vector<16x256xf32>
    %c0_46 = arith.constant 0 : index
    %c0_47 = arith.constant 0 : index
    %98 = vector.load %arg9[%c0_46, %c0_47] : memref<1x256xf32, #tpu.memory_space<vmem>>, vector<1x256xf32>
    %99 = vector.broadcast %98 : vector<1x256xf32> to vector<16x256xf32>
    %100 = arith.addf %97, %99 : vector<16x256xf32>
    %c0_48 = arith.constant 0 : index
    %c0_49 = arith.constant 0 : index
    %101 = vector.load %arg10[%c0_48, %c0_49] : memref<1x256xf32, #tpu.memory_space<vmem>>, vector<1x256xf32>
    %c0_50 = arith.constant 0 : index
    %c0_51 = arith.constant 0 : index
    %102 = vector.load %arg11[%c0_50, %c0_51] : memref<1x256xf32, #tpu.memory_space<vmem>>, vector<1x256xf32>
    %cst_52 = arith.constant dense<0.000000e+00> : vector<16xf32>
    %103 = vector.multi_reduction <add>, %100, %cst_52 [1] : vector<16x256xf32> to vector<16xf32>
    %104 = vector.shape_cast %103 : vector<16xf32> to vector<16x1xf32>
    %cst_53 = arith.constant 5.000000e-03 : f32
    %105 = vector.broadcast %cst_53 : f32 to vector<16x1xf32>
    %106 = arith.mulf %104, %105 : vector<16x1xf32>
    %107 = arith.mulf %100, %100 : vector<16x256xf32>
    %cst_54 = arith.constant dense<0.000000e+00> : vector<16xf32>
    %108 = vector.multi_reduction <add>, %107, %cst_54 [1] : vector<16x256xf32> to vector<16xf32>
    %109 = vector.shape_cast %108 : vector<16xf32> to vector<16x1xf32>
    %cst_55 = arith.constant 5.000000e-03 : f32
    %110 = vector.broadcast %cst_55 : f32 to vector<16x1xf32>
    %111 = arith.mulf %109, %110 : vector<16x1xf32>
    %112 = arith.mulf %106, %106 : vector<16x1xf32>
    %113 = arith.subf %111, %112 : vector<16x1xf32>
    %114 = vector.broadcast %106 : vector<16x1xf32> to vector<16x256xf32>
    %115 = arith.subf %100, %114 : vector<16x256xf32>
    %cst_56 = arith.constant 9.99999974E-6 : f32
    %116 = vector.broadcast %cst_56 : f32 to vector<16x1xf32>
    %117 = arith.addf %113, %116 : vector<16x1xf32>
    %118 = math.rsqrt %117 : vector<16x1xf32>
    %119 = vector.broadcast %118 : vector<16x1xf32> to vector<16x256xf32>
    %120 = arith.mulf %115, %119 : vector<16x256xf32>
    %121 = vector.broadcast %101 : vector<1x256xf32> to vector<16x256xf32>
    %122 = arith.mulf %120, %121 : vector<16x256xf32>
    %123 = vector.broadcast %102 : vector<1x256xf32> to vector<16x256xf32>
    %124 = arith.addf %122, %123 : vector<16x256xf32>
    %c0_57 = arith.constant 0 : index
    %c0_58 = arith.constant 0 : index
    %125 = vector.load %arg12[%c0_57, %c0_58] : memref<256x256xf32, #tpu.memory_space<vmem>>, vector<256x256xf32>
    %cst_59 = arith.constant dense<0.000000e+00> : vector<16x256xf32>
    %126 = tpu.matmul %124, %125, %cst_59 {dimension_numbers = #tpu.dot_dimension_numbers<[1], [0], [0], [1], [0, 0, 1, 1], [], []>} : vector<16x256xf32>, vector<256x256xf32>, vector<16x256xf32> -> vector<16x256xf32>
    %c0_60 = arith.constant 0 : index
    %c0_61 = arith.constant 0 : index
    %127 = vector.load %arg13[%c0_60, %c0_61] : memref<1x256xf32, #tpu.memory_space<vmem>>, vector<1x256xf32>
    %128 = vector.broadcast %127 : vector<1x256xf32> to vector<16x256xf32>
    %129 = arith.addf %126, %128 : vector<16x256xf32>
    %cst_62 = arith.constant 0.000000e+00 : f32
    %130 = vector.broadcast %cst_62 : f32 to vector<16x256xf32>
    %131 = arith.maximumf %129, %130 : vector<16x256xf32>
    %c0_63 = arith.constant 0 : index
    %c0_64 = arith.constant 0 : index
    %132 = vector.load %arg14[%c0_63, %c0_64] : memref<256x256xf32, #tpu.memory_space<vmem>>, vector<256x256xf32>
    %cst_65 = arith.constant dense<0.000000e+00> : vector<16x256xf32>
    %133 = tpu.matmul %131, %132, %cst_65 {dimension_numbers = #tpu.dot_dimension_numbers<[1], [0], [0], [1], [0, 0, 1, 1], [], []>} : vector<16x256xf32>, vector<256x256xf32>, vector<16x256xf32> -> vector<16x256xf32>
    %134 = arith.addf %124, %133 : vector<16x256xf32>
    %c0_66 = arith.constant 0 : index
    %c0_67 = arith.constant 0 : index
    %135 = vector.load %arg15[%c0_66, %c0_67] : memref<1x256xf32, #tpu.memory_space<vmem>>, vector<1x256xf32>
    %136 = vector.broadcast %135 : vector<1x256xf32> to vector<16x256xf32>
    %137 = arith.addf %134, %136 : vector<16x256xf32>
    %c0_68 = arith.constant 0 : index
    %c0_69 = arith.constant 0 : index
    %138 = vector.load %arg16[%c0_68, %c0_69] : memref<1x256xf32, #tpu.memory_space<vmem>>, vector<1x256xf32>
    %c0_70 = arith.constant 0 : index
    %c0_71 = arith.constant 0 : index
    %139 = vector.load %arg17[%c0_70, %c0_71] : memref<1x256xf32, #tpu.memory_space<vmem>>, vector<1x256xf32>
    %cst_72 = arith.constant dense<0.000000e+00> : vector<16xf32>
    %140 = vector.multi_reduction <add>, %137, %cst_72 [1] : vector<16x256xf32> to vector<16xf32>
    %141 = vector.shape_cast %140 : vector<16xf32> to vector<16x1xf32>
    %cst_73 = arith.constant 5.000000e-03 : f32
    %142 = vector.broadcast %cst_73 : f32 to vector<16x1xf32>
    %143 = arith.mulf %141, %142 : vector<16x1xf32>
    %144 = arith.mulf %137, %137 : vector<16x256xf32>
    %cst_74 = arith.constant dense<0.000000e+00> : vector<16xf32>
    %145 = vector.multi_reduction <add>, %144, %cst_74 [1] : vector<16x256xf32> to vector<16xf32>
    %146 = vector.shape_cast %145 : vector<16xf32> to vector<16x1xf32>
    %cst_75 = arith.constant 5.000000e-03 : f32
    %147 = vector.broadcast %cst_75 : f32 to vector<16x1xf32>
    %148 = arith.mulf %146, %147 : vector<16x1xf32>
    %149 = arith.mulf %143, %143 : vector<16x1xf32>
    %150 = arith.subf %148, %149 : vector<16x1xf32>
    %151 = vector.broadcast %143 : vector<16x1xf32> to vector<16x256xf32>
    %152 = arith.subf %137, %151 : vector<16x256xf32>
    %cst_76 = arith.constant 9.99999974E-6 : f32
    %153 = vector.broadcast %cst_76 : f32 to vector<16x1xf32>
    %154 = arith.addf %150, %153 : vector<16x1xf32>
    %155 = math.rsqrt %154 : vector<16x1xf32>
    %156 = vector.broadcast %155 : vector<16x1xf32> to vector<16x256xf32>
    %157 = arith.mulf %152, %156 : vector<16x256xf32>
    %158 = vector.broadcast %138 : vector<1x256xf32> to vector<16x256xf32>
    %159 = arith.mulf %157, %158 : vector<16x256xf32>
    %160 = vector.broadcast %139 : vector<1x256xf32> to vector<16x256xf32>
    %161 = arith.addf %159, %160 : vector<16x256xf32>
    %c0_77 = arith.constant 0 : index
    %c0_78 = arith.constant 0 : index
    %162 = vector.load %arg18[%c0_77, %c0_78] : memref<256x768xf32, #tpu.memory_space<vmem>>, vector<256x768xf32>
    %cst_79 = arith.constant dense<0.000000e+00> : vector<16x768xf32>
    %163 = tpu.matmul %161, %162, %cst_79 {dimension_numbers = #tpu.dot_dimension_numbers<[1], [0], [0], [1], [0, 0, 1, 1], [], []>} : vector<16x256xf32>, vector<256x768xf32>, vector<16x768xf32> -> vector<16x768xf32>
    %c0_80 = arith.constant 0 : index
    %c0_81 = arith.constant 0 : index
    %164 = vector.load %arg19[%c0_80, %c0_81] : memref<1x768xf32, #tpu.memory_space<vmem>>, vector<1x768xf32>
    %165 = vector.broadcast %164 : vector<1x768xf32> to vector<16x768xf32>
    %166 = arith.addf %163, %165 : vector<16x768xf32>
    %167 = vector.extract_strided_slice %166 {offsets = [0, 0], sizes = [8, 128], strides = [1, 1]} : vector<16x768xf32> to vector<8x128xf32>
    %168 = vector.extract_strided_slice %166 {offsets = [0, 256], sizes = [8, 128], strides = [1, 1]} : vector<16x768xf32> to vector<8x128xf32>
    %169 = vector.extract_strided_slice %166 {offsets = [0, 512], sizes = [8, 128], strides = [1, 1]} : vector<16x768xf32> to vector<8x128xf32>
    %cst_82 = arith.constant dense<0.000000e+00> : vector<8x8xf32>
    %170 = tpu.matmul %167, %168, %cst_82 {dimension_numbers = #tpu.dot_dimension_numbers<[1], [1], [0], [0], [0, 0, 1, 0], [], []>} : vector<8x128xf32>, vector<8x128xf32>, vector<8x8xf32> -> vector<8x8xf32>
    %171 = arith.addf %170, %20 : vector<8x8xf32>
    %cst_83 = arith.constant dense<0xFF800000> : vector<8xf32>
    %172 = vector.multi_reduction <maximumf>, %171, %cst_83 [1] : vector<8x8xf32> to vector<8xf32>
    %173 = vector.shape_cast %172 : vector<8xf32> to vector<8x1xf32>
    %174 = vector.broadcast %173 : vector<8x1xf32> to vector<8x8xf32>
    %175 = arith.subf %171, %174 : vector<8x8xf32>
    %176 = math.exp %175 : vector<8x8xf32>
    %cst_84 = arith.constant dense<0.000000e+00> : vector<8xf32>
    %177 = vector.multi_reduction <add>, %176, %cst_84 [1] : vector<8x8xf32> to vector<8xf32>
    %178 = vector.shape_cast %177 : vector<8xf32> to vector<8x1xf32>
    %179 = tpu.reciprocal %178 {approx = true} : vector<8x1xf32> -> vector<8x1xf32>
    %180 = vector.broadcast %179 : vector<8x1xf32> to vector<8x8xf32>
    %181 = arith.mulf %176, %180 : vector<8x8xf32>
    %cst_85 = arith.constant dense<0.000000e+00> : vector<8x128xf32>
    %182 = tpu.matmul %181, %169, %cst_85 {dimension_numbers = #tpu.dot_dimension_numbers<[1], [0], [0], [1], [0, 0, 1, 1], [], []>} : vector<8x8xf32>, vector<8x128xf32>, vector<8x128xf32> -> vector<8x128xf32>
    %c0_86 = arith.constant 0 : index
    %c0_87 = arith.constant 0 : index
    %183 = vector.load %arg33[%c0_86, %c0_87] : memref<16x256xf32, #tpu.memory_space<vmem>>, vector<8x128xf32>
    tpu.vector_store %arg33[%c0_86, %c0_87], %182 {strides = array<i32>} : memref<16x256xf32, #tpu.memory_space<vmem>>, vector<8x128xf32>,
    %184 = vector.extract_strided_slice %166 {offsets = [0, 128], sizes = [8, 128], strides = [1, 1]} : vector<16x768xf32> to vector<8x128xf32>
    %185 = vector.extract_strided_slice %166 {offsets = [0, 384], sizes = [8, 128], strides = [1, 1]} : vector<16x768xf32> to vector<8x128xf32>
    %186 = vector.extract_strided_slice %166 {offsets = [0, 640], sizes = [8, 128], strides = [1, 1]} : vector<16x768xf32> to vector<8x128xf32>
    %cst_88 = arith.constant dense<0.000000e+00> : vector<8x8xf32>
    %187 = tpu.matmul %184, %185, %cst_88 {dimension_numbers = #tpu.dot_dimension_numbers<[1], [1], [0], [0], [0, 0, 1, 0], [], []>} : vector<8x128xf32>, vector<8x128xf32>, vector<8x8xf32> -> vector<8x8xf32>
    %188 = arith.addf %187, %20 : vector<8x8xf32>
    %cst_89 = arith.constant dense<0xFF800000> : vector<8xf32>
    %189 = vector.multi_reduction <maximumf>, %188, %cst_89 [1] : vector<8x8xf32> to vector<8xf32>
    %190 = vector.shape_cast %189 : vector<8xf32> to vector<8x1xf32>
    %191 = vector.broadcast %190 : vector<8x1xf32> to vector<8x8xf32>
    %192 = arith.subf %188, %191 : vector<8x8xf32>
    %193 = math.exp %192 : vector<8x8xf32>
    %cst_90 = arith.constant dense<0.000000e+00> : vector<8xf32>
    %194 = vector.multi_reduction <add>, %193, %cst_90 [1] : vector<8x8xf32> to vector<8xf32>
    %195 = vector.shape_cast %194 : vector<8xf32> to vector<8x1xf32>
    %196 = tpu.reciprocal %195 {approx = true} : vector<8x1xf32> -> vector<8x1xf32>
    %197 = vector.broadcast %196 : vector<8x1xf32> to vector<8x8xf32>
    %198 = arith.mulf %193, %197 : vector<8x8xf32>
    %cst_91 = arith.constant dense<0.000000e+00> : vector<8x128xf32>
    %199 = tpu.matmul %198, %186, %cst_91 {dimension_numbers = #tpu.dot_dimension_numbers<[1], [0], [0], [1], [0, 0, 1, 1], [], []>} : vector<8x8xf32>, vector<8x128xf32>, vector<8x128xf32> -> vector<8x128xf32>
    %c0_92 = arith.constant 0 : index
    %c128_93 = arith.constant 128 : index
    %200 = vector.load %arg33[%c0_92, %c128_93] : memref<16x256xf32, #tpu.memory_space<vmem>>, vector<8x128xf32>
    tpu.vector_store %arg33[%c0_92, %c128_93], %199 {strides = array<i32>} : memref<16x256xf32, #tpu.memory_space<vmem>>, vector<8x128xf32>,
    %201 = vector.extract_strided_slice %166 {offsets = [8, 0], sizes = [8, 128], strides = [1, 1]} : vector<16x768xf32> to vector<8x128xf32>
    %202 = vector.extract_strided_slice %166 {offsets = [8, 256], sizes = [8, 128], strides = [1, 1]} : vector<16x768xf32> to vector<8x128xf32>
    %203 = vector.extract_strided_slice %166 {offsets = [8, 512], sizes = [8, 128], strides = [1, 1]} : vector<16x768xf32> to vector<8x128xf32>
    %cst_94 = arith.constant dense<0.000000e+00> : vector<8x8xf32>
    %204 = tpu.matmul %201, %202, %cst_94 {dimension_numbers = #tpu.dot_dimension_numbers<[1], [1], [0], [0], [0, 0, 1, 0], [], []>} : vector<8x128xf32>, vector<8x128xf32>, vector<8x8xf32> -> vector<8x8xf32>
    %205 = arith.addf %204, %20 : vector<8x8xf32>
    %cst_95 = arith.constant dense<0xFF800000> : vector<8xf32>
    %206 = vector.multi_reduction <maximumf>, %205, %cst_95 [1] : vector<8x8xf32> to vector<8xf32>
    %207 = vector.shape_cast %206 : vector<8xf32> to vector<8x1xf32>
    %208 = vector.broadcast %207 : vector<8x1xf32> to vector<8x8xf32>
    %209 = arith.subf %205, %208 : vector<8x8xf32>
    %210 = math.exp %209 : vector<8x8xf32>
    %cst_96 = arith.constant dense<0.000000e+00> : vector<8xf32>
    %211 = vector.multi_reduction <add>, %210, %cst_96 [1] : vector<8x8xf32> to vector<8xf32>
    %212 = vector.shape_cast %211 : vector<8xf32> to vector<8x1xf32>
    %213 = tpu.reciprocal %212 {approx = true} : vector<8x1xf32> -> vector<8x1xf32>
    %214 = vector.broadcast %213 : vector<8x1xf32> to vector<8x8xf32>
    %215 = arith.mulf %210, %214 : vector<8x8xf32>
    %cst_97 = arith.constant dense<0.000000e+00> : vector<8x128xf32>
    %216 = tpu.matmul %215, %203, %cst_97 {dimension_numbers = #tpu.dot_dimension_numbers<[1], [0], [0], [1], [0, 0, 1, 1], [], []>} : vector<8x8xf32>, vector<8x128xf32>, vector<8x128xf32> -> vector<8x128xf32>
    %c8_98 = arith.constant 8 : index
    %c0_99 = arith.constant 0 : index
    %217 = vector.load %arg33[%c8_98, %c0_99] : memref<16x256xf32, #tpu.memory_space<vmem>>, vector<8x128xf32>
    tpu.vector_store %arg33[%c8_98, %c0_99], %216 {strides = array<i32>} : memref<16x256xf32, #tpu.memory_space<vmem>>, vector<8x128xf32>,
    %218 = vector.extract_strided_slice %166 {offsets = [8, 128], sizes = [8, 128], strides = [1, 1]} : vector<16x768xf32> to vector<8x128xf32>
    %219 = vector.extract_strided_slice %166 {offsets = [8, 384], sizes = [8, 128], strides = [1, 1]} : vector<16x768xf32> to vector<8x128xf32>
    %220 = vector.extract_strided_slice %166 {offsets = [8, 640], sizes = [8, 128], strides = [1, 1]} : vector<16x768xf32> to vector<8x128xf32>
    %cst_100 = arith.constant dense<0.000000e+00> : vector<8x8xf32>
    %221 = tpu.matmul %218, %219, %cst_100 {dimension_numbers = #tpu.dot_dimension_numbers<[1], [1], [0], [0], [0, 0, 1, 0], [], []>} : vector<8x128xf32>, vector<8x128xf32>, vector<8x8xf32> -> vector<8x8xf32>
    %222 = arith.addf %221, %20 : vector<8x8xf32>
    %cst_101 = arith.constant dense<0xFF800000> : vector<8xf32>
    %223 = vector.multi_reduction <maximumf>, %222, %cst_101 [1] : vector<8x8xf32> to vector<8xf32>
    %224 = vector.shape_cast %223 : vector<8xf32> to vector<8x1xf32>
    %225 = vector.broadcast %224 : vector<8x1xf32> to vector<8x8xf32>
    %226 = arith.subf %222, %225 : vector<8x8xf32>
    %227 = math.exp %226 : vector<8x8xf32>
    %cst_102 = arith.constant dense<0.000000e+00> : vector<8xf32>
    %228 = vector.multi_reduction <add>, %227, %cst_102 [1] : vector<8x8xf32> to vector<8xf32>
    %229 = vector.shape_cast %228 : vector<8xf32> to vector<8x1xf32>
    %230 = tpu.reciprocal %229 {approx = true} : vector<8x1xf32> -> vector<8x1xf32>
    %231 = vector.broadcast %230 : vector<8x1xf32> to vector<8x8xf32>
    %232 = arith.mulf %227, %231 : vector<8x8xf32>
    %cst_103 = arith.constant dense<0.000000e+00> : vector<8x128xf32>
    %233 = tpu.matmul %232, %220, %cst_103 {dimension_numbers = #tpu.dot_dimension_numbers<[1], [0], [0], [1], [0, 0, 1, 1], [], []>} : vector<8x8xf32>, vector<8x128xf32>, vector<8x128xf32> -> vector<8x128xf32>
    %c8_104 = arith.constant 8 : index
    %c128_105 = arith.constant 128 : index
    %234 = vector.load %arg33[%c8_104, %c128_105] : memref<16x256xf32, #tpu.memory_space<vmem>>, vector<8x128xf32>
    tpu.vector_store %arg33[%c8_104, %c128_105], %233 {strides = array<i32>} : memref<16x256xf32, #tpu.memory_space<vmem>>, vector<8x128xf32>,
    %c0_106 = arith.constant 0 : index
    %c0_107 = arith.constant 0 : index
    %235 = vector.load %arg33[%c0_106, %c0_107] : memref<16x256xf32, #tpu.memory_space<vmem>>, vector<16x256xf32>
    %c0_108 = arith.constant 0 : index
    %c0_109 = arith.constant 0 : index
    %236 = vector.load %arg20[%c0_108, %c0_109] : memref<256x256xf32, #tpu.memory_space<vmem>>, vector<256x256xf32>
    %cst_110 = arith.constant dense<0.000000e+00> : vector<16x256xf32>
    %237 = tpu.matmul %235, %236, %cst_110 {dimension_numbers = #tpu.dot_dimension_numbers<[1], [0], [0], [1], [0, 0, 1, 1], [], []>} : vector<16x256xf32>, vector<256x256xf32>, vector<16x256xf32> -> vector<16x256xf32>
    %238 = arith.addf %161, %237 : vector<16x256xf32>
    %c0_111 = arith.constant 0 : index
    %c0_112 = arith.constant 0 : index
    %239 = vector.load %arg21[%c0_111, %c0_112] : memref<1x256xf32, #tpu.memory_space<vmem>>, vector<1x256xf32>
    %240 = vector.broadcast %239 : vector<1x256xf32> to vector<16x256xf32>
    %241 = arith.addf %238, %240 : vector<16x256xf32>
    %c0_113 = arith.constant 0 : index
    %c0_114 = arith.constant 0 : index
    %242 = vector.load %arg22[%c0_113, %c0_114] : memref<1x256xf32, #tpu.memory_space<vmem>>, vector<1x256xf32>
    %c0_115 = arith.constant 0 : index
    %c0_116 = arith.constant 0 : index
    %243 = vector.load %arg23[%c0_115, %c0_116] : memref<1x256xf32, #tpu.memory_space<vmem>>, vector<1x256xf32>
    %cst_117 = arith.constant dense<0.000000e+00> : vector<16xf32>
    %244 = vector.multi_reduction <add>, %241, %cst_117 [1] : vector<16x256xf32> to vector<16xf32>
    %245 = vector.shape_cast %244 : vector<16xf32> to vector<16x1xf32>
    %cst_118 = arith.constant 5.000000e-03 : f32
    %246 = vector.broadcast %cst_118 : f32 to vector<16x1xf32>
    %247 = arith.mulf %245, %246 : vector<16x1xf32>
    %248 = arith.mulf %241, %241 : vector<16x256xf32>
    %cst_119 = arith.constant dense<0.000000e+00> : vector<16xf32>
    %249 = vector.multi_reduction <add>, %248, %cst_119 [1] : vector<16x256xf32> to vector<16xf32>
    %250 = vector.shape_cast %249 : vector<16xf32> to vector<16x1xf32>
    %cst_120 = arith.constant 5.000000e-03 : f32
    %251 = vector.broadcast %cst_120 : f32 to vector<16x1xf32>
    %252 = arith.mulf %250, %251 : vector<16x1xf32>
    %253 = arith.mulf %247, %247 : vector<16x1xf32>
    %254 = arith.subf %252, %253 : vector<16x1xf32>
    %255 = vector.broadcast %247 : vector<16x1xf32> to vector<16x256xf32>
    %256 = arith.subf %241, %255 : vector<16x256xf32>
    %cst_121 = arith.constant 9.99999974E-6 : f32
    %257 = vector.broadcast %cst_121 : f32 to vector<16x1xf32>
    %258 = arith.addf %254, %257 : vector<16x1xf32>
    %259 = math.rsqrt %258 : vector<16x1xf32>
    %260 = vector.broadcast %259 : vector<16x1xf32> to vector<16x256xf32>
    %261 = arith.mulf %256, %260 : vector<16x256xf32>
    %262 = vector.broadcast %242 : vector<1x256xf32> to vector<16x256xf32>
    %263 = arith.mulf %261, %262 : vector<16x256xf32>
    %264 = vector.broadcast %243 : vector<1x256xf32> to vector<16x256xf32>
    %265 = arith.addf %263, %264 : vector<16x256xf32>
    %c0_122 = arith.constant 0 : index
    %c0_123 = arith.constant 0 : index
    %266 = vector.load %arg24[%c0_122, %c0_123] : memref<256x256xf32, #tpu.memory_space<vmem>>, vector<256x256xf32>
    %cst_124 = arith.constant dense<0.000000e+00> : vector<16x256xf32>
    %267 = tpu.matmul %265, %266, %cst_124 {dimension_numbers = #tpu.dot_dimension_numbers<[1], [0], [0], [1], [0, 0, 1, 1], [], []>} : vector<16x256xf32>, vector<256x256xf32>, vector<16x256xf32> -> vector<16x256xf32>
    %c0_125 = arith.constant 0 : index
    %c0_126 = arith.constant 0 : index
    %268 = vector.load %arg25[%c0_125, %c0_126] : memref<1x256xf32, #tpu.memory_space<vmem>>, vector<1x256xf32>
    %269 = vector.broadcast %268 : vector<1x256xf32> to vector<16x256xf32>
    %270 = arith.addf %267, %269 : vector<16x256xf32>
    %cst_127 = arith.constant 0.000000e+00 : f32
    %271 = vector.broadcast %cst_127 : f32 to vector<16x256xf32>
    %272 = arith.maximumf %270, %271 : vector<16x256xf32>
    %c0_128 = arith.constant 0 : index
    %c0_129 = arith.constant 0 : index
    %273 = vector.load %arg26[%c0_128, %c0_129] : memref<256x256xf32, #tpu.memory_space<vmem>>, vector<256x256xf32>
    %cst_130 = arith.constant dense<0.000000e+00> : vector<16x256xf32>
    %274 = tpu.matmul %272, %273, %cst_130 {dimension_numbers = #tpu.dot_dimension_numbers<[1], [0], [0], [1], [0, 0, 1, 1], [], []>} : vector<16x256xf32>, vector<256x256xf32>, vector<16x256xf32> -> vector<16x256xf32>
    %275 = arith.addf %265, %274 : vector<16x256xf32>
    %c0_131 = arith.constant 0 : index
    %c0_132 = arith.constant 0 : index
    %276 = vector.load %arg27[%c0_131, %c0_132] : memref<1x256xf32, #tpu.memory_space<vmem>>, vector<1x256xf32>
    %277 = vector.broadcast %276 : vector<1x256xf32> to vector<16x256xf32>
    %278 = arith.addf %275, %277 : vector<16x256xf32>
    %c0_133 = arith.constant 0 : index
    %c0_134 = arith.constant 0 : index
    %279 = vector.load %arg28[%c0_133, %c0_134] : memref<1x256xf32, #tpu.memory_space<vmem>>, vector<1x256xf32>
    %c0_135 = arith.constant 0 : index
    %c0_136 = arith.constant 0 : index
    %280 = vector.load %arg29[%c0_135, %c0_136] : memref<1x256xf32, #tpu.memory_space<vmem>>, vector<1x256xf32>
    %cst_137 = arith.constant dense<0.000000e+00> : vector<16xf32>
    %281 = vector.multi_reduction <add>, %278, %cst_137 [1] : vector<16x256xf32> to vector<16xf32>
    %282 = vector.shape_cast %281 : vector<16xf32> to vector<16x1xf32>
    %cst_138 = arith.constant 5.000000e-03 : f32
    %283 = vector.broadcast %cst_138 : f32 to vector<16x1xf32>
    %284 = arith.mulf %282, %283 : vector<16x1xf32>
    %285 = arith.mulf %278, %278 : vector<16x256xf32>
    %cst_139 = arith.constant dense<0.000000e+00> : vector<16xf32>
    %286 = vector.multi_reduction <add>, %285, %cst_139 [1] : vector<16x256xf32> to vector<16xf32>
    %287 = vector.shape_cast %286 : vector<16xf32> to vector<16x1xf32>
    %cst_140 = arith.constant 5.000000e-03 : f32
    %288 = vector.broadcast %cst_140 : f32 to vector<16x1xf32>
    %289 = arith.mulf %287, %288 : vector<16x1xf32>
    %290 = arith.mulf %284, %284 : vector<16x1xf32>
    %291 = arith.subf %289, %290 : vector<16x1xf32>
    %292 = vector.broadcast %284 : vector<16x1xf32> to vector<16x256xf32>
    %293 = arith.subf %278, %292 : vector<16x256xf32>
    %cst_141 = arith.constant 9.99999974E-6 : f32
    %294 = vector.broadcast %cst_141 : f32 to vector<16x1xf32>
    %295 = arith.addf %291, %294 : vector<16x1xf32>
    %296 = math.rsqrt %295 : vector<16x1xf32>
    %297 = vector.broadcast %296 : vector<16x1xf32> to vector<16x256xf32>
    %298 = arith.mulf %293, %297 : vector<16x256xf32>
    %299 = vector.broadcast %279 : vector<1x256xf32> to vector<16x256xf32>
    %300 = arith.mulf %298, %299 : vector<16x256xf32>
    %301 = vector.broadcast %280 : vector<1x256xf32> to vector<16x256xf32>
    %302 = arith.addf %300, %301 : vector<16x256xf32>
    %c0_142 = arith.constant 0 : index
    %c0_143 = arith.constant 0 : index
    %303 = vector.load %arg30[%c0_142, %c0_143] : memref<256x128xf32, #tpu.memory_space<vmem>>, vector<256x128xf32>
    %cst_144 = arith.constant dense<0.000000e+00> : vector<16x128xf32>
    %304 = tpu.matmul %302, %303, %cst_144 {dimension_numbers = #tpu.dot_dimension_numbers<[1], [0], [0], [1], [0, 0, 1, 1], [], []>} : vector<16x256xf32>, vector<256x128xf32>, vector<16x128xf32> -> vector<16x128xf32>
    %c0_145 = arith.constant 0 : index
    %c0_146 = arith.constant 0 : index
    %305 = vector.load %arg31[%c0_145, %c0_146] : memref<1x128xf32, #tpu.memory_space<vmem>>, vector<1x128xf32>
    %306 = vector.broadcast %305 : vector<1x128xf32> to vector<16x128xf32>
    %307 = arith.addf %304, %306 : vector<16x128xf32>
    %c0_147 = arith.constant 0 : index
    %c0_148 = arith.constant 0 : index
    %308 = vector.load %arg32[%c0_147, %c0_148] : memref<16x128xf32, #tpu.memory_space<vmem>>, vector<16x128xf32>
    tpu.vector_store %arg32[%c0_147, %c0_148], %307 {strides = array<i32>} : memref<16x128xf32, #tpu.memory_space<vmem>>, vector<16x128xf32>,
    return
  }
  func.func @transform_0(%arg0: i32) -> (i32, i32) {
    %c0_i32 = arith.constant 0 : i32
    %c0_i32_0 = arith.constant 0 : i32
    %c0_i32_1 = arith.constant 0 : i32
    return %c0_i32, %c0_i32_0 : i32, i32
  }
  func.func @transform_1(%arg0: i32) -> (i32, i32) {
    %c0_i32 = arith.constant 0 : i32
    %c0_i32_0 = arith.constant 0 : i32
    %c0_i32_1 = arith.constant 0 : i32
    return %c0_i32, %c0_i32_0 : i32, i32
  }
  func.func @transform_2(%arg0: i32) -> (i32, i32) {
    %c0_i32 = arith.constant 0 : i32
    %c0_i32_0 = arith.constant 0 : i32
    %c0_i32_1 = arith.constant 0 : i32
    return %c0_i32, %c0_i32_0 : i32, i32
  }
  func.func @transform_3(%arg0: i32) -> (i32, i32) {
    %c0_i32 = arith.constant 0 : i32
    %c0_i32_0 = arith.constant 0 : i32
    %c0_i32_1 = arith.constant 0 : i32
    return %c0_i32, %c0_i32_0 : i32, i32
  }
  func.func @transform_4(%arg0: i32) -> (i32, i32) {
    %c0_i32 = arith.constant 0 : i32
    %c0_i32_0 = arith.constant 0 : i32
    %c0_i32_1 = arith.constant 0 : i32
    return %c0_i32, %c0_i32_0 : i32, i32
  }
  func.func @transform_5(%arg0: i32) -> (i32, i32) {
    %c0_i32 = arith.constant 0 : i32
    %c0_i32_0 = arith.constant 0 : i32
    %c0_i32_1 = arith.constant 0 : i32
    return %c0_i32, %c0_i32_0 : i32, i32
  }
  func.func @transform_6(%arg0: i32) -> (i32, i32) {
    %c0_i32 = arith.constant 0 : i32
    %c0_i32_0 = arith.constant 0 : i32
    %c0_i32_1 = arith.constant 0 : i32
    return %c0_i32, %c0_i32_0 : i32, i32
  }
  func.func @transform_7(%arg0: i32) -> (i32, i32) {
    %c0_i32 = arith.constant 0 : i32
    %c0_i32_0 = arith.constant 0 : i32
    %c0_i32_1 = arith.constant 0 : i32
    return %c0_i32, %c0_i32_0 : i32, i32
  }
  func.func @transform_8(%arg0: i32) -> (i32, i32) {
    %c0_i32 = arith.constant 0 : i32
    %c0_i32_0 = arith.constant 0 : i32
    %c0_i32_1 = arith.constant 0 : i32
    return %c0_i32, %c0_i32_0 : i32, i32
  }
  func.func @transform_9(%arg0: i32) -> (i32, i32) {
    %c0_i32 = arith.constant 0 : i32
    %c0_i32_0 = arith.constant 0 : i32
    %c0_i32_1 = arith.constant 0 : i32
    return %c0_i32, %c0_i32_0 : i32, i32
  }
  func.func @transform_10(%arg0: i32) -> (i32, i32) {
    %c0_i32 = arith.constant 0 : i32
    %c0_i32_0 = arith.constant 0 : i32
    %c0_i32_1 = arith.constant 0 : i32
    return %c0_i32, %c0_i32_0 : i32, i32
  }
  func.func @transform_11(%arg0: i32) -> (i32, i32) {
    %c0_i32 = arith.constant 0 : i32
    %c0_i32_0 = arith.constant 0 : i32
    %c0_i32_1 = arith.constant 0 : i32
    return %c0_i32, %c0_i32_0 : i32, i32
  }
  func.func @transform_12(%arg0: i32) -> (i32, i32) {
    %c0_i32 = arith.constant 0 : i32
    %c0_i32_0 = arith.constant 0 : i32
    %c0_i32_1 = arith.constant 0 : i32
    return %c0_i32, %c0_i32_0 : i32, i32
  }
  func.func @transform_13(%arg0: i32) -> (i32, i32) {
    %c0_i32 = arith.constant 0 : i32
    %c0_i32_0 = arith.constant 0 : i32
    %c0_i32_1 = arith.constant 0 : i32
    return %c0_i32, %c0_i32_0 : i32, i32
  }
  func.func @transform_14(%arg0: i32) -> (i32, i32) {
    %c0_i32 = arith.constant 0 : i32
    %c0_i32_0 = arith.constant 0 : i32
    %c0_i32_1 = arith.constant 0 : i32
    return %c0_i32, %c0_i32_0 : i32, i32
  }
  func.func @transform_15(%arg0: i32) -> (i32, i32) {
    %c0_i32 = arith.constant 0 : i32
    %c0_i32_0 = arith.constant 0 : i32
    %c0_i32_1 = arith.constant 0 : i32
    return %c0_i32, %c0_i32_0 : i32, i32
  }
  func.func @transform_16(%arg0: i32) -> (i32, i32) {
    %c0_i32 = arith.constant 0 : i32
    %c0_i32_0 = arith.constant 0 : i32
    %c0_i32_1 = arith.constant 0 : i32
    return %c0_i32, %c0_i32_0 : i32, i32
  }
  func.func @transform_17(%arg0: i32) -> (i32, i32) {
    %c0_i32 = arith.constant 0 : i32
    %c0_i32_0 = arith.constant 0 : i32
    %c0_i32_1 = arith.constant 0 : i32
    return %c0_i32, %c0_i32_0 : i32, i32
  }
  func.func @transform_18(%arg0: i32) -> (i32, i32) {
    %c0_i32 = arith.constant 0 : i32
    %c0_i32_0 = arith.constant 0 : i32
    %c0_i32_1 = arith.constant 0 : i32
    return %c0_i32, %c0_i32_0 : i32, i32
  }
  func.func @transform_19(%arg0: i32) -> (i32, i32) {
    %c0_i32 = arith.constant 0 : i32
    %c0_i32_0 = arith.constant 0 : i32
    %c0_i32_1 = arith.constant 0 : i32
    return %c0_i32, %c0_i32_0 : i32, i32
  }
  func.func @transform_20(%arg0: i32) -> (i32, i32) {
    %c0_i32 = arith.constant 0 : i32
    %c0_i32_0 = arith.constant 0 : i32
    %c0_i32_1 = arith.constant 0 : i32
    return %c0_i32, %c0_i32_0 : i32, i32
  }
  func.func @transform_21(%arg0: i32) -> (i32, i32) {
    %c0_i32 = arith.constant 0 : i32
    %c0_i32_0 = arith.constant 0 : i32
    %c0_i32_1 = arith.constant 0 : i32
    return %c0_i32, %c0_i32_0 : i32, i32
  }
  func.func @transform_22(%arg0: i32) -> (i32, i32) {
    %c0_i32 = arith.constant 0 : i32
    %c0_i32_0 = arith.constant 0 : i32
    %c0_i32_1 = arith.constant 0 : i32
    return %c0_i32, %c0_i32_0 : i32, i32
  }
  func.func @transform_23(%arg0: i32) -> (i32, i32) {
    %c0_i32 = arith.constant 0 : i32
    %c0_i32_0 = arith.constant 0 : i32
    %c0_i32_1 = arith.constant 0 : i32
    return %c0_i32, %c0_i32_0 : i32, i32
  }
  func.func @transform_24(%arg0: i32) -> (i32, i32) {
    %c0_i32 = arith.constant 0 : i32
    %c0_i32_0 = arith.constant 0 : i32
    %c0_i32_1 = arith.constant 0 : i32
    return %c0_i32, %c0_i32_0 : i32, i32
  }
  func.func @transform_25(%arg0: i32) -> (i32, i32) {
    %c0_i32 = arith.constant 0 : i32
    %c0_i32_0 = arith.constant 0 : i32
    %c0_i32_1 = arith.constant 0 : i32
    return %c0_i32, %c0_i32_0 : i32, i32
  }
  func.func @transform_26(%arg0: i32) -> (i32, i32) {
    %c0_i32 = arith.constant 0 : i32
    %c0_i32_0 = arith.constant 0 : i32
    %c0_i32_1 = arith.constant 0 : i32
    return %c0_i32, %c0_i32_0 : i32, i32
  }
  func.func @transform_27(%arg0: i32) -> (i32, i32) {
    %c0_i32 = arith.constant 0 : i32
    %c0_i32_0 = arith.constant 0 : i32
    %c0_i32_1 = arith.constant 0 : i32
    return %c0_i32, %c0_i32_0 : i32, i32
  }
  func.func @transform_28(%arg0: i32) -> (i32, i32) {
    %c0_i32 = arith.constant 0 : i32
    %c0_i32_0 = arith.constant 0 : i32
    %c0_i32_1 = arith.constant 0 : i32
    return %c0_i32, %c0_i32_0 : i32, i32
  }
  func.func @transform_29(%arg0: i32) -> (i32, i32) {
    %c0_i32 = arith.constant 0 : i32
    %c0_i32_0 = arith.constant 0 : i32
    %c0_i32_1 = arith.constant 0 : i32
    return %c0_i32, %c0_i32_0 : i32, i32
  }
  func.func @transform_30(%arg0: i32) -> (i32, i32) {
    %c0_i32 = arith.constant 0 : i32
    %c0_i32_0 = arith.constant 0 : i32
    %c0_i32_1 = arith.constant 0 : i32
    return %c0_i32, %c0_i32_0 : i32, i32
  }
  func.func @transform_31(%arg0: i32) -> (i32, i32) {
    %c0_i32 = arith.constant 0 : i32
    %c0_i32_0 = arith.constant 0 : i32
    %c0_i32_1 = arith.constant 0 : i32
    return %c0_i32, %c0_i32_0 : i32, i32
  }
}

</mosaic_0001>

<bundles_post_ra>
// kernel: _lambda_.1
= control target key start
LH: loop header
LB: loop body
LE: loop exit
PB: predicated region body
PF: predicated region fallthrough
CT: control target
= control target key end

     0   :  { %s6022_s6 = smov 1   ;;  %s6023_s10 = smov 2   ;;  %s6840_s0 = inlined_call_operand.smem [shape: u32[32], index: -1, kind: input, shape index: {}] }
   0x1   :  { %s6082_s5 = sld [smem:[%s6840_s0]]   ;;  %s6024_s14 = smov 3  }
   0x2   :  { %s6087_s9 = sld [smem:[%s6840_s0 + %s6022_s6]]   ;;  %s6025_s18 = smov 4  }
   0x3   :  { %s6092_s13 = sld [smem:[%s6840_s0 + %s6023_s10]]   ;;  %s6026_s22 = smov 5  }
   0x4   :  { %s6097_s17 = sld [smem:[%s6840_s0 + %s6024_s14]]   ;;  %s6027_s26 = smov 6  }
   0x5   :  { %s6102_s21 = sld [smem:[%s6840_s0 + %s6025_s18]]   ;;  %s6028_s30 = smov 7  }
   0x6   :  { %s6107_s25 = sld [smem:[%s6840_s0 + %s6026_s22]]   ;;  %s6029_s4 = smov 8  }
   0x7   :  { %s6112_s29 = sld [smem:[%s6840_s0 + %s6027_s26]]   ;;  %s6030_s10 = smov 9  }
   0x8   :  { %s6117_s3 = sld [smem:[%s6840_s0 + %s6028_s30]]   ;;  %s6031_s15 = smov 10  }
   0x9   :  { %s6122_s8 = sld [smem:[%s6840_s0 + %s6029_s4]]   ;;  %s6032_s20 = smov 11  }
   0xa   :  { %s6127_s14 = sld [smem:[%s6840_s0 + %s6030_s10]]   ;;  %s6033_s26 = smov 12  }
   0xb   :  { %s6132_s19 = sld [smem:[%s6840_s0 + %s6031_s15]]   ;;  %s6034_s1 = smov 13  }
   0xc   :  { %s6137_s24 = sld [smem:[%s6840_s0 + %s6032_s20]]   ;;  %s6035_s7 = smov 14  }
   0xd   :  { %s6142_s30 = sld [smem:[%s6840_s0 + %s6033_s26]]   ;;  %s6036_s15 = smov 15  }
   0xe   :  { %s6147_s6 = sld [smem:[%s6840_s0 + %s6034_s1]]   ;;  %s6037_s22 = smov 16  }
   0xf   :  { %6841 = sst [smem:[#allocation26_spill]] %s6122_s8  ;;  %s6038_s28 = smov 17  }
  0x10   :  { %6842 = sst [smem:[#allocation27_spill]] %s6127_s14 }
  0x11   :  { %6843 = sst [smem:[#allocation28_spill]] %s6132_s19 }
  0x12   :  { %s6152_s12 = sld [smem:[%s6840_s0 + %s6035_s7]]   ;;  %s6039_s7 = smov 18  }
  0x13   :  { %6844 = sst [smem:[#allocation29_spill]] %s6142_s30 }
  0x14   :  { %s6157_s20 = sld [smem:[%s6840_s0 + %s6036_s15]]   ;;  %s6040_s15 = smov 19  }
  0x15   :  { %s6162_s27 = sld [smem:[%s6840_s0 + %s6037_s22]]   ;;  %s6041_s22 = smov 20  }
  0x16   :  { %s6167_s4 = sld [smem:[%s6840_s0 + %s6038_s28]]   ;;  %s6042_s28 = smov 21  }
  0x17   :  { %s6187_s30 = sld [smem:[%s6840_s0 + %s6042_s28]]   ;;  %s6046_s28 = smov 25  }
  0x18   :  { %6845 = sst [smem:[#allocation30_spill]] %s6152_s12 }
  0x19   :  { %s6172_s12 = sld [smem:[%s6840_s0 + %s6039_s7]]   ;;  %s6043_s7 = smov 22  }
  0x1a   :  { %6846 = sst [smem:[#allocation31_spill]] %s6157_s20 }
  0x1b   :  { %6847 = sst [smem:[#allocation32_spill]] %s6162_s27 }
  0x1c   :  { %s6177_s20 = sld [smem:[%s6840_s0 + %s6040_s15]]   ;;  %s6044_s15 = smov 23  }
  0x1d   :  { %s6182_s27 = sld [smem:[%s6840_s0 + %s6041_s22]]   ;;  %s6045_s22 = smov 24  }
  0x1e   :  { %6850 = sst [smem:[#allocation35_spill]] %s6187_s30 }
  0x1f   :  { %6848 = sst [smem:[#allocation33_spill]] %s6172_s12 }
  0x20   :  { %s6192_s12 = sld [smem:[%s6840_s0 + %s6043_s7]]   ;;  %s6047_s7 = smov 26  }
  0x21   :  { %s6197_s19 = sld [smem:[%s6840_s0 + %s6044_s15]]   ;;  %s6048_s15 = smov 27  }
  0x22   :  { %s6207_s30 = sld [smem:[%s6840_s0 + %s6046_s28]]   ;;  %s6050_s28 = smov 29  }
  0x23   :  { %6849 = sst [smem:[#allocation34_spill]] %s6182_s27 }
  0x24   :  { %s6202_s27 = sld [smem:[%s6840_s0 + %s6045_s22]]   ;;  %s6049_s22 = smov 28  }
  0x25   :  { %s6217_s14 = sld [smem:[%s6840_s0 + %s6048_s15]]   ;;  %s6052_s15 = smov 31  }
  0x26   :  { %6851 = sst [smem:[#allocation36_spill]] %s6192_s12 }
  0x27   :  { %s6212_s12 = sld [smem:[%s6840_s0 + %s6047_s7]]   ;;  %s6051_s7 = smov 30  }
  0x28   :  { %s6227_s8 = sld [smem:[%s6840_s0 + %s6050_s28]]  }
  0x2a   :  { %6852 = sst [smem:[#allocation37_spill]] %s6202_s27 }
  0x2b   :  { %6854 = sst [smem:[#allocation39_spill]] %s6217_s14 }
  0x2c   :  { %s6222_s27 = sld [smem:[%s6840_s0 + %s6049_s22]]  }
  0x2d   :  { %6853 = sst [smem:[#allocation38_spill]] %s6212_s12 }
  0x2e   :  { %s6232_s12 = sld [smem:[%s6840_s0 + %s6051_s7]]  }
  0x2f   :  { %s6237_s14 = sld [smem:[%s6840_s0 + %s6052_s15]]  }
  0x30   :  { %68 = vsyncpa [#allocation4], 0 }
  0x31   :  { %69 = vsyncpa [#allocation6], 0 }
  0x32   :  { %70 = vsyncpa [#allocation9], 0 }
  0x33   :  { %71 = vsyncpa [#allocation12], 0 }
  0x34   :  { %72 = vsyncpa [#allocation15], 0 }
  0x35   :  { %73 = vsyncpa [#allocation18], 0  ;;  %s6053_s22 = smov [#allocation5]   ;;  %s5768_s26 = scalar_lea.hbm %s6097_s17, 16384 }
  0x36   :  { %s95_s23 = sshll.u32 %s6053_s22, 4  ;;  %p5769_p0 = scmp.ne.s32.totalorder %s6097_s17, %s5768_s26  ;;  %s96_s23 = int_to_ptr.vmem [resolvable:$true] %s95_s23 }
  0x37   :  { %p5772_p1 = scmp.lt.u32.totalorder %s5768_s26, %s6097_s17 }
  0x39   :  { %p5774_p2 = pnand %p5772_p1, %p5769_p0 }
  0x3b   :  { %5777 = shalt.err (!%p5774_p2)
}
  0x3c   :  { %s5778_s28 = scalar_lea.vmem %s96_s23, 16384  ;;  %p5783_p4 = scmp.lt.s32.totalorder %s96_s23, %s96_s23 }
  0x3d   :  { %p5779_p3 = scmp.ne.s32.totalorder %s96_s23, %s5778_s28  ;;  %p5784_p5 = scmp.lt.s32.totalorder %s5778_s28, %s5778_s28 }
  0x3f   :  { %p5785_p6 = por %p5784_p5, %p5783_p4 }
  0x41   :  { %p5786_p7 = pnand %p5785_p6, %p5779_p3 }
  0x43   :  { %5789 = shalt.err (!%p5786_p7)
}
  0x44   :  { %s6054_s0 = smov 256   ;;  %s6055_s1 = smov 16  }
  0x45   :  { %101 = dma.hbm_to_vmem [thread:$0]  %s6097_s17, 16384, %s96_s23, [#allocation6], %s6054_s0, %s6054_s0, %s6055_s1  }
  0x46   :  { %s6056_s2 = smov [#allocation8]   ;;  %s6057_s10 = smov [#allocation11]  }
  0x47   :  { %s123_s7 = sshll.u32 %s6056_s2, 4  ;;  %s155_s11 = sshll.u32 %s6057_s10, 4  ;;  %s124_s7 = int_to_ptr.vmem [resolvable:$true] %s123_s7  ;;  %s156_s11 = int_to_ptr.vmem [resolvable:$true] %s155_s11 }
  0x48   :  { %s5790_s15 = scalar_lea.hbm %s6117_s3, 8192 }
  0x49   :  { %p5791_p8 = scmp.ne.s32.totalorder %s6117_s3, %s5790_s15  ;;  %p5794_p9 = scmp.lt.u32.totalorder %s5790_s15, %s6117_s3 }
  0x4b   :  { %p5796_p10 = pnand %p5794_p9, %p5791_p8 }
  0x4d   :  { %5799 = shalt.err (!%p5796_p10)
}
  0x4e   :  { %s5800_s16 = scalar_lea.vmem %s124_s7, 8192  ;;  %p5805_p12 = scmp.lt.s32.totalorder %s124_s7, %s124_s7 }
  0x4f   :  { %p5801_p11 = scmp.ne.s32.totalorder %s124_s7, %s5800_s16  ;;  %p5806_p13 = scmp.lt.s32.totalorder %s5800_s16, %s5800_s16 }
  0x51   :  { %p5807_p0 = por %p5806_p13, %p5805_p12 }
  0x53   :  { %p5808_p1 = pnand %p5807_p0, %p5801_p11 }
  0x55   :  { %5811 = shalt.err (!%p5808_p1)
}
  0x56   :  { %129 = dma.hbm_to_vmem [thread:$0]  %s6117_s3, 8192, %s124_s7, [#allocation9], %s6054_s0, %s6054_s0, %s6055_s1  }
  0x57   :  { %s5812_s17 = scalar_lea.hbm %s6147_s6, 8192 }
  0x58   :  { %p5813_p2 = scmp.ne.s32.totalorder %s6147_s6, %s5812_s17  ;;  %p5816_p3 = scmp.lt.u32.totalorder %s5812_s17, %s6147_s6 }
  0x5a   :  { %p5818_p4 = pnand %p5816_p3, %p5813_p2 }
  0x5c   :  { %5821 = shalt.err (!%p5818_p4)
}
  0x5d   :  { %s5822_s18 = scalar_lea.vmem %s156_s11, 8192  ;;  %p5827_p6 = scmp.lt.s32.totalorder %s156_s11, %s156_s11 }
  0x5e   :  { %p5823_p5 = scmp.ne.s32.totalorder %s156_s11, %s5822_s18  ;;  %p5828_p7 = scmp.lt.s32.totalorder %s5822_s18, %s5822_s18 }
  0x60   :  { %p5829_p8 = por %p5828_p7, %p5827_p6 }
  0x62   :  { %p5830_p9 = pnand %p5829_p8, %p5823_p5 }
  0x64   :  { %5833 = shalt.err (!%p5830_p9)
}
  0x65   :  { %161 = dma.hbm_to_vmem [thread:$0]  %s6147_s6, 8192, %s156_s11, [#allocation12], %s6054_s0, %s6054_s0, %s6055_s1  }
  0x66   :  { %s6058_s3 = smov [#allocation14]   ;;  %s6059_s23 = smov [#allocation17]  }
  0x67   :  { %s187_s22 = sshll.u32 %s6058_s3, 4  ;;  %s219_s26 = sshll.u32 %s6059_s23, 4  ;;  %s188_s22 = int_to_ptr.vmem [resolvable:$true] %s187_s22  ;;  %s220_s26 = int_to_ptr.vmem [resolvable:$true] %s219_s26 }
  0x68   :  { %s5834_s28 = scalar_lea.hbm %s6177_s20, 8192 }
  0x69   :  { %p5835_p10 = scmp.ne.s32.totalorder %s6177_s20, %s5834_s28  ;;  %p5838_p11 = scmp.lt.u32.totalorder %s5834_s28, %s6177_s20 }
  0x6b   :  { %p5840_p12 = pnand %p5838_p11, %p5835_p10 }
  0x6d   :  { %5843 = shalt.err (!%p5840_p12)
}
  0x6e   :  { %s5844_s2 = scalar_lea.vmem %s188_s22, 8192  ;;  %p5849_p0 = scmp.lt.s32.totalorder %s188_s22, %s188_s22 }
  0x6f   :  { %p5845_p13 = scmp.ne.s32.totalorder %s188_s22, %s5844_s2  ;;  %p5850_p1 = scmp.lt.s32.totalorder %s5844_s2, %s5844_s2 }
  0x71   :  { %p5851_p2 = por %p5850_p1, %p5849_p0 }
  0x73   :  { %p5852_p3 = pnand %p5851_p2, %p5845_p13 }
  0x75   :  { %5855 = shalt.err (!%p5852_p3)
}
  0x76   :  { %193 = dma.hbm_to_vmem [thread:$0]  %s6177_s20, 8192, %s188_s22, [#allocation15], %s6054_s0, %s6054_s0, %s6055_s1  }
  0x77   :  { %s5856_s6 = scalar_lea.hbm %s6207_s30, 8192 }
  0x78   :  { %p5857_p4 = scmp.ne.s32.totalorder %s6207_s30, %s5856_s6  ;;  %p5860_p5 = scmp.lt.u32.totalorder %s5856_s6, %s6207_s30 }
  0x7a   :  { %p5862_p6 = pnand %p5860_p5, %p5857_p4 }
  0x7c   :  { %5865 = shalt.err (!%p5862_p6)
}
  0x7d   :  { %s5866_s7 = scalar_lea.vmem %s220_s26, 8192  ;;  %p5871_p8 = scmp.lt.s32.totalorder %s220_s26, %s220_s26 }
  0x7e   :  { %p5867_p7 = scmp.ne.s32.totalorder %s220_s26, %s5866_s7  ;;  %p5872_p9 = scmp.lt.s32.totalorder %s5866_s7, %s5866_s7 }
  0x80   :  { %p5873_p10 = por %p5872_p9, %p5871_p8 }
  0x82   :  { %p5874_p11 = pnand %p5873_p10, %p5867_p7 }
  0x84   :  { %5877 = shalt.err (!%p5874_p11)
}
  0x85   :  { %225 = dma.hbm_to_vmem [thread:$0]  %s6207_s30, 8192, %s220_s26, [#allocation18], %s6054_s0, %s6054_s0, %s6055_s1  }
  0x86   :  { %s6060_s20 = smov [#allocation3]   ;;  %s5878_s11 = scalar_lea.hbm %s6087_s9, 16384 }
  0x87   :  { %s81_s10 = sshll.u32 %s6060_s20, 4  ;;  %p5879_p12 = scmp.ne.s32.totalorder %s6087_s9, %s5878_s11  ;;  %s82_s10 = int_to_ptr.vmem [resolvable:$true] %s81_s10 }
  0x88   :  { %p5882_p13 = scmp.lt.u32.totalorder %s5878_s11, %s6087_s9 }
  0x8a   :  { %p5884_p0 = pnand %p5882_p13, %p5879_p12 }
  0x8c   :  { %5887 = shalt.err (!%p5884_p0)
}
  0x8d   :  { %s5888_s15 = scalar_lea.vmem %s82_s10, 16384  ;;  %p5893_p2 = scmp.lt.s32.totalorder %s82_s10, %s82_s10 }
  0x8e   :  { %p5889_p1 = scmp.ne.s32.totalorder %s82_s10, %s5888_s15  ;;  %p5894_p3 = scmp.lt.s32.totalorder %s5888_s15, %s5888_s15 }
  0x90   :  { %p5895_p4 = por %p5894_p3, %p5893_p2 }
  0x92   :  { %p5896_p5 = pnand %p5895_p4, %p5889_p1 }
  0x94   :  { %5899 = shalt.err (!%p5896_p5)
}
  0x95   :  { %s6061_s16 = smov 512   ;;  %s6062_s30 = smov 32  }
  0x96   :  { %87 = dma.hbm_to_vmem [thread:$0]  %s6087_s9, 16384, %s82_s10, [#allocation4], %s6061_s16, %s6061_s16, %s6062_s30  }
  0x97   :  { %s6063_s17 = smov [#allocation7]   ;;  %s5900_s3 = scalar_lea.hbm %s6107_s25, 24576 }
  0x98   :  { %s109_s18 = sshll.u32 %s6063_s17, 4  ;;  %p5901_p6 = scmp.ne.s32.totalorder %s6107_s25, %s5900_s3  ;;  %s110_s18 = int_to_ptr.vmem [resolvable:$true] %s109_s18 }
  0x99   :  { %p5904_p7 = scmp.lt.u32.totalorder %s5900_s3, %s6107_s25 }
  0x9b   :  { %p5906_p8 = pnand %p5904_p7, %p5901_p6 }
  0x9d   :  { %5909 = shalt.err (!%p5906_p8)
}
  0x9e   :  { %s5910_s22 = scalar_lea.vmem %s110_s18, 24576  ;;  %p5915_p10 = scmp.lt.s32.totalorder %s110_s18, %s110_s18 }
  0x9f   :  { %p5911_p9 = scmp.ne.s32.totalorder %s110_s18, %s5910_s22  ;;  %p5916_p11 = scmp.lt.s32.totalorder %s5910_s22, %s5910_s22 }
  0xa1   :  { %p5917_p12 = por %p5916_p11, %p5915_p10 }
  0xa3   :  { %p5918_p13 = pnand %p5917_p12, %p5911_p9 }
  0xa5   :  { %5921 = shalt.err (!%p5918_p13)
}
  0xa6   :  { %s6064_s23 = smov 768   ;;  %s6065_s9 = smov 48  }
  0xa7   :  { %115 = dma.hbm_to_vmem [thread:$0]  %s6107_s25, 24576, %s110_s18, [#allocation6], %s6064_s23, %s6064_s23, %s6065_s9  }
  0xa8   :  { %s6066_s26 = smov [#allocation10]   ;;  %s6067_s2 = smov [#allocation13]  }
  0xa9   :  { %s141_s28 = sshll.u32 %s6066_s26, 4  ;;  %s173_s6 = sshll.u32 %s6067_s2, 4  ;;  %s142_s28 = int_to_ptr.vmem [resolvable:$true] %s141_s28  ;;  %s174_s6 = int_to_ptr.vmem [resolvable:$true] %s173_s6 }
  0xaa   :  { %s5922_s7 = scalar_lea.hbm %s6137_s24, 8192 }
  0xab   :  { %p5923_p0 = scmp.ne.s32.totalorder %s6137_s24, %s5922_s7  ;;  %p5926_p1 = scmp.lt.u32.totalorder %s5922_s7, %s6137_s24 }
  0xad   :  { %p5928_p2 = pnand %p5926_p1, %p5923_p0 }
  0xaf   :  { %5931 = shalt.err (!%p5928_p2)
}
  0xb0   :  { %s5932_s20 = scalar_lea.vmem %s142_s28, 8192  ;;  %p5937_p4 = scmp.lt.s32.totalorder %s142_s28, %s142_s28 }
  0xb1   :  { %p5933_p3 = scmp.ne.s32.totalorder %s142_s28, %s5932_s20  ;;  %p5938_p5 = scmp.lt.s32.totalorder %s5932_s20, %s5932_s20 }
  0xb3   :  { %p5939_p6 = por %p5938_p5, %p5937_p4 }
  0xb5   :  { %p5940_p7 = pnand %p5939_p6, %p5933_p3 }
  0xb7   :  { %5943 = shalt.err (!%p5940_p7)
}
  0xb8   :  { %147 = dma.hbm_to_vmem [thread:$0]  %s6137_s24, 8192, %s142_s28, [#allocation9], %s6054_s0, %s6054_s0, %s6055_s1  }
  0xb9   :  { %s5944_s25 = scalar_lea.hbm %s6167_s4, 24576 }
  0xba   :  { %p5945_p8 = scmp.ne.s32.totalorder %s6167_s4, %s5944_s25  ;;  %p5948_p9 = scmp.lt.u32.totalorder %s5944_s25, %s6167_s4 }
  0xbc   :  { %p5950_p10 = pnand %p5948_p9, %p5945_p8 }
  0xbe   :  { %5953 = shalt.err (!%p5950_p10)
}
  0xbf   :  { %s5954_s10 = scalar_lea.vmem %s174_s6, 24576  ;;  %p5959_p12 = scmp.lt.s32.totalorder %s174_s6, %s174_s6 }
  0xc0   :  { %p5955_p11 = scmp.ne.s32.totalorder %s174_s6, %s5954_s10  ;;  %p5960_p13 = scmp.lt.s32.totalorder %s5954_s10, %s5954_s10 }
  0xc2   :  { %p5961_p0 = por %p5960_p13, %p5959_p12 }
  0xc4   :  { %p5962_p1 = pnand %p5961_p0, %p5955_p11 }
  0xc6   :  { %5965 = shalt.err (!%p5962_p1)
}
  0xc7   :  { %179 = dma.hbm_to_vmem [thread:$0]  %s6167_s4, 24576, %s174_s6, [#allocation12], %s6064_s23, %s6064_s23, %s6065_s9  }
  0xc8   :  { %s6068_s24 = smov [#allocation16]   ;;  %s6069_s15 = smov [#allocation19]  }
  0xc9   :  { %s205_s11 = sshll.u32 %s6068_s24, 4  ;;  %s237_s16 = sshll.u32 %s6069_s15, 4  ;;  %s206_s11 = int_to_ptr.vmem [resolvable:$true] %s205_s11  ;;  %s238_s16 = int_to_ptr.vmem [resolvable:$true] %s237_s16 }
  0xca   :  { %s5966_s30 = scalar_lea.hbm %s6197_s19, 8192 }
  0xcb   :  { %p5967_p2 = scmp.ne.s32.totalorder %s6197_s19, %s5966_s30  ;;  %p5970_p3 = scmp.lt.u32.totalorder %s5966_s30, %s6197_s19 }
  0xcd   :  { %p5972_p4 = pnand %p5970_p3, %p5967_p2 }
  0xcf   :  { %5975 = shalt.err (!%p5972_p4)
}
  0xd0   :  { %s5976_s17 = scalar_lea.vmem %s206_s11, 8192  ;;  %p5981_p6 = scmp.lt.s32.totalorder %s206_s11, %s206_s11 }
  0xd1   :  { %p5977_p5 = scmp.ne.s32.totalorder %s206_s11, %s5976_s17  ;;  %p5982_p7 = scmp.lt.s32.totalorder %s5976_s17, %s5976_s17 }
  0xd3   :  { %p5983_p8 = por %p5982_p7, %p5981_p6 }
  0xd5   :  { %p5984_p9 = pnand %p5983_p8, %p5977_p5 }
  0xd7   :  { %5987 = shalt.err (!%p5984_p9)
}
  0xd8   :  { %211 = dma.hbm_to_vmem [thread:$0]  %s6197_s19, 8192, %s206_s11, [#allocation15], %s6054_s0, %s6054_s0, %s6055_s1  }
  0xd9   :  { %s5988_s4 = scalar_lea.hbm %s6227_s8, 4096 }
  0xda   :  { %p5989_p10 = scmp.ne.s32.totalorder %s6227_s8, %s5988_s4  ;;  %p5992_p11 = scmp.lt.u32.totalorder %s5988_s4, %s6227_s8 }
  0xdc   :  { %p5994_p12 = pnand %p5992_p11, %p5989_p10 }
  0xde   :  { %5997 = shalt.err (!%p5994_p12)
}
  0xdf   :  { %s5998_s18 = scalar_lea.vmem %s238_s16, 4096  ;;  %p6003_p0 = scmp.lt.s32.totalorder %s238_s16, %s238_s16 }
  0xe0   :  { %p5999_p13 = scmp.ne.s32.totalorder %s238_s16, %s5998_s18  ;;  %p6004_p1 = scmp.lt.s32.totalorder %s5998_s18, %s5998_s18 }
  0xe2   :  { %p6005_p2 = por %p6004_p1, %p6003_p0 }
  0xe4   :  { %p6006_p3 = pnand %p6005_p2, %p5999_p13 }
  0xe6   :  { %6009 = shalt.err (!%p6006_p3)
}
  0xe7   :  { %s6070_s3 = smov 128   ;;  %s6071_s22 = smov 8  }
  0xe8   :  { %243 = dma.hbm_to_vmem [thread:$0]  %s6227_s8, 4096, %s238_s16, [#allocation18], %s6070_s3, %s6070_s3, %s6071_s22  }
  0xe9   :  { %6010 = dma.done.wait [#allocation4], 16384  }
  0xea   :  { %6011 = vsyncadd [#allocation4], 4294950912 }
  0xeb   :  { %6012 = dma.done.wait [#allocation6], 40960  }
  0xec   :  { %6013 = vsyncadd [#allocation6], 4294926336 }
  0xed   :  { %6014 = dma.done.wait [#allocation9], 16384  }
  0xee   :  { %6015 = vsyncadd [#allocation9], 4294950912 }
  0xef   :  { %6016 = dma.done.wait [#allocation12], 32768  }
  0xf0   :  { %6017 = vsyncadd [#allocation12], 4294934528 }
  0xf1   :  { %6018 = dma.done.wait [#allocation15], 16384  }
  0xf2   :  { %6019 = vsyncadd [#allocation15], 4294950912 }
  0xf3   :  { %6020 = dma.done.wait [#allocation18], 12288  }
  0xf4   :  { %6021 = vsyncadd [#allocation18], 4294955008  ;;  %v284_v0 = vld [vmem:[#allocation3 + $0x8] sm:$0xff]  ;;  %v283_v2 = vld [vmem:[#allocation3] sm:$0xff]  ;;  %vm6073_vm0 = vmmov 0   ;;  %vm1424_vm2 = vcmask 64512  }
  0xf5   :  { %v288_v1 = vld [vmem:[#allocation3 + $0x28] sm:$0xff]  ;;  %v287_v4 = vld [vmem:[#allocation3 + $0x20] sm:$0xff]  ;;  %v286_v43 = vld [vmem:[#allocation3 + $0x18] sm:$0xff]  ;;  %s6859_s8 = sld [smem:[#allocation30_spill]]  ;;  %s6860_s19 = sld [smem:[#allocation31_spill]] }
  0xf6   :  { %v4604_v3 = vpack.c.bf16 %v288_v1, %v284_v0  ;;  %v292_v5 = vld [vmem:[#allocation3 + $0x48] sm:$0xff]  ;;  %v4606_v7 = vpack.c.bf16 %v287_v4, %v283_v2  ;;  %v291_v9 = vld [vmem:[#allocation3 + $0x40] sm:$0xff]  ;;  %v290_v44 = vld [vmem:[#allocation3 + $0x38] sm:$0xff]  ;;  %s6861_s0 = sld [smem:[#allocation32_spill]]  ;;  %s6862_s1 = sld [smem:[#allocation33_spill]] }
  0xf7   :  { %v296_v6 = vld [vmem:[#allocation3 + $0x68] sm:$0xff]  ;;  %v295_v10 = vld [vmem:[#allocation3 + $0x60] sm:$0xff]  ;;  %v4668_v45 = vpack.c.bf16 %v290_v44, %v286_v43  ;;  %v285_v47 = vld [vmem:[#allocation3 + $0x10] sm:$0xff]  ;;  %s6863_s23 = sld [smem:[#allocation34_spill]]  ;;  %s6864_s9 = sld [smem:[#allocation35_spill]] }
  0xf8   :  { %v4608_v8 = vpack.c.bf16 %v296_v6, %v292_v5  ;;  %v300_v11 = vld [vmem:[#allocation3 + $0x88] sm:$0xff]  ;;  %4605 = vmatprep.subr.bf16.mxu0 %v4604_v3  ;;  %v4610_v13 = vpack.c.bf16 %v295_v10, %v291_v9  ;;  %v299_v15 = vld [vmem:[#allocation3 + $0x80] sm:$0xff]  ;;  %v289_v48 = vld [vmem:[#allocation3 + $0x30] sm:$0xff]  ;;  %s6865_s26 = sld [smem:[#allocation36_spill]]  ;;  %s6866_s28 = sld [smem:[#allocation37_spill]] }
  0xf9   :  { %v304_v12 = vld [vmem:[#allocation3 + $0xa8] sm:$0xff]  ;;  %4607 = vmatpush1.bf16.msra.mxu0 %v4606_v7  ;;  %v303_v16 = vld [vmem:[#allocation3 + $0xa0] sm:$0xff]  ;;  %v4670_v50 = vpack.c.bf16 %v289_v48, %v285_v47  ;;  %v294_v51 = vld [vmem:[#allocation3 + $0x58] sm:$0xff]  ;;  %4669 = vmatprep.subr.bf16.mxu1 %v4668_v45  ;;  %s6867_s2 = sld [smem:[#allocation38_spill]]  ;;  %s6868_s6 = sld [smem:[#allocation39_spill]] }
  0xfa   :  { %4609 = vmatprep.subr.bf16.mxu0 %v4608_v8  ;;  %v4612_v14 = vpack.c.bf16 %v304_v12, %v300_v11  ;;  %v308_v17 = vld [vmem:[#allocation3 + $0xc8] sm:$0xff]  ;;  %v4614_v19 = vpack.c.bf16 %v303_v16, %v299_v15  ;;  %v307_v21 = vld [vmem:[#allocation3 + $0xc0] sm:$0xff]  ;;  %v298_v52 = vld [vmem:[#allocation3 + $0x78] sm:$0xff] }
  0xfb   :  { %v312_v18 = vld [vmem:[#allocation3 + $0xe8] sm:$0xff]  ;;  %v311_v22 = vld [vmem:[#allocation3 + $0xe0] sm:$0xff]  ;;  %v4672_v54 = vpack.c.bf16 %v298_v52, %v294_v51  ;;  %v293_v55 = vld [vmem:[#allocation3 + $0x50] sm:$0xff]  ;;  %4671 = vmatpush1.bf16.msra.mxu1 %v4670_v50 }
  0xfc   :  { %v4616_v20 = vpack.c.bf16 %v312_v18, %v308_v17  ;;  %v316_v23 = vld [vmem:[#allocation3 + $0x108] sm:$0xff]  ;;  %v4618_v25 = vpack.c.bf16 %v311_v22, %v307_v21  ;;  %v315_v27 = vld [vmem:[#allocation3 + $0x100] sm:$0xff]  ;;  %v297_v56 = vld [vmem:[#allocation3 + $0x70] sm:$0xff] }
  0xfd   :  { %4611 = vmatpush1.bf16.msra.mxu0 %v4610_v13  ;;  %v320_v24 = vld [vmem:[#allocation3 + $0x128] sm:$0xff]  ;;  %v319_v28 = vld [vmem:[#allocation3 + $0x120] sm:$0xff]  ;;  %v302_v57 = vld [vmem:[#allocation3 + $0x98] sm:$0xff]  ;;  %v4674_v61 = vpack.c.bf16 %v297_v56, %v293_v55  ;;  %4673 = vmatprep.subr.bf16.mxu1 %v4672_v54 }
  0xfe   :  { %4613 = vmatprep.subr.bf16.mxu0 %v4612_v14  ;;  %v4620_v26 = vpack.c.bf16 %v320_v24, %v316_v23  ;;  %v324_v29 = vld [vmem:[#allocation3 + $0x148] sm:$0xff]  ;;  %v4622_v31 = vpack.c.bf16 %v319_v28, %v315_v27  ;;  %v323_v33 = vld [vmem:[#allocation3 + $0x140] sm:$0xff]  ;;  %v306_v62 = vld [vmem:[#allocation3 + $0xb8] sm:$0xff] }
  0xff   :  { %v328_v30 = vld [vmem:[#allocation3 + $0x168] sm:$0xff]  ;;  %v327_v34 = vld [vmem:[#allocation3 + $0x160] sm:$0xff]  ;;  %v4676_v0 = vpack.c.bf16 %v306_v62, %v302_v57  ;;  %v301_v1 = vld [vmem:[#allocation3 + $0x90] sm:$0xff]  ;;  %4675 = vmatpush1.bf16.msra.mxu1 %v4674_v61 }
 0x100   :  { %v4624_v32 = vpack.c.bf16 %v328_v30, %v324_v29  ;;  %v332_v35 = vld [vmem:[#allocation3 + $0x188] sm:$0xff]  ;;  %v4626_v37 = vpack.c.bf16 %v327_v34, %v323_v33  ;;  %v331_v38 = vld [vmem:[#allocation3 + $0x180] sm:$0xff]  ;;  %v305_v2 = vld [vmem:[#allocation3 + $0xb0] sm:$0xff] }
 0x101   :  { %4615 = vmatpush1.bf16.msra.mxu0 %v4614_v19  ;;  %v336_v36 = vld [vmem:[#allocation3 + $0x1a8] sm:$0xff]  ;;  %v335_v39 = vld [vmem:[#allocation3 + $0x1a0] sm:$0xff]  ;;  %v310_v3 = vld [vmem:[#allocation3 + $0xd8] sm:$0xff]  ;;  %v4678_v10 = vpack.c.bf16 %v305_v2, %v301_v1  ;;  %4677 = vmatprep.subr.bf16.mxu1 %v4676_v0 }
 0x102   :  { %4617 = vmatprep.subr.bf16.mxu0 %v4616_v20  ;;  %v340_v40 = vld [vmem:[#allocation3 + $0x1c8] sm:$0xff]  ;;  %v4628_v41 = vpack.c.bf16 %v336_v36, %v332_v35  ;;  %v339_v49 = vld [vmem:[#allocation3 + $0x1c0] sm:$0xff]  ;;  %v4630_v53 = vpack.c.bf16 %v335_v39, %v331_v38  ;;  %v314_v4 = vld [vmem:[#allocation3 + $0xf8] sm:$0xff] }
 0x103   :  { %v344_v42 = vld [vmem:[#allocation3 + $0x1e8] sm:$0xff]  ;;  %v343_v59 = vld [vmem:[#allocation3 + $0x1e0] sm:$0xff]  ;;  %v4680_v12 = vpack.c.bf16 %v314_v4, %v310_v3  ;;  %v309_v13 = vld [vmem:[#allocation3 + $0xd0] sm:$0xff]  ;;  %4679 = vmatpush1.bf16.msra.mxu1 %v4678_v10 }
 0x104   :  { %v280_v46 = vld [vmem:[%s6082_s5 + $0x8] sm:$0xff]  ;;  %v4632_v58 = vpack.c.bf16 %v344_v42, %v340_v40  ;;  %v4634_v5 = vpack.c.bf16 %v343_v59, %v339_v49  ;;  %v347_v7 = vld [vmem:[#allocation3 + $0x200] sm:$0xff]  ;;  %v313_v14 = vld [vmem:[#allocation3 + $0xf0] sm:$0xff] }
 0x105   :  { %4619 = vmatpush1.bf16.msra.mxu0 %v4618_v25  ;;  %497 = vmatprep.mubr.f32.mxu0 %v280_v46  ;;  %v348_v60 = vld [vmem:[#allocation3 + $0x208] sm:$0xff]  ;;  %v351_v8 = vld [vmem:[#allocation3 + $0x220] sm:$0xff]  ;;  %v318_v15 = vld [vmem:[#allocation3 + $0x118] sm:$0xff]  ;;  %v4682_v22 = vpack.c.bf16 %v313_v14, %v309_v13 }
 0x106   :  { %4621 = vmatprep.subr.bf16.mxu0 %v4620_v26  ;;  %574 = vmatprep.mubr.f32.mxu1 %v280_v46  ;;  %v352_v63 = vld [vmem:[#allocation3 + $0x228] sm:$0xff]  ;;  %v322_v16 = vld [vmem:[#allocation3 + $0x138] sm:$0xff]  ;;  %v4638_v17 = vpack.c.bf16 %v351_v8, %v347_v7  ;;  %v355_v19 = vld [vmem:[#allocation3 + $0x240] sm:$0xff] }
 0x107   :  { %v4636_v6 = vpack.c.bf16 %v352_v63, %v348_v60  ;;  %v356_v9 = vld [vmem:[#allocation3 + $0x248] sm:$0xff]  ;;  %v359_v20 = vld [vmem:[#allocation3 + $0x260] sm:$0xff]  ;;  %4681 = vmatprep.subr.bf16.mxu1 %v4680_v12  ;;  %v4684_v24 = vpack.c.bf16 %v322_v16, %v318_v15  ;;  %v317_v25 = vld [vmem:[#allocation3 + $0x110] sm:$0xff] }
 0x108   :  { %v360_v11 = vld [vmem:[#allocation3 + $0x268] sm:$0xff]  ;;  %v321_v26 = vld [vmem:[#allocation3 + $0x130] sm:$0xff]  ;;  %v326_v27 = vld [vmem:[#allocation3 + $0x158] sm:$0xff]  ;;  %v4642_v29 = vpack.c.bf16 %v359_v20, %v355_v19  ;;  %4683 = vmatpush1.bf16.msra.mxu1 %v4682_v22 }
 0x109   :  { %4623 = vmatpush1.bf16.msra.mxu0 %v4622_v31  ;;  %v4640_v18 = vpack.c.bf16 %v360_v11, %v356_v9  ;;  %v364_v21 = vld [vmem:[#allocation3 + $0x288] sm:$0xff]  ;;  %v330_v28 = vld [vmem:[#allocation3 + $0x178] sm:$0xff]  ;;  %v363_v31 = vld [vmem:[#allocation3 + $0x280] sm:$0xff]  ;;  %v4686_v34 = vpack.c.bf16 %v321_v26, %v317_v25  ;;  %4685 = vmatprep.subr.bf16.mxu1 %v4684_v24 }
 0x10a   :  { %4625 = vmatprep.subr.bf16.mxu0 %v4624_v32  ;;  %v368_v23 = vld [vmem:[#allocation3 + $0x2a8] sm:$0xff]  ;;  %v367_v32 = vld [vmem:[#allocation3 + $0x2a0] sm:$0xff]  ;;  %v4688_v36 = vpack.c.bf16 %v330_v28, %v326_v27  ;;  %v329_v38 = vld [vmem:[#allocation3 + $0x170] sm:$0xff] }
 0x10b   :  { %v4644_v30 = vpack.c.bf16 %v368_v23, %v364_v21  ;;  %v372_v33 = vld [vmem:[#allocation3 + $0x2c8] sm:$0xff]  ;;  %v334_v39 = vld [vmem:[#allocation3 + $0x198] sm:$0xff]  ;;  %v371_v43 = vld [vmem:[#allocation3 + $0x2c0] sm:$0xff] }
 0x10c   :  { %v376_v35 = vld [vmem:[#allocation3 + $0x2e8] sm:$0xff]  ;;  %v338_v40 = vld [vmem:[#allocation3 + $0x1b8] sm:$0xff]  ;;  %v375_v44 = vld [vmem:[#allocation3 + $0x2e0] sm:$0xff]  ;;  %4687 = vmatpush1.bf16.msra.mxu1 %v4686_v34 }
 0x10d   :  { %4627 = vmatpush1.bf16.msra.mxu0 %v4626_v37  ;;  %v325_v37 = vld [vmem:[#allocation3 + $0x150] sm:$0xff]  ;;  %v4648_v42 = vpack.c.bf16 %v376_v35, %v372_v33  ;;  %v380_v45 = vld [vmem:[#allocation3 + $0x308] sm:$0xff]  ;;  %4689 = vmatprep.subr.bf16.mxu1 %v4688_v36  ;;  %v4692_v48 = vpack.c.bf16 %v338_v40, %v334_v39  ;;  %v342_v51 = vld [vmem:[#allocation3 + $0x1d8] sm:$0xff] }
 0x10e   :  { %4629 = vmatprep.subr.bf16.mxu0 %v4628_v41  ;;  %v4646_v41 = vpack.c.bf16 %v367_v32, %v363_v31  ;;  %v4690_v46 = vpack.c.bf16 %v329_v38, %v325_v37  ;;  %v384_v47 = vld [vmem:[#allocation3 + $0x328] sm:$0xff]  ;;  %v333_v49 = vld [vmem:[#allocation3 + $0x190] sm:$0xff]  ;;  %v346_v52 = vld [vmem:[#allocation3 + $0x1f8] sm:$0xff] }
 0x10f   :  { %v337_v50 = vld [vmem:[#allocation3 + $0x1b0] sm:$0xff]  ;;  %v4652_v54 = vpack.c.bf16 %v384_v47, %v380_v45  ;;  %v379_v55 = vld [vmem:[#allocation3 + $0x300] sm:$0xff]  ;;  %v388_v57 = vld [vmem:[#allocation3 + $0x348] sm:$0xff]  ;;  %v4696_v60 = vpack.c.bf16 %v346_v52, %v342_v51 }
 0x110   :  { %v383_v56 = vld [vmem:[#allocation3 + $0x320] sm:$0xff]  ;;  %4691 = vmatpush1.bf16.msra.mxu1 %v4690_v46  ;;  %v392_v59 = vld [vmem:[#allocation3 + $0x368] sm:$0xff]  ;;  %v341_v61 = vld [vmem:[#allocation3 + $0x1d0] sm:$0xff] }
 0x111   :  { %4631 = vmatpush1.bf16.msra.mxu0 %v4630_v53  ;;  %v4650_v53 = vpack.c.bf16 %v375_v44, %v371_v43  ;;  %4693 = vmatprep.subr.bf16.mxu1 %v4692_v48  ;;  %v345_v62 = vld [vmem:[#allocation3 + $0x1f0] sm:$0xff]  ;;  %v350_v63 = vld [vmem:[#allocation3 + $0x218] sm:$0xff]  ;;  %v4654_v1 = vpack.c.bf16 %v383_v56, %v379_v55  ;;  %v4656_v2 = vpack.c.bf16 %v392_v59, %v388_v57  ;;  %v387_v3 = vld [vmem:[#allocation3 + $0x340] sm:$0xff] }
 0x112   :  { %4633 = vmatprep.subr.bf16.mxu0 %v4632_v58  ;;  %v4694_v58 = vpack.c.bf16 %v337_v50, %v333_v49  ;;  %v354_v0 = vld [vmem:[#allocation3 + $0x238] sm:$0xff]  ;;  %v391_v4 = vld [vmem:[#allocation3 + $0x360] sm:$0xff]  ;;  %v400_v7 = vld [vmem:[#allocation3 + $0x3a8] sm:$0xff] }
 0x113   :  { %v4700_v8 = vpack.c.bf16 %v354_v0, %v350_v63  ;;  %v349_v9 = vld [vmem:[#allocation3 + $0x210] sm:$0xff]  ;;  %v358_v11 = vld [vmem:[#allocation3 + $0x258] sm:$0xff]  ;;  %v4658_v13 = vpack.c.bf16 %v391_v4, %v387_v3  ;;  %v395_v15 = vld [vmem:[#allocation3 + $0x380] sm:$0xff] }
 0x114   :  { %4695 = vmatpush1.bf16.msra.mxu1 %v4694_v58  ;;  %v353_v10 = vld [vmem:[#allocation3 + $0x230] sm:$0xff]  ;;  %v362_v12 = vld [vmem:[#allocation3 + $0x278] sm:$0xff]  ;;  %v399_v16 = vld [vmem:[#allocation3 + $0x3a0] sm:$0xff] }
 0x115   :  { %4635 = vmatpush1.bf16.msra.mxu0 %v4634_v5  ;;  %v396_v5 = vld [vmem:[#allocation3 + $0x388] sm:$0xff]  ;;  %4697 = vmatprep.subr.bf16.mxu1 %v4696_v60  ;;  %v4704_v20 = vpack.c.bf16 %v362_v12, %v358_v11  ;;  %v357_v21 = vld [vmem:[#allocation3 + $0x250] sm:$0xff]  ;;  %v366_v23 = vld [vmem:[#allocation3 + $0x298] sm:$0xff]  ;;  %v4662_v25 = vpack.c.bf16 %v399_v16, %v395_v15 }
 0x116   :  { %4637 = vmatprep.subr.bf16.mxu0 %v4636_v6  ;;  %v4698_v6 = vpack.c.bf16 %v345_v62, %v341_v61  ;;  %v4660_v14 = vpack.c.bf16 %v400_v7, %v396_v5  ;;  %v408_v19 = vld [vmem:[#allocation3 + $0x3e8] sm:$0xff]  ;;  %v361_v22 = vld [vmem:[#allocation3 + $0x270] sm:$0xff]  ;;  %v370_v24 = vld [vmem:[#allocation3 + $0x2b8] sm:$0xff] }
 0x117   :  { %v403_v27 = vld [vmem:[#allocation3 + $0x3c0] sm:$0xff]  ;;  %v4708_v31 = vpack.c.bf16 %v370_v24, %v366_v23  ;;  %v369_v32 = vld [vmem:[#allocation3 + $0x2b0] sm:$0xff]  ;;  %v596_v33 = vld [vmem:[#allocation5 + $0x8] sm:$0xff] }
 0x118   :  { %4699 = vmatpush1.bf16.msra.mxu1 %v4698_v6  ;;  %v407_v28 = vld [vmem:[#allocation3 + $0x3e0] sm:$0xff]  ;;  %v598_v34 = vld [vmem:[#allocation5 + $0x18] sm:$0xff]  ;;  %v373_v39 = vld [vmem:[#allocation3 + $0x2d0] sm:$0xff] }
 0x119   :  { %4639 = vmatpush1.bf16.msra.mxu0 %v4638_v17  ;;  %v404_v17 = vld [vmem:[#allocation3 + $0x3c8] sm:$0xff]  ;;  %4701 = vmatprep.subr.bf16.mxu1 %v4700_v8  ;;  %v374_v35 = vld [vmem:[#allocation3 + $0x2d8] sm:$0xff]  ;;  %v4666_v37 = vpack.c.bf16 %v407_v28, %v403_v27  ;;  %v4732_v40 = vpack.c.bf16 %v598_v34, %v596_v33  ;;  %v377_v44 = vld [vmem:[#allocation3 + $0x2f0] sm:$0xff] }
 0x11a   :  { %4641 = vmatprep.subr.bf16.mxu0 %v4640_v18  ;;  %v4702_v18 = vpack.c.bf16 %v353_v10, %v349_v9  ;;  %v4664_v26 = vpack.c.bf16 %v408_v19, %v404_v17  ;;  %v378_v36 = vld [vmem:[#allocation3 + $0x2f8] sm:$0xff]  ;;  %v600_v45 = vld [vmem:[#allocation5 + $0x28] sm:$0xff]  ;;  %v6312_v49 = vld [vmem:[%s6082_s5] sm:$0xff]  ;;  %v4714_v52 = vpack.c.bf16 %v377_v44, %v373_v39 }
 0x11b   :  { %v4712_v43 = vpack.c.bf16 %v378_v36, %v374_v35  ;;  %v602_v46 = vld [vmem:[#allocation5 + $0x38] sm:$0xff]  ;;  %v381_v50 = vld [vmem:[#allocation3 + $0x310] sm:$0xff]  ;;  %v599_v55 = vld [vmem:[#allocation5 + $0x20] sm:$0xff] }
 0x11c   :  { %4703 = vmatpush1.bf16.msra.mxu1 %v4702_v18  ;;  %v382_v47 = vld [vmem:[#allocation3 + $0x318] sm:$0xff]  ;;  %v601_v56 = vld [vmem:[#allocation5 + $0x30] sm:$0xff]  ;;  %v604_v59 = vld [vmem:[#allocation5 + $0x48] sm:$0xff] }
 0x11d   :  { %4643 = vmatpush1.bf16.msra.mxu0 %v4642_v29  ;;  %v4706_v29 = vpack.c.bf16 %v361_v22, %v357_v21  ;;  %4705 = vmatprep.subr.bf16.mxu1 %v4704_v20  ;;  %v386_v48 = vld [vmem:[#allocation3 + $0x338] sm:$0xff]  ;;  %v385_v58 = vld [vmem:[#allocation3 + $0x330] sm:$0xff]  ;;  %v4738_v0 = vpack.c.bf16 %v601_v56, %v599_v55  ;;  %v603_v4 = vld [vmem:[#allocation5 + $0x40] sm:$0xff] }
 0x11e   :  { %4645 = vmatprep.subr.bf16.mxu0 %v4644_v30  ;;  %v365_v30 = vld [vmem:[#allocation3 + $0x290] sm:$0xff]  ;;  %v4716_v57 = vpack.c.bf16 %v386_v48, %v382_v47  ;;  %v606_v60 = vld [vmem:[#allocation5 + $0x58] sm:$0xff]  ;;  %v608_v8 = vld [vmem:[#allocation5 + $0x68] sm:$0xff] }
 0x11f   :  { %v4710_v38 = vpack.c.bf16 %v369_v32, %v365_v30  ;;  %v390_v61 = vld [vmem:[#allocation3 + $0x358] sm:$0xff]  ;;  %v6320_v63 = vld [vmem:[%s6082_s5 + $0x10] sm:$0xff]  ;;  %v4740_v3 = vpack.c.bf16 %v606_v60, %v604_v59  ;;  %v607_v16 = vld [vmem:[#allocation5 + $0x60] sm:$0xff] }
 0x120   :  { %4707 = vmatpush1.bf16.msra.mxu1 %v4706_v29  ;;  %v394_v62 = vld [vmem:[#allocation3 + $0x378] sm:$0xff]  ;;  %v605_v5 = vld [vmem:[#allocation5 + $0x50] sm:$0xff]  ;;  %v612_v20 = vld [vmem:[#allocation5 + $0x88] sm:$0xff] }
 0x121   :  { %4647 = vmatpush1.bf16.msra.mxu0 %v4646_v41  ;;  %v595_v41 = vld [vmem:[#allocation5] sm:$0xff]  ;;  %4709 = vmatprep.subr.bf16.mxu1 %v4708_v31  ;;  %v4720_v6 = vpack.c.bf16 %v394_v62, %v390_v61  ;;  %v393_v7 = vld [vmem:[#allocation3 + $0x370] sm:$0xff]  ;;  %v610_v9 = vld [vmem:[#allocation5 + $0x78] sm:$0xff]  ;;  %v4742_v12 = vpack.c.bf16 %v605_v5, %v603_v4 }
 0x122   :  { %4649 = vmatprep.subr.bf16.mxu0 %v4648_v42  ;;  %v597_v42 = vld [vmem:[#allocation5 + $0x10] sm:$0xff]  ;;  %v398_v10 = vld [vmem:[#allocation3 + $0x398] sm:$0xff]  ;;  %v4744_v15 = vpack.c.bf16 %v610_v9, %v608_v8  ;;  %v611_v28 = vld [vmem:[#allocation5 + $0x80] sm:$0xff] }
 0x123   :  { %v4734_v51 = vpack.c.bf16 %v597_v42, %v595_v41  ;;  %v402_v11 = vld [vmem:[#allocation3 + $0x3b8] sm:$0xff]  ;;  %v609_v17 = vld [vmem:[#allocation5 + $0x70] sm:$0xff]  ;;  %v616_v32 = vld [vmem:[#allocation5 + $0xa8] sm:$0xff] }
 0x124   :  { %4711 = vmatpush1.bf16.msra.mxu1 %v4710_v38  ;;  %v4724_v18 = vpack.c.bf16 %v402_v11, %v398_v10  ;;  %v401_v19 = vld [vmem:[#allocation3 + $0x3b0] sm:$0xff]  ;;  %v614_v21 = vld [vmem:[#allocation5 + $0x98] sm:$0xff]  ;;  %v4746_v24 = vpack.c.bf16 %v609_v17, %v607_v16  ;;  %v620_v39 = vld [vmem:[#allocation5 + $0xc8] sm:$0xff] }
 0x125   :  { %4651 = vmatpush1.bf16.msra.mxu0 %v4650_v53  ;;  %v6315_v53 = vld [vmem:[%s6082_s5 + $0x18] sm:$0xff]  ;;  %4713 = vmatprep.subr.bf16.mxu1 %v4712_v43  ;;  %v4748_v27 = vpack.c.bf16 %v614_v21, %v612_v20  ;;  %v613_v29 = vld [vmem:[#allocation5 + $0x90] sm:$0xff]  ;;  %v619_v43 = vld [vmem:[#allocation5 + $0xc0] sm:$0xff]  ;;  %s6855_s5 = sld [smem:[#allocation26_spill]] }
 0x126   :  { %4653 = vmatprep.subr.bf16.mxu0 %v4652_v54  ;;  %v4736_v54 = vpack.c.bf16 %v602_v46, %v600_v45  ;;  %v406_v22 = vld [vmem:[#allocation3 + $0x3d8] sm:$0xff]  ;;  %v409_v31 = vld [vmem:[#allocation3 + $0x3f0] sm:$0xff]  ;;  %v4750_v34 = vpack.c.bf16 %v613_v29, %v611_v28  ;;  %v624_v45 = vld [vmem:[#allocation5 + $0xe8] sm:$0xff] }
 0x127   :  { %v410_v23 = vld [vmem:[#allocation3 + $0x3f8] sm:$0xff]  ;;  %v617_v38 = vld [vmem:[#allocation5 + $0xb0] sm:$0xff]  ;;  %v632_v59 = vld [vmem:[#allocation5 + $0x128] sm:$0xff] }
 0x128   :  { %4715 = vmatpush1.bf16.msra.mxu1 %v4714_v52  ;;  %v4728_v30 = vpack.c.bf16 %v410_v23, %v406_v22  ;;  %v618_v33 = vld [vmem:[#allocation5 + $0xb8] sm:$0xff]  ;;  %v621_v44 = vld [vmem:[#allocation5 + $0xd0] sm:$0xff]  ;;  %v628_v52 = vld [vmem:[#allocation5 + $0x108] sm:$0xff] }
 0x129   :  { %4655 = vmatpush1.bf16.msra.mxu0 %v4654_v1  ;;  %v4718_v1 = vpack.c.bf16 %v385_v58, %v381_v50  ;;  %4717 = vmatprep.subr.bf16.mxu1 %v4716_v57  ;;  %v4752_v36 = vpack.c.bf16 %v618_v33, %v616_v32  ;;  %v626_v46 = vld [vmem:[#allocation5 + $0xf8] sm:$0xff]  ;;  %v4758_v47 = vpack.c.bf16 %v621_v44, %v619_v43  ;;  %v623_v50 = vld [vmem:[#allocation5 + $0xe0] sm:$0xff]  ;;  %v629_v58 = vld [vmem:[#allocation5 + $0x110] sm:$0xff] }
 0x12a   :  { %4657 = vmatprep.subr.bf16.mxu0 %v4656_v2  ;;  %v389_v2 = vld [vmem:[#allocation3 + $0x350] sm:$0xff]  ;;  %v4760_v48 = vpack.c.bf16 %v626_v46, %v624_v45  ;;  %v627_v57 = vld [vmem:[#allocation5 + $0x100] sm:$0xff]  ;;  %v640_v5 = vld [vmem:[#allocation5 + $0x168] sm:$0xff] }
 0x12b   :  { %v4766_v60 = vpack.c.bf16 %v629_v58, %v627_v57  ;;  %v631_v61 = vld [vmem:[#allocation5 + $0x120] sm:$0xff]  ;;  %v633_v62 = vld [vmem:[#allocation5 + $0x130] sm:$0xff]  ;;  %v644_v11 = vld [vmem:[#allocation5 + $0x188] sm:$0xff] }
 0x12c   :  { %4719 = vmatpush1.bf16.msra.mxu1 %v4718_v1  ;;  %v638_v1 = vld [vmem:[#allocation5 + $0x158] sm:$0xff]  ;;  %v637_v4 = vld [vmem:[#allocation5 + $0x150] sm:$0xff]  ;;  %v639_v9 = vld [vmem:[#allocation5 + $0x160] sm:$0xff] }
 0x12d   :  { %4659 = vmatpush1.bf16.msra.mxu0 %v4658_v13  ;;  %v4722_v13 = vpack.c.bf16 %v393_v7, %v389_v2  ;;  %4721 = vmatprep.subr.bf16.mxu1 %v4720_v6  ;;  %v4770_v2 = vpack.c.bf16 %v633_v62, %v631_v61  ;;  %v642_v6 = vld [vmem:[#allocation5 + $0x178] sm:$0xff]  ;;  %v641_v10 = vld [vmem:[#allocation5 + $0x170] sm:$0xff]  ;;  %v648_v17 = vld [vmem:[#allocation5 + $0x1a8] sm:$0xff] }
 0x12e   :  { %4661 = vmatprep.subr.bf16.mxu0 %v4660_v14  ;;  %v397_v14 = vld [vmem:[#allocation3 + $0x390] sm:$0xff]  ;;  %v4776_v8 = vpack.c.bf16 %v642_v6, %v640_v5  ;;  %v647_v21 = vld [vmem:[#allocation5 + $0x1a0] sm:$0xff]  ;;  %v652_v23 = vld [vmem:[#allocation5 + $0x1c8] sm:$0xff] }
 0x12f   :  { %v645_v16 = vld [vmem:[#allocation5 + $0x190] sm:$0xff]  ;;  %v655_v33 = vld [vmem:[#allocation5 + $0x1e0] sm:$0xff]  ;;  %v912_v45 = vld [vmem:[#allocation7 + $0x68] sm:$0xff] }
 0x130   :  { %4723 = vmatpush1.bf16.msra.mxu1 %v4722_v13  ;;  %v4778_v13 = vpack.c.bf16 %v641_v10, %v639_v9  ;;  %v649_v22 = vld [vmem:[#allocation5 + $0x1b0] sm:$0xff]  ;;  %v918_v46 = vld [vmem:[#allocation7 + $0x98] sm:$0xff]  ;;  %v948_v62 = vld [vmem:[#allocation7 + $0x188] sm:$0xff] }
 0x131   :  { %4663 = vmatpush1.bf16.msra.mxu0 %v4662_v25  ;;  %v4726_v25 = vpack.c.bf16 %v401_v19, %v397_v14  ;;  %4725 = vmatprep.subr.bf16.mxu1 %v4724_v18  ;;  %v650_v18 = vld [vmem:[#allocation5 + $0x1b8] sm:$0xff]  ;;  %v653_v28 = vld [vmem:[#allocation5 + $0x1d0] sm:$0xff]  ;;  %v972_v10 = vld [vmem:[#allocation7 + $0x248] sm:$0xff] }
 0x132   :  { %4665 = vmatprep.subr.bf16.mxu0 %v4664_v26  ;;  %v405_v26 = vld [vmem:[#allocation3 + $0x3d0] sm:$0xff]  ;;  %v4784_v20 = vpack.c.bf16 %v650_v18, %v648_v17  ;;  %v966_v5 = vld [vmem:[#allocation7 + $0x218] sm:$0xff] }
 0x133   :  { %v4730_v35 = vpack.c.bf16 %v409_v31, %v405_v26  ;;  %v658_v31 = vld [vmem:[#allocation5 + $0x1f8] sm:$0xff]  ;;  %v905_v43 = vld [vmem:[#allocation7 + $0x30] sm:$0xff] }
 0x134   :  { %4727 = vmatpush1.bf16.msra.mxu1 %v4726_v25  ;;  %v4786_v25 = vpack.c.bf16 %v649_v22, %v647_v21  ;;  %v929_v57 = vld [vmem:[#allocation7 + $0xf0] sm:$0xff]  ;;  %v990_v17 = vld [vmem:[#allocation7 + $0x2d8] sm:$0xff]  ;;  %v996_v22 = vld [vmem:[#allocation7 + $0x308] sm:$0xff] }
 0x135   :  { %4667 = vmatpush1.bf16.msra.mxu0 %v4666_v37  ;;  %v615_v37 = vld [vmem:[#allocation5 + $0xa0] sm:$0xff]  ;;  %4729 = vmatprep.subr.bf16.mxu1 %v4728_v30  ;;  %v656_v30 = vld [vmem:[#allocation5 + $0x1e8] sm:$0xff]  ;;  %v941_v61 = vld [vmem:[#allocation7 + $0x150] sm:$0xff] }
 0x136   :  { %4733 = vmatprep.subr.bf16.mxu0 %v4732_v40  ;;  %v622_v40 = vld [vmem:[#allocation5 + $0xd8] sm:$0xff]  ;;  %v4754_v41 = vpack.c.bf16 %v617_v38, %v615_v37  ;;  %v4792_v32 = vpack.c.bf16 %v658_v31, %v656_v30  ;;  %v965_v9 = vld [vmem:[#allocation7 + $0x210] sm:$0xff] }
 0x137   :  { %v4756_v42 = vpack.c.bf16 %v622_v40, %v620_v39  ;;  %v662_v37 = vld [vmem:[#allocation5 + $0x218] sm:$0xff]  ;;  %v900_v39 = vld [vmem:[#allocation7 + $0x8] sm:$0xff]  ;;  %v989_v21 = vld [vmem:[#allocation7 + $0x2d0] sm:$0xff] }
 0x138   :  { %498 = vmatmul.mubr.f32.vlgmr.msra.gmra.mrb[0].mxu0 %v6312_v49  ;;  %4731 = vmatpush1.bf16.msra.mxu1 %v4730_v35  ;;  %v906_v40 = vld [vmem:[#allocation7 + $0x38] sm:$0xff] }
 0x139   :  { %503 = vmatprep.mubr.f32.mxu0 %v6315_v53  ;;  %4735 = vmatpush1.bf16.msra.mxu0 %v4734_v51  ;;  %v625_v51 = vld [vmem:[#allocation5 + $0xf0] sm:$0xff] }
 0x13a   :  { %4737 = vmatprep.subr.bf16.mxu0 %v4736_v54  ;;  %v630_v54 = vld [vmem:[#allocation5 + $0x118] sm:$0xff]  ;;  %v4762_v55 = vpack.c.bf16 %v625_v51, %v623_v50  ;;  %v4864_v50 = vpack.c.bf16 %v918_v46, %v912_v45  ;;  %v1031_v45 = vld [vmem:[#allocation7 + $0x420] sm:$0xff]  ;;  %v1037_v46 = vld [vmem:[#allocation7 + $0x450] sm:$0xff] }
 0x13b   :  { %575 = vmatmul.mubr.f32.vlgmr.msra.gmra.mrb[0].mxu1 %v6312_v49  ;;  %v4764_v56 = vpack.c.bf16 %v630_v54, %v628_v52  ;;  %v634_v49 = vld [vmem:[#allocation5 + $0x138] sm:$0xff]  ;;  %v924_v52 = vld [vmem:[#allocation7 + $0xc8] sm:$0xff] }
 0x13c   :  { %504 = vmatmul.mubr.f32.gmra.mrb[2].mxu0 %v6320_v63  ;;  %580 = vmatprep.mubr.f32.mxu1 %v6315_v53  ;;  %v4768_v53 = vpack.c.bf16 %v634_v49, %v632_v59  ;;  %v930_v54 = vld [vmem:[#allocation7 + $0xf8] sm:$0xff]  ;;  %v936_v59 = vld [vmem:[#allocation7 + $0x128] sm:$0xff] }
 0x13d   :  { %4739 = vmatpush1.bf16.msra.mxu0 %v4738_v0  ;;  %v636_v0 = vld [vmem:[#allocation5 + $0x148] sm:$0xff]  ;;  %v942_v49 = vld [vmem:[#allocation7 + $0x158] sm:$0xff] }
 0x13e   :  { %4741 = vmatprep.subr.bf16.mxu0 %v4740_v3  ;;  %v635_v3 = vld [vmem:[#allocation5 + $0x140] sm:$0xff] }
 0x13f   :  { %581 = vmatmul.mubr.f32.gmra.mrb[2].mxu1 %v6320_v63  ;;  %v4772_v63 = vpack.c.bf16 %v638_v1, %v636_v0  ;;  %v4774_v7 = vpack.c.bf16 %v637_v4, %v635_v3  ;;  %v954_v0 = vld [vmem:[#allocation7 + $0x1b8] sm:$0xff]  ;;  %v953_v3 = vld [vmem:[#allocation7 + $0x1b0] sm:$0xff]  ;;  %v960_v4 = vld [vmem:[#allocation7 + $0x1e8] sm:$0xff] }
 0x141   :  { %4743 = vmatpush1.bf16.msra.mxu0 %v4742_v12  ;;  %v646_v12 = vld [vmem:[#allocation5 + $0x198] sm:$0xff] }
 0x142   :  { %4745 = vmatprep.subr.bf16.mxu0 %v4744_v15  ;;  %v4780_v14 = vpack.c.bf16 %v646_v12, %v644_v11  ;;  %v643_v15 = vld [vmem:[#allocation5 + $0x180] sm:$0xff]  ;;  %v978_v11 = vld [vmem:[#allocation7 + $0x278] sm:$0xff] }
 0x143   :  { %v4782_v19 = vpack.c.bf16 %v645_v16, %v643_v15  ;;  %v977_v15 = vld [vmem:[#allocation7 + $0x270] sm:$0xff]  ;;  %v984_v16 = vld [vmem:[#allocation7 + $0x2a8] sm:$0xff] }
 0x145   :  { %4747 = vmatpush1.bf16.msra.mxu0 %v4746_v24  ;;  %v654_v24 = vld [vmem:[#allocation5 + $0x1d8] sm:$0xff] }
 0x146   :  { %4749 = vmatprep.subr.bf16.mxu0 %v4748_v27  ;;  %v4788_v26 = vpack.c.bf16 %v654_v24, %v652_v23  ;;  %v651_v27 = vld [vmem:[#allocation5 + $0x1c0] sm:$0xff]  ;;  %v1002_v23 = vld [vmem:[#allocation7 + $0x338] sm:$0xff] }
 0x147   :  { %v4790_v29 = vpack.c.bf16 %v653_v28, %v651_v27  ;;  %v1001_v27 = vld [vmem:[#allocation7 + $0x330] sm:$0xff]  ;;  %v1008_v28 = vld [vmem:[#allocation7 + $0x368] sm:$0xff] }
 0x149   :  { %4751 = vmatpush1.bf16.msra.mxu0 %v4750_v34  ;;  %v657_v34 = vld [vmem:[#allocation5 + $0x1f0] sm:$0xff] }
 0x14a   :  { %4753 = vmatprep.subr.bf16.mxu0 %v4752_v36  ;;  %v4794_v35 = vpack.c.bf16 %v657_v34, %v655_v33  ;;  %v660_v36 = vld [vmem:[#allocation5 + $0x208] sm:$0xff]  ;;  %v1013_v33 = vld [vmem:[#allocation7 + $0x390] sm:$0xff] }
 0x14b   :  { %v4796_v38 = vpack.c.bf16 %v662_v37, %v660_v36  ;;  %v1020_v34 = vld [vmem:[#allocation7 + $0x3c8] sm:$0xff] }
 0x14d   :  { %4755 = vmatpush1.bf16.msra.mxu0 %v4754_v41  ;;  %v899_v41 = vld [vmem:[#allocation7] sm:$0xff] }
 0x14e   :  { %4757 = vmatprep.subr.bf16.mxu0 %v4756_v42  ;;  %v4860_v42 = vpack.c.bf16 %v906_v40, %v900_v39  ;;  %v4862_v44 = vpack.c.bf16 %v905_v43, %v899_v41  ;;  %v1025_v39 = vld [vmem:[#allocation7 + $0x3f0] sm:$0xff]  ;;  %v413_v40 = vlaneseq  ;;  %v1032_v41 = vld [vmem:[#allocation7 + $0x428] sm:$0xff] }
 0x150   :  { %4861 = vmatprep.subr.bf16.mxu1 %v4860_v42  ;;  %v1038_v42 = vld [vmem:[#allocation7 + $0x458] sm:$0xff] }
 0x151   :  { %4759 = vmatpush1.bf16.msra.mxu0 %v4758_v47  ;;  %v911_v47 = vld [vmem:[#allocation7 + $0x60] sm:$0xff]  ;;  %4863 = vmatpush1.bf16.msra.mxu1 %v4862_v44  ;;  %v4904_v44 = vpack.c.bf16 %v1038_v42, %v1032_v41  ;;  %v676_v41 = vld [vmem:[#allocation5 + $0x288] sm:$0xff]  ;;  %v678_v42 = vld [vmem:[#allocation5 + $0x298] sm:$0xff] }
 0x152   :  { %4761 = vmatprep.subr.bf16.mxu0 %v4760_v48  ;;  %v917_v48 = vld [vmem:[#allocation7 + $0x90] sm:$0xff]  ;;  %4865 = vmatprep.subr.bf16.mxu1 %v4864_v50  ;;  %v1050_v50 = vld [vmem:[#allocation7 + $0x4b8] sm:$0xff] }
 0x153   :  { %v4866_v51 = vpack.c.bf16 %v917_v48, %v911_v47  ;;  %v6327_v47 = vshrl.u32 %v413_v40, 7  ;;  %v1044_v48 = vld [vmem:[#allocation7 + $0x488] sm:$0xff] }
 0x155   :  { %4763 = vmatpush1.bf16.msra.mxu0 %v4762_v55  ;;  %v4868_v55 = vpack.c.bf16 %v930_v54, %v924_v52  ;;  %4867 = vmatpush1.bf16.msra.mxu1 %v4866_v51  ;;  %v4906_v51 = vpack.c.bf16 %v1037_v46, %v1031_v45  ;;  %v4908_v52 = vpack.c.bf16 %v1050_v50, %v1044_v48  ;;  %v1043_v54 = vld [vmem:[#allocation7 + $0x480] sm:$0xff]  ;;  %v677_v48 = vld [vmem:[#allocation5 + $0x290] sm:$0xff]  ;;  %v680_v50 = vld [vmem:[#allocation5 + $0x2a8] sm:$0xff] }
 0x156   :  { %4765 = vmatprep.subr.bf16.mxu0 %v4764_v56  ;;  %v923_v56 = vld [vmem:[#allocation7 + $0xc0] sm:$0xff]  ;;  %v4812_v45 = vpack.c.bf16 %v678_v42, %v676_v41 }
 0x157   :  { %v4870_v58 = vpack.c.bf16 %v929_v57, %v923_v56  ;;  %4869 = vmatprep.subr.bf16.mxu1 %v4868_v55  ;;  %v1049_v55 = vld [vmem:[#allocation7 + $0x4b0] sm:$0xff]  ;;  %v6330_v56 = vsub.s32 0, %v6327_v47  ;;  %v1056_v57 = vld [vmem:[#allocation7 + $0x4e8] sm:$0xff]  ;;  %v675_v46 = vld [vmem:[#allocation5 + $0x280] sm:$0xff] }
 0x158   :  { %v707_v42 = vld [vmem:[#allocation5 + $0x380] sm:$0xff] }
 0x159   :  { %4767 = vmatpush1.bf16.msra.mxu0 %v4766_v60  ;;  %v4872_v60 = vpack.c.bf16 %v942_v49, %v936_v59  ;;  %4871 = vmatpush1.bf16.msra.mxu1 %v4870_v58  ;;  %v1062_v58 = vld [vmem:[#allocation7 + $0x518] sm:$0xff]  ;;  %v6333_v59 = vld [vmem:[%s6092_s13] sm:$0xf]  ;;  %v6336_v49 = vsub.s32 1, %v6327_v47  ;;  %s6856_s13 = sld [smem:[#allocation27_spill]] }
 0x15a   :  { %4769 = vmatprep.subr.bf16.mxu0 %v4768_v53  ;;  %v935_v53 = vld [vmem:[#allocation7 + $0x120] sm:$0xff] }
 0x15b   :  { %v4874_v1 = vpack.c.bf16 %v941_v61, %v935_v53  ;;  %4873 = vmatprep.subr.bf16.mxu1 %v4872_v60  ;;  %v4910_v60 = vpack.c.bf16 %v1049_v55, %v1043_v54  ;;  %v4912_v53 = vpack.c.bf16 %v1062_v58, %v1056_v57  ;;  %v1055_v61 = vld [vmem:[#allocation7 + $0x4e0] sm:$0xff]  ;;  %v4814_v54 = vpack.c.bf16 %v677_v48, %v675_v46  ;;  %v681_v58 = vld [vmem:[#allocation5 + $0x2b0] sm:$0xff]  ;;  %v714_v46 = vld [vmem:[#allocation5 + $0x3b8] sm:$0xff] }
 0x15c   :  { %v679_v57 = vld [vmem:[#allocation5 + $0x2a0] sm:$0xff] }
 0x15d   :  { %4771 = vmatpush1.bf16.msra.mxu0 %v4770_v2  ;;  %v4876_v2 = vpack.c.bf16 %v954_v0, %v948_v62  ;;  %4875 = vmatpush1.bf16.msra.mxu1 %v4874_v1  ;;  %v1061_v62 = vld [vmem:[#allocation7 + $0x510] sm:$0xff]  ;;  %v416_v0 = vrot.slane %v6333_v59, %v6330_v56  ;;  %v1068_v1 = vld [vmem:[#allocation7 + $0x548] sm:$0xff] }
 0x15e   :  { %4773 = vmatprep.subr.bf16.mxu0 %v4772_v63  ;;  %v947_v63 = vld [vmem:[#allocation7 + $0x180] sm:$0xff] }
 0x15f   :  { %v4878_v6 = vpack.c.bf16 %v953_v3, %v947_v63  ;;  %4877 = vmatprep.subr.bf16.mxu1 %v4876_v2  ;;  %v1074_v2 = vld [vmem:[#allocation7 + $0x578] sm:$0xff]  ;;  %v420_v63 = vrot.slane %v6333_v59, %v6336_v49  ;;  %v4914_v3 = vpack.c.bf16 %v1061_v62, %v1055_v61 }
 0x160   :  { %v686_v61 = vld [vmem:[#allocation5 + $0x2d8] sm:$0xff] }
 0x161   :  { %4775 = vmatpush1.bf16.msra.mxu0 %v4774_v7  ;;  %v4880_v7 = vpack.c.bf16 %v966_v5, %v960_v4  ;;  %4879 = vmatpush1.bf16.msra.mxu1 %v4878_v6  ;;  %v4916_v5 = vpack.c.bf16 %v1074_v2, %v1068_v1  ;;  %v1067_v6 = vld [vmem:[#allocation7 + $0x540] sm:$0xff]  ;;  %v4818_v1 = vpack.c.bf16 %v681_v58, %v679_v57  ;;  %v718_v57 = vld [vmem:[#allocation5 + $0x3d8] sm:$0xff] }
 0x162   :  { %4777 = vmatprep.subr.bf16.mxu0 %v4776_v8  ;;  %v959_v8 = vld [vmem:[#allocation7 + $0x1e0] sm:$0xff] }
 0x163   :  { %v4882_v12 = vpack.c.bf16 %v965_v9, %v959_v8  ;;  %4881 = vmatprep.subr.bf16.mxu1 %v4880_v7  ;;  %v1073_v7 = vld [vmem:[#allocation7 + $0x570] sm:$0xff] }
 0x165   :  { %4779 = vmatpush1.bf16.msra.mxu0 %v4778_v13  ;;  %v4884_v13 = vpack.c.bf16 %v978_v11, %v972_v10  ;;  %4883 = vmatpush1.bf16.msra.mxu1 %v4882_v12  ;;  %v659_v10 = vld [vmem:[#allocation5 + $0x200] sm:$0xff]  ;;  %v661_v11 = vld [vmem:[#allocation5 + $0x210] sm:$0xff] }
 0x166   :  { %4781 = vmatprep.subr.bf16.mxu0 %v4780_v14  ;;  %v971_v14 = vld [vmem:[#allocation7 + $0x240] sm:$0xff] }
 0x167   :  { %v4886_v18 = vpack.c.bf16 %v977_v15, %v971_v14  ;;  %4885 = vmatprep.subr.bf16.mxu1 %v4884_v13  ;;  %v664_v13 = vld [vmem:[#allocation5 + $0x228] sm:$0xff]  ;;  %v666_v14 = vld [vmem:[#allocation5 + $0x238] sm:$0xff]  ;;  %v4918_v15 = vpack.c.bf16 %v1073_v7, %v1067_v6 }
 0x168   :  { %v688_v6 = vld [vmem:[#allocation5 + $0x2e8] sm:$0xff]  ;;  %v690_v7 = vld [vmem:[#allocation5 + $0x2f8] sm:$0xff] }
 0x169   :  { %4783 = vmatpush1.bf16.msra.mxu0 %v4782_v19  ;;  %v4888_v19 = vpack.c.bf16 %v990_v17, %v984_v16  ;;  %4887 = vmatpush1.bf16.msra.mxu1 %v4886_v18  ;;  %v4798_v17 = vpack.c.bf16 %v661_v11, %v659_v10  ;;  %v4824_v10 = vpack.c.bf16 %v690_v7, %v688_v6  ;;  %v687_v11 = vld [vmem:[#allocation5 + $0x2e0] sm:$0xff]  ;;  %v721_v7 = vld [vmem:[#allocation5 + $0x3f0] sm:$0xff] }
 0x16a   :  { %4785 = vmatprep.subr.bf16.mxu0 %v4784_v20  ;;  %v983_v20 = vld [vmem:[#allocation7 + $0x2a0] sm:$0xff] }
 0x16b   :  { %v4890_v24 = vpack.c.bf16 %v989_v21, %v983_v20  ;;  %4889 = vmatprep.subr.bf16.mxu1 %v4888_v19  ;;  %v4800_v20 = vpack.c.bf16 %v666_v14, %v664_v13  ;;  %v663_v21 = vld [vmem:[#allocation5 + $0x220] sm:$0xff]  ;;  %v692_v13 = vld [vmem:[#allocation5 + $0x308] sm:$0xff]  ;;  %v694_v14 = vld [vmem:[#allocation5 + $0x318] sm:$0xff] }
 0x16c   :  { %v719_v6 = vld [vmem:[#allocation5 + $0x3e0] sm:$0xff] }
 0x16d   :  { %4787 = vmatpush1.bf16.msra.mxu0 %v4786_v25  ;;  %v4892_v25 = vpack.c.bf16 %v1002_v23, %v996_v22  ;;  %4891 = vmatpush1.bf16.msra.mxu1 %v4890_v24  ;;  %v665_v22 = vld [vmem:[#allocation5 + $0x230] sm:$0xff] }
 0x16e   :  { %4789 = vmatprep.subr.bf16.mxu0 %v4788_v26  ;;  %v995_v26 = vld [vmem:[#allocation7 + $0x300] sm:$0xff] }
 0x16f   :  { %v4894_v30 = vpack.c.bf16 %v1001_v27, %v995_v26  ;;  %4893 = vmatprep.subr.bf16.mxu1 %v4892_v25  ;;  %v668_v25 = vld [vmem:[#allocation5 + $0x248] sm:$0xff]  ;;  %v670_v26 = vld [vmem:[#allocation5 + $0x258] sm:$0xff] }
 0x171   :  { %4791 = vmatpush1.bf16.msra.mxu0 %v4790_v29  ;;  %v1014_v29 = vld [vmem:[#allocation7 + $0x398] sm:$0xff]  ;;  %4895 = vmatpush1.bf16.msra.mxu1 %v4894_v30 }
 0x172   :  { %4793 = vmatprep.subr.bf16.mxu0 %v4792_v32  ;;  %v4896_v31 = vpack.c.bf16 %v1014_v29, %v1008_v28  ;;  %v1007_v32 = vld [vmem:[#allocation7 + $0x360] sm:$0xff]  ;;  %v4802_v29 = vpack.c.bf16 %v665_v22, %v663_v21 }
 0x173   :  { %v4898_v36 = vpack.c.bf16 %v1013_v33, %v1007_v32  ;;  %v667_v32 = vld [vmem:[#allocation5 + $0x240] sm:$0xff]  ;;  %v669_v33 = vld [vmem:[#allocation5 + $0x250] sm:$0xff] }
 0x174   :  { %4897 = vmatprep.subr.bf16.mxu1 %v4896_v31  ;;  %v4804_v31 = vpack.c.bf16 %v670_v26, %v668_v25  ;;  %v700_v25 = vld [vmem:[#allocation5 + $0x348] sm:$0xff]  ;;  %v702_v26 = vld [vmem:[#allocation5 + $0x358] sm:$0xff] }
 0x175   :  { %4795 = vmatpush1.bf16.msra.mxu0 %v4794_v35  ;;  %v1026_v35 = vld [vmem:[#allocation7 + $0x3f8] sm:$0xff]  ;;  %4899 = vmatpush1.bf16.msra.mxu1 %v4898_v36  ;;  %v4806_v36 = vpack.c.bf16 %v669_v33, %v667_v32 }
 0x176   :  { %4797 = vmatprep.subr.bf16.mxu0 %v4796_v38  ;;  %v4900_v37 = vpack.c.bf16 %v1026_v35, %v1020_v34  ;;  %v1019_v38 = vld [vmem:[#allocation7 + $0x3c0] sm:$0xff]  ;;  %v672_v34 = vld [vmem:[#allocation5 + $0x268] sm:$0xff]  ;;  %v674_v35 = vld [vmem:[#allocation5 + $0x278] sm:$0xff] }
 0x177   :  { %v4902_v43 = vpack.c.bf16 %v1025_v39, %v1019_v38  ;;  %v671_v38 = vld [vmem:[#allocation5 + $0x260] sm:$0xff]  ;;  %v673_v39 = vld [vmem:[#allocation5 + $0x270] sm:$0xff]  ;;  %v706_v32 = vld [vmem:[#allocation5 + $0x378] sm:$0xff] }
 0x178   :  { %4901 = vmatprep.subr.bf16.mxu1 %v4900_v37  ;;  %v4808_v37 = vpack.c.bf16 %v674_v35, %v672_v34  ;;  %v703_v35 = vld [vmem:[#allocation5 + $0x360] sm:$0xff] }
 0x179   :  { %4903 = vmatpush1.bf16.msra.mxu1 %v4902_v43  ;;  %v6343_v43 = vsub.s32 3, %v6327_v47 }
 0x17a   :  { %4905 = vmatprep.subr.bf16.mxu1 %v4904_v44  ;;  %v4810_v44 = vpack.c.bf16 %v673_v39, %v671_v38  ;;  %v710_v38 = vld [vmem:[#allocation5 + $0x398] sm:$0xff] }
 0x17d   :  { %4907 = vmatpush1.bf16.msra.mxu1 %v4906_v51  ;;  %v682_v51 = vld [vmem:[#allocation5 + $0x2b8] sm:$0xff] }
 0x17e   :  { %4909 = vmatprep.subr.bf16.mxu1 %v4908_v52  ;;  %v6347_v52 = vrot.slane %v6333_v59, %v6343_v43  ;;  %v4816_v55 = vpack.c.bf16 %v682_v51, %v680_v50  ;;  %v711_v51 = vld [vmem:[#allocation5 + $0x3a0] sm:$0xff] }
 0x181   :  { %4911 = vmatpush1.bf16.msra.mxu1 %v4910_v60 }
 0x182   :  { %4913 = vmatprep.subr.bf16.mxu1 %v4912_v53  ;;  %v684_v53 = vld [vmem:[#allocation5 + $0x2c8] sm:$0xff] }
 0x183   :  { %v4820_v2 = vpack.c.bf16 %v686_v61, %v684_v53  ;;  %v6357_v53 = vsub.s32 2, %v6327_v47 }
 0x185   :  { %4915 = vmatpush1.bf16.msra.mxu1 %v4914_v3  ;;  %v685_v3 = vld [vmem:[#allocation5 + $0x2d0] sm:$0xff] }
 0x186   :  { %4917 = vmatprep.subr.bf16.mxu1 %v4916_v5 }
 0x189   :  { %4919 = vmatpush1.bf16.msra.mxu1 %v4918_v15 }
 0x20b   :  { %v499_v4 = vpop.f32.mrb[0].mxu0 }
 0x20c   :  { %v500_v8 = vadd.f32 %v499_v4, %v416_v0  ;;  %v501_v9 = vpop.f32.mrb[1].mxu0 }
 0x20d   :  { %v502_v12 = vadd.f32 %v501_v9, %v420_v63 }
 0x20e   :  { %v587_v19 = vmax.f32 %v500_v8, 0.0  ;;  %v6349_v60 = vpop.f32.mrb[0].mxu1 }
 0x20f   :  { %v588_v16 = vmax.f32 %v502_v12, 0.0  ;;  %v505_v18 = vpop.f32.mrb[2].mxu0  ;;  %v578_v62 = vpop.f32.mrb[1].mxu1  ;;  %v689_v12 = vld [vmem:[#allocation5 + $0x2f0] sm:$0xff] }
 0x210   :  { %v506_v23 = vadd.f32 %v505_v18, %v416_v0  ;;  %v507_v24 = vpop.f32.mrb[3].mxu0  ;;  %v579_v0 = vadd.f32 %v578_v62, %v6347_v52  ;;  %v4826_v15 = vpack.c.bf16 %v689_v12, %v687_v11  ;;  %v693_v18 = vld [vmem:[#allocation5 + $0x310] sm:$0xff]  ;;  %v715_v62 = vld [vmem:[#allocation5 + $0x3c0] sm:$0xff]  ;;  %v4858_v11 = vpack.c.bf16 %v721_v7, %v719_v6 }
 0x211   :  { %799 = vmatprep.mubr.f32.mxu0 %v588_v16  ;;  %v508_v27 = vadd.f32 %v507_v24, %v420_v63  ;;  %v683_v63 = vld [vmem:[#allocation5 + $0x2c0] sm:$0xff]  ;;  %v4828_v16 = vpack.c.bf16 %v694_v14, %v692_v13  ;;  %v697_v24 = vld [vmem:[#allocation5 + $0x330] sm:$0xff] }
 0x212   :  { %800 = vmatmul.mubr.f32.vlgmr.msra.gmra.mrb[4].mxu0 %v587_v19  ;;  %v591_v28 = vmax.f32 %v506_v23, 0.0  ;;  %v590_v4 = vmax.f32 %v579_v0, 0.0  ;;  %v6352_v5 = vpop.f32.mrb[2].mxu1  ;;  %v4822_v9 = vpack.c.bf16 %v685_v3, %v683_v63  ;;  %v696_v19 = vld [vmem:[#allocation5 + $0x328] sm:$0xff]  ;;  %v695_v23 = vld [vmem:[#allocation5 + $0x320] sm:$0xff]  ;;  %v717_v0 = vld [vmem:[#allocation5 + $0x3d0] sm:$0xff]  ;;  %v424_v3 = vrot.slane %v6333_v59, %v6357_v53 }
 0x213   :  { %4799 = vmatpush1.bf16.msra.mxu0 %v4798_v17  ;;  %v592_v30 = vmax.f32 %v508_v27, 0.0  ;;  %v6354_v8 = vpop.f32.mrb[3].mxu1  ;;  %v691_v17 = vld [vmem:[#allocation5 + $0x300] sm:$0xff]  ;;  %v4834_v27 = vpack.c.bf16 %v697_v24, %v695_v23  ;;  %v4854_v63 = vpack.c.bf16 %v717_v0, %v715_v62  ;;  %v921_v24 = vld [vmem:[#allocation7 + $0xb0] sm:$0xff]  ;;  %v994_v62 = vld [vmem:[#allocation7 + $0x2f8] sm:$0xff] }
 0x214   :  { %4801 = vmatprep.subr.bf16.mxu0 %v4800_v20  ;;  %v698_v20 = vld [vmem:[#allocation5 + $0x338] sm:$0xff]  ;;  %v4830_v21 = vpack.c.bf16 %v693_v18, %v691_v17  ;;  %v585_v12 = vadd.f32 %v6354_v8, %v6347_v52  ;;  %v577_v13 = vadd.f32 %v6349_v60, %v424_v3  ;;  %v916_v17 = vld [vmem:[#allocation7 + $0x88] sm:$0xff]  ;;  %v583_v59 = vadd.f32 %v6352_v5, %v424_v3  ;;  %v915_v23 = vld [vmem:[#allocation7 + $0x80] sm:$0xff] }
 0x215   :  { %805 = vmatprep.mubr.f32.mxu0 %v592_v30  ;;  %v4832_v22 = vpack.c.bf16 %v698_v20, %v696_v19  ;;  %v701_v30 = vld [vmem:[#allocation5 + $0x350] sm:$0xff]  ;;  %v922_v18 = vld [vmem:[#allocation7 + $0xb8] sm:$0xff]  ;;  %v4994_v60 = vpack.c.bf16 %v921_v24, %v915_v23  ;;  %v940_v5 = vld [vmem:[#allocation7 + $0x148] sm:$0xff] }
 0x216   :  { %806 = vmatmul.mubr.f32.gmra.mrb[6].mxu0 %v591_v28  ;;  %v4836_v28 = vpack.c.bf16 %v702_v26, %v700_v25  ;;  %v594_v19 = vmax.f32 %v585_v12, 0.0  ;;  %v928_v25 = vld [vmem:[#allocation7 + $0xe8] sm:$0xff]  ;;  %v934_v52 = vld [vmem:[#allocation7 + $0x118] sm:$0xff]  ;;  %v593_v8 = vmax.f32 %v583_v59, 0.0 }
 0x217   :  { %4803 = vmatpush1.bf16.msra.mxu0 %v4802_v29  ;;  %876 = vmatprep.mubr.f32.mxu0 %v590_v4  ;;  %v699_v29 = vld [vmem:[#allocation5 + $0x340] sm:$0xff]  ;;  %v4996_v26 = vpack.c.bf16 %v934_v52, %v928_v25  ;;  %v1000_v3 = vld [vmem:[#allocation7 + $0x328] sm:$0xff]  ;;  %v1018_v12 = vld [vmem:[#allocation7 + $0x3b8] sm:$0xff] }
 0x218   :  { %4805 = vmatprep.subr.bf16.mxu0 %v4804_v31  ;;  %v704_v31 = vld [vmem:[#allocation5 + $0x368] sm:$0xff]  ;;  %v4838_v33 = vpack.c.bf16 %v701_v30, %v699_v29  ;;  %v946_v29 = vld [vmem:[#allocation7 + $0x178] sm:$0xff]  ;;  %v1035_v52 = vld [vmem:[#allocation7 + $0x440] sm:$0xff] }
 0x219   :  { %v4840_v34 = vpack.c.bf16 %v706_v32, %v704_v31  ;;  %v5000_v31 = vpack.c.bf16 %v946_v29, %v940_v5  ;;  %v939_v32 = vld [vmem:[#allocation7 + $0x140] sm:$0xff]  ;;  %v1042_v23 = vld [vmem:[#allocation7 + $0x478] sm:$0xff]  ;;  %v1053_v29 = vld [vmem:[#allocation7 + $0x4d0] sm:$0xff] }
 0x21a   :  { %v1047_v5 = vld [vmem:[#allocation7 + $0x4a0] sm:$0xff] }
 0x21b   :  { %4807 = vmatpush1.bf16.msra.mxu0 %v4806_v36  ;;  %v705_v36 = vld [vmem:[#allocation5 + $0x370] sm:$0xff] }
 0x21c   :  { %4809 = vmatprep.subr.bf16.mxu0 %v4808_v37  ;;  %v708_v37 = vld [vmem:[#allocation5 + $0x388] sm:$0xff]  ;;  %v4842_v39 = vpack.c.bf16 %v705_v36, %v703_v35  ;;  %v958_v35 = vld [vmem:[#allocation7 + $0x1d8] sm:$0xff] }
 0x21d   :  { %v4844_v41 = vpack.c.bf16 %v710_v38, %v708_v37  ;;  %v951_v38 = vld [vmem:[#allocation7 + $0x1a0] sm:$0xff] }
 0x21f   :  { %4811 = vmatpush1.bf16.msra.mxu0 %v4810_v44  ;;  %v709_v44 = vld [vmem:[#allocation5 + $0x390] sm:$0xff] }
 0x220   :  { %4813 = vmatprep.subr.bf16.mxu0 %v4812_v45  ;;  %v712_v45 = vld [vmem:[#allocation5 + $0x3a8] sm:$0xff]  ;;  %v4846_v48 = vpack.c.bf16 %v709_v44, %v707_v42  ;;  %v970_v42 = vld [vmem:[#allocation7 + $0x238] sm:$0xff] }
 0x221   :  { %v4848_v50 = vpack.c.bf16 %v714_v46, %v712_v45  ;;  %v963_v46 = vld [vmem:[#allocation7 + $0x200] sm:$0xff] }
 0x223   :  { %4815 = vmatpush1.bf16.msra.mxu0 %v4814_v54  ;;  %v713_v54 = vld [vmem:[#allocation5 + $0x3b0] sm:$0xff] }
 0x224   :  { %4817 = vmatprep.subr.bf16.mxu0 %v4816_v55  ;;  %v716_v55 = vld [vmem:[#allocation5 + $0x3c8] sm:$0xff]  ;;  %v4850_v58 = vpack.c.bf16 %v713_v54, %v711_v51  ;;  %v982_v51 = vld [vmem:[#allocation7 + $0x298] sm:$0xff] }
 0x225   :  { %v4852_v61 = vpack.c.bf16 %v718_v57, %v716_v55  ;;  %v975_v57 = vld [vmem:[#allocation7 + $0x260] sm:$0xff] }
 0x227   :  { %4819 = vmatpush1.bf16.msra.mxu0 %v4818_v1  ;;  %v720_v1 = vld [vmem:[#allocation5 + $0x3e8] sm:$0xff] }
 0x228   :  { %4821 = vmatprep.subr.bf16.mxu0 %v4820_v2  ;;  %v722_v2 = vld [vmem:[#allocation5 + $0x3f8] sm:$0xff] }
 0x229   :  { %v4856_v4 = vpack.c.bf16 %v722_v2, %v720_v1  ;;  %v987_v2 = vld [vmem:[#allocation7 + $0x2c0] sm:$0xff] }
 0x22b   :  { %4823 = vmatpush1.bf16.msra.mxu0 %v4822_v9  ;;  %v904_v9 = vld [vmem:[#allocation7 + $0x28] sm:$0xff] }
 0x22c   :  { %4825 = vmatprep.subr.bf16.mxu0 %v4824_v10  ;;  %v910_v10 = vld [vmem:[#allocation7 + $0x58] sm:$0xff] }
 0x22d   :  { %v4988_v14 = vpack.c.bf16 %v910_v10, %v904_v9  ;;  %v999_v9 = vld [vmem:[#allocation7 + $0x320] sm:$0xff]  ;;  %v1005_v10 = vld [vmem:[#allocation7 + $0x350] sm:$0xff] }
 0x22f   :  { %4827 = vmatpush1.bf16.msra.mxu0 %v4826_v15  ;;  %v903_v15 = vld [vmem:[#allocation7 + $0x20] sm:$0xff] }
 0x230   :  { %4829 = vmatprep.subr.bf16.mxu0 %v4828_v16  ;;  %v909_v16 = vld [vmem:[#allocation7 + $0x50] sm:$0xff] }
 0x231   :  { %v4990_v20 = vpack.c.bf16 %v909_v16, %v903_v15  ;;  %v1011_v15 = vld [vmem:[#allocation7 + $0x380] sm:$0xff]  ;;  %v1017_v16 = vld [vmem:[#allocation7 + $0x3b0] sm:$0xff] }
 0x232   :  { %v5026_v59 = vpack.c.bf16 %v1017_v16, %v1011_v15  ;;  %v920_v15 = vld [vmem:[#allocation7 + $0xa8] sm:$0xff] }
 0x233   :  { %4831 = vmatpush1.bf16.msra.mxu0 %v4830_v21  ;;  %v589_v21 = vmax.f32 %v577_v13, 0.0  ;;  %v5022_v13 = vpack.c.bf16 %v1005_v10, %v999_v9 }
 0x234   :  { %4833 = vmatprep.subr.bf16.mxu0 %v4832_v22  ;;  %v4992_v22 = vpack.c.bf16 %v922_v18, %v916_v17  ;;  %v1024_v17 = vld [vmem:[#allocation7 + $0x3e8] sm:$0xff]  ;;  %v1030_v18 = vld [vmem:[#allocation7 + $0x418] sm:$0xff] }
 0x237   :  { %4835 = vmatpush1.bf16.msra.mxu0 %v4834_v27  ;;  %v927_v27 = vld [vmem:[#allocation7 + $0xe0] sm:$0xff] }
 0x238   :  { %4837 = vmatprep.subr.bf16.mxu0 %v4836_v28  ;;  %v933_v28 = vld [vmem:[#allocation7 + $0x110] sm:$0xff] }
 0x239   :  { %v4998_v30 = vpack.c.bf16 %v933_v28, %v927_v27 }
 0x23b   :  { %4839 = vmatpush1.bf16.msra.mxu0 %v4838_v33  ;;  %v945_v33 = vld [vmem:[#allocation7 + $0x170] sm:$0xff] }
 0x23c   :  { %4841 = vmatprep.subr.bf16.mxu0 %v4840_v34  ;;  %v952_v34 = vld [vmem:[#allocation7 + $0x1a8] sm:$0xff]  ;;  %v5002_v36 = vpack.c.bf16 %v945_v33, %v939_v32  ;;  %v5038_v32 = vpack.c.bf16 %v1053_v29, %v1047_v5  ;;  %v931_v5 = vld [vmem:[#allocation7 + $0x100] sm:$0xff]  ;;  %v938_v29 = vld [vmem:[#allocation7 + $0x138] sm:$0xff] }
 0x23d   :  { %v5004_v37 = vpack.c.bf16 %v958_v35, %v952_v34  ;;  %v1059_v34 = vld [vmem:[#allocation7 + $0x500] sm:$0xff]  ;;  %v1065_v35 = vld [vmem:[#allocation7 + $0x530] sm:$0xff] }
 0x23f   :  { %4843 = vmatpush1.bf16.msra.mxu0 %v4842_v39  ;;  %v957_v39 = vld [vmem:[#allocation7 + $0x1d0] sm:$0xff] }
 0x240   :  { %4845 = vmatprep.subr.bf16.mxu0 %v4844_v41  ;;  %v964_v41 = vld [vmem:[#allocation7 + $0x208] sm:$0xff]  ;;  %v5006_v44 = vpack.c.bf16 %v957_v39, %v951_v38  ;;  %v5042_v38 = vpack.c.bf16 %v1065_v35, %v1059_v34  ;;  %v943_v34 = vld [vmem:[#allocation7 + $0x160] sm:$0xff]  ;;  %v950_v35 = vld [vmem:[#allocation7 + $0x198] sm:$0xff] }
 0x241   :  { %v5008_v45 = vpack.c.bf16 %v970_v42, %v964_v41  ;;  %v1071_v41 = vld [vmem:[#allocation7 + $0x560] sm:$0xff]  ;;  %v1077_v42 = vld [vmem:[#allocation7 + $0x590] sm:$0xff] }
 0x243   :  { %4847 = vmatpush1.bf16.msra.mxu0 %v4846_v48  ;;  %v969_v48 = vld [vmem:[#allocation7 + $0x230] sm:$0xff] }
 0x244   :  { %4849 = vmatprep.subr.bf16.mxu0 %v4848_v50  ;;  %v976_v50 = vld [vmem:[#allocation7 + $0x268] sm:$0xff]  ;;  %v5010_v54 = vpack.c.bf16 %v969_v48, %v963_v46  ;;  %v1086_v46 = vld [vmem:[#allocation7 + $0x5d8] sm:$0xff] }
 0x245   :  { %v5012_v55 = vpack.c.bf16 %v982_v51, %v976_v50  ;;  %v1079_v50 = vld [vmem:[#allocation7 + $0x5a0] sm:$0xff]  ;;  %v1085_v51 = vld [vmem:[#allocation7 + $0x5d0] sm:$0xff] }
 0x247   :  { %4851 = vmatpush1.bf16.msra.mxu0 %v4850_v58  ;;  %v981_v58 = vld [vmem:[#allocation7 + $0x290] sm:$0xff] }
 0x248   :  { %4853 = vmatprep.subr.bf16.mxu0 %v4852_v61  ;;  %v988_v61 = vld [vmem:[#allocation7 + $0x2c8] sm:$0xff]  ;;  %v5014_v0 = vpack.c.bf16 %v981_v58, %v975_v57  ;;  %v1090_v57 = vld [vmem:[#allocation7 + $0x5f8] sm:$0xff]  ;;  %v1083_v58 = vld [vmem:[#allocation7 + $0x5c0] sm:$0xff] }
 0x249   :  { %v5016_v1 = vpack.c.bf16 %v994_v62, %v988_v61  ;;  %v1089_v61 = vld [vmem:[#allocation7 + $0x5f0] sm:$0xff] }
 0x24b   :  { %4855 = vmatpush1.bf16.msra.mxu0 %v4854_v63  ;;  %v993_v63 = vld [vmem:[#allocation7 + $0x2f0] sm:$0xff] }
 0x24c   :  { %4857 = vmatprep.subr.bf16.mxu0 %v4856_v4  ;;  %v1006_v4 = vld [vmem:[#allocation7 + $0x358] sm:$0xff]  ;;  %v5018_v6 = vpack.c.bf16 %v993_v63, %v987_v2  ;;  %v908_v2 = vld [vmem:[#allocation7 + $0x48] sm:$0xff] }
 0x24d   :  { %v5020_v7 = vpack.c.bf16 %v1006_v4, %v1000_v3  ;;  %v723_v3 = vld [vmem:[%s6102_s21] sm:$0x3]  ;;  %s6857_s21 = sld [smem:[#allocation28_spill]] }
 0x24e   :  { %v728_v4 = vrot.slane %v723_v3, %v6330_v56 }
 0x24f   :  { %4859 = vmatpush1.bf16.msra.mxu0 %v4858_v11  ;;  %v1012_v11 = vld [vmem:[#allocation7 + $0x388] sm:$0xff] }
 0x250   :  { %4989 = vmatprep.subr.bf16.mxu0 %v4988_v14  ;;  %v5024_v14 = vpack.c.bf16 %v1018_v12, %v1012_v11  ;;  %v901_v11 = vld [vmem:[#allocation7 + $0x10] sm:$0xff]  ;;  %v907_v12 = vld [vmem:[#allocation7 + $0x40] sm:$0xff] }
 0x252   :  { %877 = vmatmul.mubr.f32.vlgmr.msra.gmra.mrb[4].mxu0 %v589_v21  ;;  %v1029_v21 = vld [vmem:[#allocation7 + $0x410] sm:$0xff] }
 0x253   :  { %882 = vmatprep.mubr.f32.mxu0 %v594_v19  ;;  %4991 = vmatpush1.bf16.msra.mxu0 %v4990_v20  ;;  %v5028_v19 = vpack.c.bf16 %v1030_v18, %v1024_v17  ;;  %v1023_v20 = vld [vmem:[#allocation7 + $0x3e0] sm:$0xff]  ;;  %v4926_v18 = vpack.c.bf16 %v907_v12, %v901_v11  ;;  %v1010_v12 = vld [vmem:[#allocation7 + $0x378] sm:$0xff] }
 0x254   :  { %4993 = vmatprep.subr.bf16.mxu0 %v4992_v22  ;;  %v1036_v22 = vld [vmem:[#allocation7 + $0x448] sm:$0xff]  ;;  %v5030_v24 = vpack.c.bf16 %v1029_v21, %v1023_v20  ;;  %v1003_v11 = vld [vmem:[#allocation7 + $0x340] sm:$0xff] }
 0x255   :  { %v5032_v25 = vpack.c.bf16 %v1042_v23, %v1036_v22  ;;  %v913_v22 = vld [vmem:[#allocation7 + $0x70] sm:$0xff]  ;;  %v919_v23 = vld [vmem:[#allocation7 + $0xa0] sm:$0xff] }
 0x256   :  { %883 = vmatmul.mubr.f32.gmra.mrb[6].mxu0 %v593_v8  ;;  %v1041_v8 = vld [vmem:[#allocation7 + $0x470] sm:$0xff] }
 0x257   :  { %4995 = vmatpush1.bf16.msra.mxu0 %v4994_v60  ;;  %v1048_v60 = vld [vmem:[#allocation7 + $0x4a8] sm:$0xff]  ;;  %v5034_v27 = vpack.c.bf16 %v1041_v8, %v1035_v52 }
 0x258   :  { %4997 = vmatprep.subr.bf16.mxu0 %v4996_v26  ;;  %v1054_v26 = vld [vmem:[#allocation7 + $0x4d8] sm:$0xff]  ;;  %v932_v52 = vld [vmem:[#allocation7 + $0x108] sm:$0xff] }
 0x259   :  { %v5036_v28 = vpack.c.bf16 %v1054_v26, %v1048_v60  ;;  %v4930_v60 = vpack.c.bf16 %v919_v23, %v913_v22  ;;  %v1021_v23 = vld [vmem:[#allocation7 + $0x3d0] sm:$0xff] }
 0x25b   :  { %4999 = vmatpush1.bf16.msra.mxu0 %v4998_v30  ;;  %v1060_v30 = vld [vmem:[#allocation7 + $0x508] sm:$0xff] }
 0x25c   :  { %5001 = vmatprep.subr.bf16.mxu0 %v5000_v31  ;;  %v1066_v31 = vld [vmem:[#allocation7 + $0x538] sm:$0xff] }
 0x25d   :  { %v5040_v33 = vpack.c.bf16 %v1066_v31, %v1060_v30  ;;  %v944_v30 = vld [vmem:[#allocation7 + $0x168] sm:$0xff] }
 0x25f   :  { %5003 = vmatpush1.bf16.msra.mxu0 %v5002_v36  ;;  %v1072_v36 = vld [vmem:[#allocation7 + $0x568] sm:$0xff] }
 0x260   :  { %5005 = vmatprep.subr.bf16.mxu0 %v5004_v37  ;;  %v1078_v37 = vld [vmem:[#allocation7 + $0x598] sm:$0xff] }
 0x261   :  { %v5044_v39 = vpack.c.bf16 %v1078_v37, %v1072_v36  ;;  %v956_v36 = vld [vmem:[#allocation7 + $0x1c8] sm:$0xff] }
 0x263   :  { %5007 = vmatpush1.bf16.msra.mxu0 %v5006_v44  ;;  %v5046_v44 = vpack.c.bf16 %v1077_v42, %v1071_v41  ;;  %v955_v41 = vld [vmem:[#allocation7 + $0x1c0] sm:$0xff]  ;;  %v962_v42 = vld [vmem:[#allocation7 + $0x1f8] sm:$0xff] }
 0x264   :  { %5009 = vmatprep.subr.bf16.mxu0 %v5008_v45  ;;  %v1080_v45 = vld [vmem:[#allocation7 + $0x5a8] sm:$0xff] }
 0x265   :  { %v4920_v48 = vpack.c.bf16 %v1086_v46, %v1080_v45 }
 0x267   :  { %5011 = vmatpush1.bf16.msra.mxu0 %v5010_v54  ;;  %v1084_v54 = vld [vmem:[#allocation7 + $0x5c8] sm:$0xff]  ;;  %4921 = vmatprep.subr.bf16.mxu1 %v4920_v48  ;;  %v961_v48 = vld [vmem:[#allocation7 + $0x1f0] sm:$0xff] }
 0x268   :  { %5013 = vmatprep.subr.bf16.mxu0 %v5012_v55  ;;  %v4922_v55 = vpack.c.bf16 %v1085_v51, %v1079_v50  ;;  %v5048_v62 = vpack.c.bf16 %v1090_v57, %v1084_v54  ;;  %v967_v50 = vld [vmem:[#allocation7 + $0x220] sm:$0xff]  ;;  %v974_v51 = vld [vmem:[#allocation7 + $0x258] sm:$0xff]  ;;  %v980_v54 = vld [vmem:[#allocation7 + $0x288] sm:$0xff] }
 0x269   :  { %v4948_v57 = vpack.c.bf16 %v980_v54, %v974_v51  ;;  %v1082_v51 = vld [vmem:[#allocation7 + $0x5b8] sm:$0xff]  ;;  %v1088_v54 = vld [vmem:[#allocation7 + $0x5e8] sm:$0xff] }
 0x26a   :  { %4923 = vmatpush1.bf16.msra.mxu1 %v4922_v55  ;;  %v4946_v55 = vpack.c.bf16 %v967_v50, %v961_v48  ;;  %v1069_v48 = vld [vmem:[#allocation7 + $0x550] sm:$0xff]  ;;  %v1075_v50 = vld [vmem:[#allocation7 + $0x580] sm:$0xff] }
 0x26b   :  { %5015 = vmatpush1.bf16.msra.mxu0 %v5014_v0  ;;  %v5050_v0 = vpack.c.bf16 %v1089_v61, %v1083_v58  ;;  %v973_v58 = vld [vmem:[#allocation7 + $0x250] sm:$0xff]  ;;  %v979_v61 = vld [vmem:[#allocation7 + $0x280] sm:$0xff] }
 0x26c   :  { %5017 = vmatprep.subr.bf16.mxu0 %v5016_v1  ;;  %v902_v1 = vld [vmem:[#allocation7 + $0x18] sm:$0xff] }
 0x26d   :  { %v4924_v63 = vpack.c.bf16 %v908_v2, %v902_v1  ;;  %v4950_v1 = vpack.c.bf16 %v979_v61, %v973_v58  ;;  %v1081_v58 = vld [vmem:[#allocation7 + $0x5b0] sm:$0xff]  ;;  %v1087_v61 = vld [vmem:[#allocation7 + $0x5e0] sm:$0xff] }
 0x26f   :  { %5019 = vmatpush1.bf16.msra.mxu0 %v5018_v6  ;;  %4925 = vmatprep.subr.bf16.mxu1 %v4924_v63  ;;  %v732_v6 = vrot.slane %v723_v3, %v6336_v49  ;;  %v985_v63 = vld [vmem:[#allocation7 + $0x2b0] sm:$0xff]  ;;  %v991_v3 = vld [vmem:[#allocation7 + $0x2e0] sm:$0xff] }
 0x270   :  { %5021 = vmatprep.subr.bf16.mxu0 %v5020_v7 }
 0x273   :  { %5023 = vmatpush1.bf16.msra.mxu0 %v5022_v13 }
 0x274   :  { %5025 = vmatprep.subr.bf16.mxu0 %v5024_v14  ;;  %v914_v14 = vld [vmem:[#allocation7 + $0x78] sm:$0xff] }
 0x275   :  { %v4928_v21 = vpack.c.bf16 %v920_v15, %v914_v14 }
 0x277   :  { %5027 = vmatpush1.bf16.msra.mxu0 %v5026_v59 }
 0x278   :  { %5029 = vmatprep.subr.bf16.mxu0 %v5028_v19 }
 0x27b   :  { %5031 = vmatpush1.bf16.msra.mxu0 %v5030_v24 }
 0x27c   :  { %5033 = vmatprep.subr.bf16.mxu0 %v5032_v25  ;;  %v926_v25 = vld [vmem:[#allocation7 + $0xd8] sm:$0xff] }
 0x27f   :  { %5035 = vmatpush1.bf16.msra.mxu0 %v5034_v27  ;;  %v4932_v27 = vpack.c.bf16 %v932_v52, %v926_v25  ;;  %v1034_v25 = vld [vmem:[#allocation7 + $0x438] sm:$0xff]  ;;  %v1040_v52 = vld [vmem:[#allocation7 + $0x468] sm:$0xff] }
 0x280   :  { %5037 = vmatprep.subr.bf16.mxu0 %v5036_v28  ;;  %v925_v28 = vld [vmem:[#allocation7 + $0xd0] sm:$0xff] }
 0x281   :  { %v4934_v31 = vpack.c.bf16 %v931_v5, %v925_v28  ;;  %v1033_v28 = vld [vmem:[#allocation7 + $0x430] sm:$0xff]  ;;  %v1039_v5 = vld [vmem:[#allocation7 + $0x460] sm:$0xff] }
 0x283   :  { %5039 = vmatpush1.bf16.msra.mxu0 %v5038_v32  ;;  %v4936_v32 = vpack.c.bf16 %v944_v30, %v938_v29  ;;  %v1046_v29 = vld [vmem:[#allocation7 + $0x498] sm:$0xff]  ;;  %v1052_v30 = vld [vmem:[#allocation7 + $0x4c8] sm:$0xff] }
 0x284   :  { %5041 = vmatprep.subr.bf16.mxu0 %v5040_v33  ;;  %v937_v33 = vld [vmem:[#allocation7 + $0x130] sm:$0xff] }
 0x285   :  { %v4938_v37 = vpack.c.bf16 %v943_v34, %v937_v33  ;;  %v1045_v33 = vld [vmem:[#allocation7 + $0x490] sm:$0xff]  ;;  %v1051_v34 = vld [vmem:[#allocation7 + $0x4c0] sm:$0xff] }
 0x287   :  { %5043 = vmatpush1.bf16.msra.mxu0 %v5042_v38  ;;  %v4940_v38 = vpack.c.bf16 %v956_v36, %v950_v35  ;;  %v1058_v35 = vld [vmem:[#allocation7 + $0x4f8] sm:$0xff]  ;;  %v1064_v36 = vld [vmem:[#allocation7 + $0x528] sm:$0xff] }
 0x288   :  { %5045 = vmatprep.subr.bf16.mxu0 %v5044_v39  ;;  %v949_v39 = vld [vmem:[#allocation7 + $0x190] sm:$0xff] }
 0x289   :  { %v4942_v45 = vpack.c.bf16 %v955_v41, %v949_v39  ;;  %v1057_v39 = vld [vmem:[#allocation7 + $0x4f0] sm:$0xff]  ;;  %v1063_v41 = vld [vmem:[#allocation7 + $0x520] sm:$0xff] }
 0x28b   :  { %5047 = vmatpush1.bf16.msra.mxu0 %v5046_v44  ;;  %v968_v44 = vld [vmem:[#allocation7 + $0x228] sm:$0xff] }
 0x28c   :  { %5049 = vmatprep.subr.bf16.mxu0 %v5048_v62  ;;  %v4944_v46 = vpack.c.bf16 %v968_v44, %v962_v42  ;;  %v986_v62 = vld [vmem:[#allocation7 + $0x2b8] sm:$0xff]  ;;  %v1076_v44 = vld [vmem:[#allocation7 + $0x588] sm:$0xff] }
 0x28d   :  { %v1070_v42 = vld [vmem:[#allocation7 + $0x558] sm:$0xff] }
 0x28f   :  { %5051 = vmatpush1.bf16.msra.mxu0 %v5050_v0  ;;  %v992_v0 = vld [vmem:[#allocation7 + $0x2e8] sm:$0xff] }
 0x290   :  { %v4952_v2 = vpack.c.bf16 %v992_v0, %v986_v62  ;;  %v4986_v62 = vpack.c.bf16 %v1087_v61, %v1081_v58  ;;  %v6072_v0 = vmov 0.0  }
 0x291   :  { %4524 = vmatprep.subr.mxu0 %v6072_v0 }
 0x325   :  { %v878_v7 = vpop.f32.mrb[4].mxu0 }
 0x326   :  { %v5660_v9 = vadd.f32 %v878_v7, %v728_v4  ;;  %v880_v10 = vpop.f32.mrb[5].mxu0  ;;  %v4954_v7 = vpack.c.bf16 %v991_v3, %v985_v63  ;;  %v1111_v3 = vsub.s32 4, %v6327_v47 }
 0x327   :  { %v5661_v13 = vadd.f32 %v880_v10, %v732_v6  ;;  %v997_v10 = vld [vmem:[#allocation7 + $0x310] sm:$0xff] }
 0x328   :  { %v6370_v59 = vmax.f32 %v5660_v9, 0.0  ;;  %v4958_v14 = vpack.c.bf16 %v1003_v11, %v997_v10 }
 0x329   :  { %v6368_v16 = vmax.f32 %v5661_v13, 0.0  ;;  %v884_v17 = vpop.f32.mrb[6].mxu0  ;;  %v1016_v13 = vld [vmem:[#allocation7 + $0x3a8] sm:$0xff] }
 0x32a   :  { %v5662_v19 = vadd.f32 %v884_v17, %v728_v4  ;;  %v886_v20 = vpop.f32.mrb[7].mxu0  ;;  %v998_v4 = vld [vmem:[#allocation7 + $0x318] sm:$0xff]  ;;  %v4960_v15 = vpack.c.bf16 %v1016_v13, %v1010_v12  ;;  %v1009_v17 = vld [vmem:[#allocation7 + $0x370] sm:$0xff] }
 0x32b   :  { %v5663_v24 = vadd.f32 %v886_v20, %v732_v6  ;;  %1187 = vmatprep.mubr.f32.mxu1 %v6368_v16  ;;  %1341 = vmatprep.mubr.f32.mxu0 %v6368_v16  ;;  %v1004_v6 = vld [vmem:[#allocation7 + $0x348] sm:$0xff] }
 0x32c   :  { %1188 = vmatmul.mubr.f32.vlgmr.msra.gmra.mrb[4].mxu1 %v6370_v59  ;;  %1342 = vmatmul.mubr.f32.vlgmr.msra.gmra.mrb[8].mxu0 %v6370_v59  ;;  %v6378_v26 = vmax.f32 %v5662_v19, 0.0  ;;  %v4956_v9 = vpack.c.bf16 %v1004_v6, %v998_v4  ;;  %v1022_v19 = vld [vmem:[#allocation7 + $0x3d8] sm:$0xff]  ;;  %v1028_v20 = vld [vmem:[#allocation7 + $0x408] sm:$0xff] }
 0x32d   :  { %v6376_v8 = vmax.f32 %v5663_v24, 0.0  ;;  %4927 = vmatpush1.bf16.msra.mxu1 %v4926_v18  ;;  %v1015_v18 = vld [vmem:[#allocation7 + $0x3a0] sm:$0xff]  ;;  %v4964_v22 = vpack.c.bf16 %v1028_v20, %v1022_v19 }
 0x32e   :  { %4929 = vmatprep.subr.bf16.mxu1 %v4928_v21  ;;  %v4962_v21 = vpack.c.bf16 %v1015_v18, %v1009_v17  ;;  %v1027_v24 = vld [vmem:[#allocation7 + $0x400] sm:$0xff] }
 0x32f   :  { %1193 = vmatprep.mubr.f32.mxu1 %v6376_v8  ;;  %1347 = vmatprep.mubr.f32.mxu0 %v6376_v8 }
 0x330   :  { %1194 = vmatmul.mubr.f32.gmra.mrb[6].mxu1 %v6378_v26  ;;  %1348 = vmatmul.mubr.f32.gmra.mrb[10].mxu0 %v6378_v26 }
 0x331   :  { %4931 = vmatpush1.bf16.msra.mxu1 %v4930_v60  ;;  %1264 = vmatprep.mubr.f32.mxu1 %v6368_v16  ;;  %v4966_v60 = vpack.c.bf16 %v1027_v24, %v1021_v23 }
 0x332   :  { %4933 = vmatprep.subr.bf16.mxu1 %v4932_v27  ;;  %v4968_v27 = vpack.c.bf16 %v1040_v52, %v1034_v25  ;;  %4526 = vmatprep.mubr.msk.f32.mxu0 %vm6073_vm0, %v6072_v0 }
 0x335   :  { %4935 = vmatpush1.bf16.msra.mxu1 %v4934_v31  ;;  %v4970_v31 = vpack.c.bf16 %v1039_v5, %v1033_v28 }
 0x336   :  { %4937 = vmatprep.subr.bf16.mxu1 %v4936_v32  ;;  %v4972_v32 = vpack.c.bf16 %v1052_v30, %v1046_v29 }
 0x339   :  { %4939 = vmatpush1.bf16.msra.mxu1 %v4938_v37  ;;  %v4974_v37 = vpack.c.bf16 %v1051_v34, %v1045_v33 }
 0x33a   :  { %4941 = vmatprep.subr.bf16.mxu1 %v4940_v38  ;;  %v4976_v38 = vpack.c.bf16 %v1064_v36, %v1058_v35 }
 0x33d   :  { %4943 = vmatpush1.bf16.msra.mxu1 %v4942_v45  ;;  %v4978_v45 = vpack.c.bf16 %v1063_v41, %v1057_v39 }
 0x33e   :  { %4945 = vmatprep.subr.bf16.mxu1 %v4944_v46  ;;  %v4980_v46 = vpack.c.bf16 %v1076_v44, %v1070_v42 }
 0x341   :  { %4947 = vmatpush1.bf16.msra.mxu1 %v4946_v55  ;;  %v4982_v55 = vpack.c.bf16 %v1075_v50, %v1069_v48 }
 0x342   :  { %4949 = vmatprep.subr.bf16.mxu1 %v4948_v57  ;;  %v4984_v57 = vpack.c.bf16 %v1088_v54, %v1082_v51 }
 0x345   :  { %4951 = vmatpush1.bf16.msra.mxu1 %v4950_v1  ;;  %v1115_v1 = vsub.s32 5, %v6327_v47 }
 0x346   :  { %4953 = vmatprep.subr.bf16.mxu1 %v4952_v2  ;;  %v1091_v2 = vld [vmem:[%s6112_s29] sm:$0x3f]  ;;  %s6858_s29 = sld [smem:[#allocation29_spill]] }
 0x347   :  { %v1116_v63 = vrot.slane %v1091_v2, %v1115_v1  ;;  %v1096_v11 = vrot.slane %v1091_v2, %v6330_v56  ;;  %v1112_v12 = vrot.slane %v1091_v2, %v1111_v3  ;;  %v1100_v13 = vrot.slane %v1091_v2, %v6336_v49 }
 0x348   :  { %v1104_v23 = vrot.slane %v1091_v2, %v6357_v53 }
 0x349   :  { %4955 = vmatpush1.bf16.msra.mxu1 %v4954_v7 }
 0x34a   :  { %4957 = vmatprep.subr.bf16.mxu1 %v4956_v9 }
 0x34d   :  { %4959 = vmatpush1.bf16.msra.mxu1 %v4958_v14 }
 0x34e   :  { %4961 = vmatprep.subr.bf16.mxu1 %v4960_v15 }
 0x351   :  { %4963 = vmatpush1.bf16.msra.mxu1 %v4962_v21 }
 0x352   :  { %4965 = vmatprep.subr.bf16.mxu1 %v4964_v22 }
 0x355   :  { %4967 = vmatpush1.bf16.msra.mxu1 %v4966_v60 }
 0x356   :  { %4969 = vmatprep.subr.bf16.mxu1 %v4968_v27  ;;  %v1108_v27 = vrot.slane %v1091_v2, %v6343_v43 }
 0x359   :  { %4971 = vmatpush1.bf16.msra.mxu1 %v4970_v31 }
 0x35a   :  { %4973 = vmatprep.subr.bf16.mxu1 %v4972_v32  ;;  %v896_v32 = vand.u32 127, %v413_v40 }
 0x35c   :  { %vm897_vm1 = vcmp.gt.s32.totalorder %v6327_v47, %v896_v32 }
 0x35d   :  { %4975 = vmatpush1.bf16.msra.mxu1 %v4974_v37  ;;  %v6423_v33 = vsel %vm897_vm1, -1e+30, %v6072_v0 }
 0x35e   :  { %4977 = vmatprep.subr.bf16.mxu1 %v4976_v38 }
 0x361   :  { %4979 = vmatpush1.bf16.msra.mxu1 %v4978_v45 }
 0x362   :  { %4981 = vmatprep.subr.bf16.mxu1 %v4980_v46 }
 0x365   :  { %4983 = vmatpush1.bf16.msra.mxu1 %v4982_v55 }
 0x366   :  { %4985 = vmatprep.subr.bf16.mxu1 %v4984_v57 }
 0x369   :  { %4987 = vmatpush1.bf16.msra.mxu1 %v4986_v62 }
 0x36a   :  { %4539 = vmatprep.subr.mxu1 %v6072_v0 }
 0x36c   :  { %1265 = vmatmul.mubr.f32.vlgmr.msra.gmra.mrb[8].mxu1 %v6370_v59 }
 0x36d   :  { %1270 = vmatprep.mubr.f32.mxu1 %v6376_v8 }
 0x370   :  { %1271 = vmatmul.mubr.f32.gmra.mrb[10].mxu1 %v6378_v26 }
 0x371   :  { %4541 = vmatprep.mubr.msk.f32.mxu1 %vm6073_vm0, %v6072_v0 }
 0x3ff   :  { %v1189_v4 = vpop.f32.mrb[4].mxu1  ;;  %v1343_v6 = vpop.f32.mrb[8].mxu0 }
 0x400   :  { %v1191_v7 = vpop.f32.mrb[5].mxu1  ;;  %v1345_v9 = vpop.f32.mrb[9].mxu0  ;;  %v1190_v60 = vadd.f32 %v1189_v4, %v1096_v11  ;;  %v1344_v5 = vadd.f32 %v1343_v6, %v1112_v12 }
 0x401   :  { %v1346_v10 = vadd.f32 %v1345_v9, %v1116_v63  ;;  %v1192_v50 = vadd.f32 %v1191_v7, %v1100_v13 }
 0x403   :  { %v1195_v14 = vpop.f32.mrb[6].mxu1  ;;  %v1349_v15 = vpop.f32.mrb[10].mxu0  ;;  %4540 = vmatpush3.msra.mxu1 %v1346_v10 }
 0x404   :  { %v6403_v17 = vadd.f32 %v1195_v14, %v1096_v11  ;;  %v6405_v18 = vadd.f32 %v1349_v15, %v1112_v12  ;;  %v1197_v19 = vpop.f32.mrb[7].mxu1  ;;  %v1351_v20 = vpop.f32.mrb[11].mxu0  ;;  %4544 = vmatprep.subr.mxu1 %v6072_v0 }
 0x405   :  { %v6408_v21 = vadd.f32 %v1197_v19, %v1100_v13  ;;  %v6410_v22 = vadd.f32 %v1351_v20, %v1116_v63 }
 0x43f   :  { %v1266_v24 = vpop.f32.mrb[8].mxu1 }
 0x440   :  { %v1267_v25 = vadd.f32 %v1266_v24, %v1104_v23  ;;  %v1268_v52 = vpop.f32.mrb[9].mxu1 }
 0x441   :  { %v1269_v48 = vadd.f32 %v1268_v52, %v1108_v27 }
 0x442   :  { %4525 = vmatpush3.xpose.msra.mxu0 %v1267_v25 }
 0x443   :  { %v1272_v28 = vpop.f32.mrb[10].mxu1  ;;  %4529 = vmatprep.subr.mxu0 %v6072_v0 }
 0x444   :  { %v1273_v29 = vadd.f32 %v1272_v28, %v1104_v23  ;;  %v1274_v30 = vpop.f32.mrb[11].mxu1 }
 0x445   :  { %v6415_v31 = vadd.f32 %v1274_v30, %v1108_v27  ;;  %4527 = vmatmul.mubr.f32.vlgmr.msra.gmra.mrb[12].mxu0 %v1190_v60 }
 0x446   :  { %4530 = vmatpush3.msra.mxu0 %v1344_v5  ;;  %4531 = vmatprep.mubr.msk.f32.mxu0 %vm6073_vm0, %v6072_v0 }
 0x447   :  { %4534 = vmatprep.subr.mxu0 %v6072_v0 }
 0x518   :  { %v1420_v34 = vpop.f32.mrb[12].mxu0 }
 0x519   :  { %v1421_v35 = vadd.f32 %v1420_v34, %v6423_v33  ;;  %v4528_v36 = vpop.f32.mrb[13].mxu0 }
 0x51a   :  { %v1980_v36 = vld [vmem:[#allocation8 + $0x8] sm:$0xff] }
 0x51b   :  { %v1425_v37 = vsel %vm1424_vm2, %v1421_v35, -inf }
 0x51c   :  { %1426 = vmax.xlane.f32.xlu0 %v1425_v37  ;;  %v1982_v37 = vld [vmem:[#allocation8 + $0x18] sm:$0xff] }
 0x5a9   :  { %v1427_v38 = vpop.xlane.xlu0 %1426 }
 0x5aa   :  { %v1428_v39 = vsub.f32 %v1421_v35, %v1427_v38  ;;  %v5052_v38 = vpack.c.bf16 %v1982_v37, %v1980_v36  ;;  %v2009_v36 = vld [vmem:[#allocation8 + $0xf0] sm:$0xff]  ;;  %v2012_v37 = vld [vmem:[#allocation8 + $0x108] sm:$0xff] }
 0x5ac   :  { %v1429_v41 = vmul.f32 1.442695, %v1428_v39 }
 0x5ae   :  { %5720 = vpow2.f32 %v1429_v41  ;;  %v1979_v41 = vld [vmem:[#allocation8] sm:$0xff] }
 0x5b8   :  { %v5721_v42 = vpop.eup %5720 }
 0x5b9   :  { %v1431_v40 = vsel %vm1424_vm2, %v5721_v42, 0.0 }
 0x5ba   :  { %1432 = vadd.xlane.f32.xlu0 %v1431_v40  ;;  %v1984_v40 = vld [vmem:[#allocation8 + $0x28] sm:$0xff] }
 0x647   :  { %v1433_v44 = vpop.xlane.xlu0 %1432 }
 0x648   :  { %5722 = vrcp.f32 %v1433_v44  ;;  %v1986_v44 = vld [vmem:[#allocation8 + $0x38] sm:$0xff] }
 0x652   :  { %v5723_v45 = vpop.eup %5722 }
 0x653   :  { %v1435_v46 = vmul.f32 %v5723_v45, %v5721_v42  ;;  %v1981_v42 = vld [vmem:[#allocation8 + $0x10] sm:$0xff] }
 0x655   :  { %4532 = vmatmul.mubr.msk.f32.vlgmr.msra.gmra.mrb[14].mxu0 %vm1424_vm2, %v1435_v46  ;;  %v5054_v46 = vpack.c.bf16 %v1981_v42, %v1979_v41  ;;  %v2011_v42 = vld [vmem:[#allocation8 + $0x100] sm:$0xff] }
 0x656   :  { %4535 = vmatpush3.xpose.msra.mxu0 %v1269_v48  ;;  %4536 = vmatprep.mubr.msk.f32.mxu0 %vm6073_vm0, %v6072_v0 }
 0x659   :  { %4537 = vmatmul.mubr.f32.vlgmr.msra.gmra.mrb[16].mxu0 %v1192_v50  ;;  %v5056_v50 = vpack.c.bf16 %v1986_v44, %v1984_v40  ;;  %v2013_v40 = vld [vmem:[#allocation8 + $0x110] sm:$0xff]  ;;  %v2016_v44 = vld [vmem:[#allocation8 + $0x128] sm:$0xff] }
 0x728   :  { %v6431_v51 = vpop.f32.mrb[14].mxu0 }
 0x729   :  { %v4533_v54 = vpop.f32.mrb[15].mxu0 }
 0x72a   :  { %v1983_v54 = vld [vmem:[#allocation8 + $0x20] sm:$0xff] }
 0x72c   :  { %v1576_v55 = vpop.f32.mrb[16].mxu0 }
 0x72d   :  { %v1577_v57 = vadd.f32 %v1576_v55, %v6423_v33  ;;  %v4538_v58 = vpop.f32.mrb[17].mxu0  ;;  %v1985_v55 = vld [vmem:[#allocation8 + $0x30] sm:$0xff] }
 0x72e   :  { %v1990_v58 = vld [vmem:[#allocation8 + $0x58] sm:$0xff] }
 0x72f   :  { %v1580_v61 = vsel %vm1424_vm2, %v1577_v57, -inf }
 0x730   :  { %1581 = vmax.xlane.f32.xlu1 %v1580_v61  ;;  %v5058_v61 = vpack.c.bf16 %v1985_v55, %v1983_v54  ;;  %v2017_v54 = vld [vmem:[#allocation8 + $0x130] sm:$0xff]  ;;  %v2020_v55 = vld [vmem:[#allocation8 + $0x148] sm:$0xff] }
 0x7bd   :  { %v1582_v62 = vpop.xlane.xlu1 %1581 }
 0x7be   :  { %v1583_v2 = vsub.f32 %v1577_v57, %v1582_v62  ;;  %v1988_v57 = vld [vmem:[#allocation8 + $0x48] sm:$0xff] }
 0x7bf   :  { %v5060_v62 = vpack.c.bf16 %v1990_v58, %v1988_v57  ;;  %v2022_v57 = vld [vmem:[#allocation8 + $0x158] sm:$0xff] }
 0x7c0   :  { %v1584_v63 = vmul.f32 1.442695, %v1583_v2  ;;  %v1987_v2 = vld [vmem:[#allocation8 + $0x40] sm:$0xff] }
 0x7c2   :  { %5724 = vpow2.f32 %v1584_v63  ;;  %v1989_v63 = vld [vmem:[#allocation8 + $0x50] sm:$0xff] }
 0x7cc   :  { %v5725_v4 = vpop.eup %5724 }
 0x7cd   :  { %v1586_v6 = vsel %vm1424_vm2, %v5725_v4, 0.0 }
 0x7ce   :  { %1587 = vadd.xlane.f32.xlu1 %v1586_v6  ;;  %v1994_v6 = vld [vmem:[#allocation8 + $0x78] sm:$0xff] }
 0x85b   :  { %v1588_v7 = vpop.xlane.xlu1 %1587 }
 0x85c   :  { %5726 = vrcp.f32 %v1588_v7  ;;  %v5062_v7 = vpack.c.bf16 %v1989_v63, %v1987_v2  ;;  %v2021_v2 = vld [vmem:[#allocation8 + $0x150] sm:$0xff]  ;;  %v2024_v63 = vld [vmem:[#allocation8 + $0x168] sm:$0xff] }
 0x866   :  { %v5727_v9 = vpop.eup %5726 }
 0x867   :  { %v1590_v10 = vmul.f32 %v5727_v9, %v5725_v4  ;;  %v1992_v4 = vld [vmem:[#allocation8 + $0x68] sm:$0xff] }
 0x868   :  { %v5064_v9 = vpack.c.bf16 %v1994_v6, %v1992_v4  ;;  %v2026_v4 = vld [vmem:[#allocation8 + $0x178] sm:$0xff] }
 0x869   :  { %4542 = vmatmul.mubr.msk.f32.vlgmr.msra.gmra.mrb[12].mxu1 %vm1424_vm2, %v1590_v10  ;;  %v1991_v10 = vld [vmem:[#allocation8 + $0x60] sm:$0xff] }
 0x86a   :  { %4545 = vmatpush3.xpose.msra.mxu1 %v1273_v29  ;;  %4546 = vmatprep.mubr.msk.f32.mxu1 %vm6073_vm0, %v6072_v0 }
 0x86b   :  { %4549 = vmatprep.subr.mxu1 %v6072_v0 }
 0x86d   :  { %4547 = vmatmul.mubr.f32.vlgmr.msra.gmra.mrb[14].mxu1 %v6403_v17 }
 0x86e   :  { %4550 = vmatpush3.msra.mxu1 %v6405_v18  ;;  %4551 = vmatprep.mubr.msk.f32.mxu1 %vm6073_vm0, %v6072_v0 }
 0x86f   :  { %4554 = vmatprep.subr.mxu1 %v6072_v0 }
 0x93c   :  { %v1660_v11 = vpop.f32.mrb[12].mxu1 }
 0x93d   :  { %v4543_v12 = vpop.f32.mrb[13].mxu1 }
 0x93e   :  { %v1993_v12 = vld [vmem:[#allocation8 + $0x70] sm:$0xff] }
 0x940   :  { %v1731_v13 = vpop.f32.mrb[14].mxu1 }
 0x941   :  { %v1732_v14 = vadd.f32 %v1731_v13, %v6423_v33  ;;  %v4548_v15 = vpop.f32.mrb[15].mxu1  ;;  %v1996_v13 = vld [vmem:[#allocation8 + $0x88] sm:$0xff] }
 0x942   :  { %v5066_v15 = vpack.c.bf16 %v1993_v12, %v1991_v10  ;;  %v2025_v10 = vld [vmem:[#allocation8 + $0x170] sm:$0xff]  ;;  %v2028_v12 = vld [vmem:[#allocation8 + $0x188] sm:$0xff] }
 0x943   :  { %v1735_v19 = vsel %vm1424_vm2, %v1732_v14, -inf }
 0x944   :  { %1736 = vmax.xlane.f32.xlu0 %v1735_v19 }
 0x9d1   :  { %v1737_v20 = vpop.xlane.xlu0 %1736 }
 0x9d2   :  { %v1738_v23 = vsub.f32 %v1732_v14, %v1737_v20  ;;  %v1998_v14 = vld [vmem:[#allocation8 + $0x98] sm:$0xff]  ;;  %v1997_v20 = vld [vmem:[#allocation8 + $0x90] sm:$0xff] }
 0x9d3   :  { %v5068_v19 = vpack.c.bf16 %v1998_v14, %v1996_v13  ;;  %v2030_v13 = vld [vmem:[#allocation8 + $0x198] sm:$0xff] }
 0x9d4   :  { %v1739_v24 = vmul.f32 1.442695, %v1738_v23  ;;  %v2000_v23 = vld [vmem:[#allocation8 + $0xa8] sm:$0xff] }
 0x9d6   :  { %5728 = vpow2.f32 %v1739_v24  ;;  %v2002_v24 = vld [vmem:[#allocation8 + $0xb8] sm:$0xff] }
 0x9e0   :  { %v5729_v17 = vpop.eup %5728 }
 0x9e1   :  { %v1741_v18 = vsel %vm1424_vm2, %v5729_v17, 0.0 }
 0x9e2   :  { %1742 = vadd.xlane.f32.xlu1 %v1741_v18  ;;  %v5072_v18 = vpack.c.bf16 %v2002_v24, %v2000_v23  ;;  %v2034_v23 = vld [vmem:[#allocation8 + $0x1b8] sm:$0xff] }
 0xa6f   :  { %v1743_v25 = vpop.xlane.xlu1 %1742 }
 0xa70   :  { %5730 = vrcp.f32 %v1743_v25  ;;  %v1999_v25 = vld [vmem:[#allocation8 + $0xa0] sm:$0xff] }
 0xa7a   :  { %v5731_v52 = vpop.eup %5730 }
 0xa7b   :  { %v1745_v60 = vmul.f32 %v5731_v52, %v5729_v17  ;;  %v2001_v52 = vld [vmem:[#allocation8 + $0xb0] sm:$0xff] }
 0xa7d   :  { %4552 = vmatmul.mubr.msk.f32.vlgmr.msra.gmra.mrb[16].mxu1 %vm1424_vm2, %v1745_v60  ;;  %v2004_v60 = vld [vmem:[#allocation8 + $0xc8] sm:$0xff] }
 0xa7e   :  { %4555 = vmatpush3.xpose.msra.mxu1 %v6415_v31  ;;  %4556 = vmatprep.mubr.msk.f32.mxu1 %vm6073_vm0, %v6072_v0 }
 0xa7f   :  { %4559 = vmatprep.subr.mxu1 %v6072_v0 }
 0xa81   :  { %4557 = vmatmul.mubr.f32.vlgmr.msra.gmra.mrb[18].mxu1 %v6408_v21 }
 0xa82   :  { %4560 = vmatpush3.msra.mxu1 %v6410_v22  ;;  %4561 = vmatprep.mubr.msk.f32.mxu1 %vm6073_vm0, %v6072_v0 }
 0xa83   :  { %5053 = vmatprep.subr.bf16.mxu1 %v5052_v38  ;;  %v2014_v38 = vld [vmem:[#allocation8 + $0x118] sm:$0xff] }
 0xa84   :  { %v5084_v41 = vpack.c.bf16 %v2014_v38, %v2012_v37  ;;  %v2209_v37 = vld [vmem:[#allocation10 + $0x8] sm:$0xff]  ;;  %v2211_v38 = vld [vmem:[#allocation10 + $0x18] sm:$0xff] }
 0xb50   :  { %v6457_v27 = vpop.f32.mrb[16].mxu1 }
 0xb51   :  { %v4553_v28 = vpop.f32.mrb[17].mxu1 }
 0xb52   :  { %v2006_v28 = vld [vmem:[#allocation8 + $0xd8] sm:$0xff] }
 0xb54   :  { %v1886_v5 = vpop.f32.mrb[18].mxu1 }
 0xb55   :  { %v1887_v29 = vadd.f32 %v1886_v5, %v6423_v33  ;;  %v4558_v30 = vpop.f32.mrb[19].mxu1  ;;  %v5074_v5 = vpack.c.bf16 %v2001_v52, %v1999_v25  ;;  %v2033_v25 = vld [vmem:[#allocation8 + $0x1b0] sm:$0xff]  ;;  %v2036_v52 = vld [vmem:[#allocation8 + $0x1c8] sm:$0xff] }
 0xb56   :  { %v2003_v30 = vld [vmem:[#allocation8 + $0xc0] sm:$0xff] }
 0xb57   :  { %v1890_v31 = vsel %vm1424_vm2, %v1887_v29, -inf }
 0xb58   :  { %1891 = vmax.xlane.f32.xlu0 %v1890_v31  ;;  %v2005_v31 = vld [vmem:[#allocation8 + $0xd0] sm:$0xff] }
 0xbe5   :  { %v1892_v32 = vpop.xlane.xlu0 %1891 }
 0xbe6   :  { %v1893_v34 = vsub.f32 %v1887_v29, %v1892_v32  ;;  %v5076_v29 = vpack.c.bf16 %v2006_v28, %v2004_v60  ;;  %v2008_v32 = vld [vmem:[#allocation8 + $0xe8] sm:$0xff]  ;;  %v2038_v60 = vld [vmem:[#allocation8 + $0x1d8] sm:$0xff] }
 0xbe8   :  { %v1894_v35 = vmul.f32 1.442695, %v1893_v34  ;;  %v2010_v34 = vld [vmem:[#allocation8 + $0xf8] sm:$0xff] }
 0xbea   :  { %5732 = vpow2.f32 %v1894_v35  ;;  %v5078_v35 = vpack.c.bf16 %v2005_v31, %v2003_v30  ;;  %v2037_v30 = vld [vmem:[#allocation8 + $0x1d0] sm:$0xff]  ;;  %v2040_v31 = vld [vmem:[#allocation8 + $0x1e8] sm:$0xff] }
 0xbf4   :  { %v5733_v21 = vpop.eup %5732 }
 0xbf5   :  { %v1896_v22 = vsel %vm1424_vm2, %v5733_v21, 0.0 }
 0xbf6   :  { %1897 = vadd.xlane.f32.xlu1 %v1896_v22  ;;  %v2007_v22 = vld [vmem:[#allocation8 + $0xe0] sm:$0xff] }
 0xc83   :  { %v1898_v39 = vpop.xlane.xlu1 %1897 }
 0xc84   :  { %5734 = vrcp.f32 %v1898_v39  ;;  %v5082_v39 = vpack.c.bf16 %v2009_v36, %v2007_v22  ;;  %v2041_v22 = vld [vmem:[#allocation8 + $0x1f0] sm:$0xff] }
 0xc8e   :  { %v5735_v45 = vpop.eup %5734 }
 0xc8f   :  { %v1900_v48 = vmul.f32 %v5735_v45, %v5733_v21  ;;  %v5080_v21 = vpack.c.bf16 %v2010_v34, %v2008_v32  ;;  %v2018_v45 = vld [vmem:[#allocation8 + $0x138] sm:$0xff] }
 0xc90   :  { %v2042_v32 = vld [vmem:[#allocation8 + $0x1f8] sm:$0xff] }
 0xc91   :  { %4562 = vmatmul.mubr.msk.f32.vlgmr.msra.gmra.mrb[20].mxu1 %vm1424_vm2, %v1900_v48  ;;  %v5088_v48 = vpack.c.bf16 %v2018_v45, %v2016_v44  ;;  %v2215_v44 = vld [vmem:[#allocation10 + $0x38] sm:$0xff] }
 0xc92   :  { %5055 = vmatpush1.bf16.msra.mxu1 %v5054_v46  ;;  %2107 = vmatprep.mubr.f32.mxu1 %v1660_v11  ;;  %v1995_v11 = vld [vmem:[#allocation8 + $0x80] sm:$0xff]  ;;  %v5086_v46 = vpack.c.bf16 %v2013_v40, %v2011_v42  ;;  %v2210_v42 = vld [vmem:[#allocation10 + $0x10] sm:$0xff]  ;;  %v2213_v40 = vld [vmem:[#allocation10 + $0x28] sm:$0xff] }
 0xc93   :  { %5057 = vmatprep.subr.bf16.mxu1 %v5056_v50  ;;  %v5070_v17 = vpack.c.bf16 %v1997_v20, %v1995_v11  ;;  %v2015_v50 = vld [vmem:[#allocation8 + $0x120] sm:$0xff]  ;;  %v2029_v11 = vld [vmem:[#allocation8 + $0x190] sm:$0xff]  ;;  %v2032_v20 = vld [vmem:[#allocation8 + $0x1a8] sm:$0xff] }
 0xc94   :  { %v5090_v58 = vpack.c.bf16 %v2017_v54, %v2015_v50  ;;  %v2214_v50 = vld [vmem:[#allocation10 + $0x30] sm:$0xff]  ;;  %v2217_v54 = vld [vmem:[#allocation10 + $0x48] sm:$0xff] }
 0xc96   :  { %5059 = vmatpush1.bf16.msra.mxu1 %v5058_v61  ;;  %v5092_v61 = vpack.c.bf16 %v2022_v57, %v2020_v55  ;;  %v2219_v55 = vld [vmem:[#allocation10 + $0x58] sm:$0xff] }
 0xc97   :  { %5061 = vmatprep.subr.bf16.mxu1 %v5060_v62  ;;  %v2019_v62 = vld [vmem:[#allocation8 + $0x140] sm:$0xff] }
 0xc98   :  { %v5094_v6 = vpack.c.bf16 %v2021_v2, %v2019_v62  ;;  %v2221_v62 = vld [vmem:[#allocation10 + $0x68] sm:$0xff]  ;;  %v2223_v2 = vld [vmem:[#allocation10 + $0x78] sm:$0xff] }
 0xc9a   :  { %5063 = vmatpush1.bf16.msra.mxu1 %v5062_v7  ;;  %v5096_v7 = vpack.c.bf16 %v2026_v4, %v2024_v63  ;;  %v5128_v4 = vpack.c.bf16 %v2223_v2, %v2221_v62 }
 0xc9b   :  { %5065 = vmatprep.subr.bf16.mxu1 %v5064_v9  ;;  %v2023_v9 = vld [vmem:[#allocation8 + $0x160] sm:$0xff] }
 0xc9c   :  { %v5098_v14 = vpack.c.bf16 %v2025_v10, %v2023_v9  ;;  %v2225_v9 = vld [vmem:[#allocation10 + $0x88] sm:$0xff]  ;;  %v2227_v10 = vld [vmem:[#allocation10 + $0x98] sm:$0xff] }
 0xc9e   :  { %5067 = vmatpush1.bf16.msra.mxu1 %v5066_v15  ;;  %v5100_v15 = vpack.c.bf16 %v2030_v13, %v2028_v12  ;;  %v5132_v13 = vpack.c.bf16 %v2227_v10, %v2225_v9  ;;  %v2249_v9 = vld [vmem:[#allocation10 + $0x148] sm:$0xff] }
 0xc9f   :  { %5069 = vmatprep.subr.bf16.mxu1 %v5068_v19  ;;  %v2027_v19 = vld [vmem:[#allocation8 + $0x180] sm:$0xff] }
 0xca0   :  { %v5102_v24 = vpack.c.bf16 %v2029_v11, %v2027_v19  ;;  %v2229_v19 = vld [vmem:[#allocation10 + $0xa8] sm:$0xff]  ;;  %v2231_v11 = vld [vmem:[#allocation10 + $0xb8] sm:$0xff] }
 0xca2   :  { %5071 = vmatpush1.bf16.msra.mxu1 %v5070_v17  ;;  %v5104_v17 = vpack.c.bf16 %v2034_v23, %v2032_v20  ;;  %v5136_v23 = vpack.c.bf16 %v2231_v11, %v2229_v19  ;;  %v2255_v19 = vld [vmem:[#allocation10 + $0x178] sm:$0xff] }
 0xca3   :  { %5073 = vmatprep.subr.bf16.mxu1 %v5072_v18  ;;  %v2031_v18 = vld [vmem:[#allocation8 + $0x1a0] sm:$0xff] }
 0xca4   :  { %v5106_v28 = vpack.c.bf16 %v2033_v25, %v2031_v18  ;;  %v2233_v18 = vld [vmem:[#allocation10 + $0xc8] sm:$0xff]  ;;  %v2235_v25 = vld [vmem:[#allocation10 + $0xd8] sm:$0xff] }
 0xca6   :  { %5075 = vmatpush1.bf16.msra.mxu1 %v5074_v5  ;;  %v5108_v5 = vpack.c.bf16 %v2038_v60, %v2036_v52  ;;  %v5140_v60 = vpack.c.bf16 %v2235_v25, %v2233_v18  ;;  %v2259_v18 = vld [vmem:[#allocation10 + $0x198] sm:$0xff] }
 0xca7   :  { %5077 = vmatprep.subr.bf16.mxu1 %v5076_v29  ;;  %v2035_v29 = vld [vmem:[#allocation8 + $0x1c0] sm:$0xff] }
 0xca8   :  { %v5110_v34 = vpack.c.bf16 %v2037_v30, %v2035_v29  ;;  %v2237_v29 = vld [vmem:[#allocation10 + $0xe8] sm:$0xff]  ;;  %v2239_v30 = vld [vmem:[#allocation10 + $0xf8] sm:$0xff] }
 0xcaa   :  { %5079 = vmatpush1.bf16.msra.mxu1 %v5078_v35  ;;  %v5112_v35 = vpack.c.bf16 %v2042_v32, %v2040_v31  ;;  %v5144_v32 = vpack.c.bf16 %v2239_v30, %v2237_v29  ;;  %v2263_v29 = vld [vmem:[#allocation10 + $0x1b8] sm:$0xff]  ;;  %v2260_v30 = vld [vmem:[#allocation10 + $0x1a0] sm:$0xff] }
 0xcab   :  { %5081 = vmatprep.subr.bf16.mxu1 %v5080_v21  ;;  %v2039_v21 = vld [vmem:[#allocation8 + $0x1e0] sm:$0xff] }
 0xcac   :  { %v5114_v36 = vpack.c.bf16 %v2041_v22, %v2039_v21  ;;  %v2241_v21 = vld [vmem:[#allocation10 + $0x108] sm:$0xff]  ;;  %v2243_v22 = vld [vmem:[#allocation10 + $0x118] sm:$0xff] }
 0xcae   :  { %5083 = vmatpush1.bf16.msra.mxu1 %v5082_v39  ;;  %v2208_v39 = vld [vmem:[#allocation10] sm:$0xff] }
 0xcaf   :  { %5085 = vmatprep.subr.bf16.mxu1 %v5084_v41  ;;  %v5116_v41 = vpack.c.bf16 %v2211_v38, %v2209_v37  ;;  %v5118_v45 = vpack.c.bf16 %v2210_v42, %v2208_v39  ;;  %v5148_v37 = vpack.c.bf16 %v2243_v22, %v2241_v21  ;;  %v2240_v38 = vld [vmem:[#allocation10 + $0x100] sm:$0xff]  ;;  %v2242_v39 = vld [vmem:[#allocation10 + $0x110] sm:$0xff]  ;;  %v2247_v42 = vld [vmem:[#allocation10 + $0x138] sm:$0xff] }
 0xcb1   :  { %5117 = vmatprep.subr.bf16.mxu0 %v5116_v41  ;;  %v2245_v41 = vld [vmem:[#allocation10 + $0x128] sm:$0xff] }
 0xcb2   :  { %5087 = vmatpush1.bf16.msra.mxu1 %v5086_v46  ;;  %v5120_v46 = vpack.c.bf16 %v2215_v44, %v2213_v40  ;;  %5119 = vmatpush1.bf16.msra.mxu0 %v5118_v45  ;;  %v5150_v40 = vpack.c.bf16 %v2242_v39, %v2240_v38  ;;  %v5152_v44 = vpack.c.bf16 %v2247_v42, %v2245_v41  ;;  %v2244_v45 = vld [vmem:[#allocation10 + $0x120] sm:$0xff]  ;;  %v2269_v38 = vld [vmem:[#allocation10 + $0x1e8] sm:$0xff]  ;;  %v2271_v39 = vld [vmem:[#allocation10 + $0x1f8] sm:$0xff] }
 0xcb3   :  { %5089 = vmatprep.subr.bf16.mxu1 %v5088_v48  ;;  %v2212_v48 = vld [vmem:[#allocation10 + $0x20] sm:$0xff]  ;;  %v5176_v42 = vpack.c.bf16 %v2271_v39, %v2269_v38  ;;  %v2375_v38 = vld [vmem:[#allocation11 + $0x50] sm:$0xff]  ;;  %v2378_v39 = vld [vmem:[#allocation11 + $0x68] sm:$0xff] }
 0xcb4   :  { %v5122_v57 = vpack.c.bf16 %v2214_v50, %v2212_v48  ;;  %5121 = vmatprep.subr.bf16.mxu0 %v5120_v46  ;;  %v2246_v46 = vld [vmem:[#allocation10 + $0x130] sm:$0xff] }
 0xcb5   :  { %v5154_v48 = vpack.c.bf16 %v2246_v46, %v2244_v45 }
 0xcb6   :  { %5091 = vmatpush1.bf16.msra.mxu1 %v5090_v58  ;;  %v5124_v58 = vpack.c.bf16 %v2219_v55, %v2217_v54  ;;  %5123 = vmatpush1.bf16.msra.mxu0 %v5122_v57  ;;  %v2124_v55 = vld [vmem:[%s6855_s5] sm:$0x3] }
 0xcb7   :  { %5093 = vmatprep.subr.bf16.mxu1 %v5092_v61  ;;  %v2216_v61 = vld [vmem:[#allocation10 + $0x40] sm:$0xff]  ;;  %v6467_v57 = vrot.slane %v2124_v55, %v6330_v56 }
 0xcb8   :  { %5125 = vmatprep.subr.bf16.mxu0 %v5124_v58 }
 0xcba   :  { %5095 = vmatpush1.bf16.msra.mxu1 %v5094_v6  ;;  %v2220_v6 = vld [vmem:[#allocation10 + $0x60] sm:$0xff] }
 0xcbb   :  { %5097 = vmatprep.subr.bf16.mxu1 %v5096_v7  ;;  %v2222_v7 = vld [vmem:[#allocation10 + $0x70] sm:$0xff] }
 0xcbc   :  { %v5130_v12 = vpack.c.bf16 %v2222_v7, %v2220_v6 }
 0xcbe   :  { %5099 = vmatpush1.bf16.msra.mxu1 %v5098_v14  ;;  %v2224_v14 = vld [vmem:[#allocation10 + $0x80] sm:$0xff] }
 0xcbf   :  { %5101 = vmatprep.subr.bf16.mxu1 %v5100_v15  ;;  %v2226_v15 = vld [vmem:[#allocation10 + $0x90] sm:$0xff] }
 0xcc0   :  { %v5134_v20 = vpack.c.bf16 %v2226_v15, %v2224_v14  ;;  %v2253_v15 = vld [vmem:[#allocation10 + $0x168] sm:$0xff] }
 0xcc1   :  { %v5160_v11 = vpack.c.bf16 %v2255_v19, %v2253_v15 }
 0xcc2   :  { %5103 = vmatpush1.bf16.msra.mxu1 %v5102_v24  ;;  %v2228_v24 = vld [vmem:[#allocation10 + $0xa0] sm:$0xff] }
 0xcc3   :  { %5105 = vmatprep.subr.bf16.mxu1 %v5104_v17  ;;  %v2230_v17 = vld [vmem:[#allocation10 + $0xb0] sm:$0xff] }
 0xcc4   :  { %v5138_v52 = vpack.c.bf16 %v2230_v17, %v2228_v24  ;;  %v2257_v17 = vld [vmem:[#allocation10 + $0x188] sm:$0xff] }
 0xcc5   :  { %v5164_v25 = vpack.c.bf16 %v2259_v18, %v2257_v17  ;;  %v2366_v18 = vld [vmem:[#allocation11 + $0x8] sm:$0xff] }
 0xcc6   :  { %5107 = vmatpush1.bf16.msra.mxu1 %v5106_v28  ;;  %v2232_v28 = vld [vmem:[#allocation10 + $0xc0] sm:$0xff] }
 0xcc7   :  { %5109 = vmatprep.subr.bf16.mxu1 %v5108_v5  ;;  %v2234_v5 = vld [vmem:[#allocation10 + $0xd0] sm:$0xff] }
 0xcc8   :  { %v5142_v31 = vpack.c.bf16 %v2234_v5, %v2232_v28  ;;  %v2261_v28 = vld [vmem:[#allocation10 + $0x1a8] sm:$0xff] }
 0xcca   :  { %5111 = vmatpush1.bf16.msra.mxu1 %v5110_v34  ;;  %v2236_v34 = vld [vmem:[#allocation10 + $0xe0] sm:$0xff] }
 0xccb   :  { %5113 = vmatprep.subr.bf16.mxu1 %v5112_v35  ;;  %v2238_v35 = vld [vmem:[#allocation10 + $0xf0] sm:$0xff] }
 0xcce   :  { %5115 = vmatpush1.bf16.msra.mxu1 %v5114_v36  ;;  %v5146_v36 = vpack.c.bf16 %v2238_v35, %v2236_v34  ;;  %v2265_v34 = vld [vmem:[#allocation10 + $0x1c8] sm:$0xff]  ;;  %v2267_v35 = vld [vmem:[#allocation10 + $0x1d8] sm:$0xff] }
 0xccf   :  { %v5172_v22 = vpack.c.bf16 %v2267_v35, %v2265_v34  ;;  %v2371_v34 = vld [vmem:[#allocation11 + $0x30] sm:$0xff]  ;;  %v2374_v35 = vld [vmem:[#allocation11 + $0x48] sm:$0xff] }
 0xcd1   :  { %2108 = vmatmul.mubr.f32.vlgmr.msra.gmra.mrb[22].mxu1 %v6431_v51  ;;  %v2218_v51 = vld [vmem:[#allocation10 + $0x50] sm:$0xff] }
 0xcd2   :  { %v5126_v63 = vpack.c.bf16 %v2218_v51, %v2216_v61  ;;  %v6470_v61 = vrot.slane %v2124_v55, %v6336_v49 }
 0xcd4   :  { %5127 = vmatpush1.bf16.msra.mxu0 %v5126_v63 }
 0xcd5   :  { %5129 = vmatprep.subr.bf16.mxu0 %v5128_v4 }
 0xcd8   :  { %5131 = vmatpush1.bf16.msra.mxu0 %v5130_v12  ;;  %v2248_v12 = vld [vmem:[#allocation10 + $0x140] sm:$0xff] }
 0xcd9   :  { %5133 = vmatprep.subr.bf16.mxu0 %v5132_v13  ;;  %v2250_v13 = vld [vmem:[#allocation10 + $0x150] sm:$0xff] }
 0xcda   :  { %v5158_v14 = vpack.c.bf16 %v2250_v13, %v2248_v12 }
 0xcdc   :  { %5135 = vmatpush1.bf16.msra.mxu0 %v5134_v20  ;;  %v2252_v20 = vld [vmem:[#allocation10 + $0x160] sm:$0xff] }
 0xcdd   :  { %5137 = vmatprep.subr.bf16.mxu0 %v5136_v23  ;;  %v2254_v23 = vld [vmem:[#allocation10 + $0x170] sm:$0xff] }
 0xcde   :  { %v5162_v24 = vpack.c.bf16 %v2254_v23, %v2252_v20 }
 0xce0   :  { %5139 = vmatpush1.bf16.msra.mxu0 %v5138_v52  ;;  %v2256_v52 = vld [vmem:[#allocation10 + $0x180] sm:$0xff] }
 0xce1   :  { %5141 = vmatprep.subr.bf16.mxu0 %v5140_v60  ;;  %v2258_v60 = vld [vmem:[#allocation10 + $0x190] sm:$0xff] }
 0xce2   :  { %v5166_v5 = vpack.c.bf16 %v2258_v60, %v2256_v52  ;;  %v2365_v52 = vld [vmem:[#allocation11] sm:$0xff] }
 0xce4   :  { %5143 = vmatpush1.bf16.msra.mxu0 %v5142_v31  ;;  %v2262_v31 = vld [vmem:[#allocation10 + $0x1b0] sm:$0xff] }
 0xce5   :  { %5145 = vmatprep.subr.bf16.mxu0 %v5144_v32  ;;  %v5168_v32 = vpack.c.bf16 %v2263_v29, %v2261_v28  ;;  %v5170_v21 = vpack.c.bf16 %v2262_v31, %v2260_v30  ;;  %v2367_v28 = vld [vmem:[#allocation11 + $0x10] sm:$0xff]  ;;  %v2372_v29 = vld [vmem:[#allocation11 + $0x38] sm:$0xff] }
 0xce6   :  { %v5182_v30 = vpack.c.bf16 %v2367_v28, %v2365_v52  ;;  %v2397_v28 = vld [vmem:[#allocation11 + $0x100] sm:$0xff] }
 0xce8   :  { %5147 = vmatpush1.bf16.msra.mxu0 %v5146_v36  ;;  %v2264_v36 = vld [vmem:[#allocation10 + $0x1c0] sm:$0xff] }
 0xce9   :  { %5149 = vmatprep.subr.bf16.mxu0 %v5148_v37  ;;  %v2266_v37 = vld [vmem:[#allocation10 + $0x1d0] sm:$0xff] }
 0xcea   :  { %v5174_v41 = vpack.c.bf16 %v2266_v37, %v2264_v36  ;;  %v2373_v37 = vld [vmem:[#allocation11 + $0x40] sm:$0xff] }
 0xcec   :  { %5151 = vmatpush1.bf16.msra.mxu0 %v5150_v40  ;;  %v2268_v40 = vld [vmem:[#allocation10 + $0x1e0] sm:$0xff] }
 0xced   :  { %5153 = vmatprep.subr.bf16.mxu0 %v5152_v44  ;;  %v2270_v44 = vld [vmem:[#allocation10 + $0x1f0] sm:$0xff] }
 0xcee   :  { %v5178_v45 = vpack.c.bf16 %v2270_v44, %v2268_v40  ;;  %v2377_v44 = vld [vmem:[#allocation11 + $0x60] sm:$0xff] }
 0xcf0   :  { %5155 = vmatpush1.bf16.msra.mxu0 %v5154_v48 }
 0xd64   :  { %v1970_v50 = vpop.f32.mrb[20].mxu1 }
 0xd65   :  { %v4563_v54 = vpop.f32.mrb[21].mxu1  ;;  %2113 = vmatprep.mubr.f32.mxu1 %v1970_v50 }
 0xd66   :  { %2114 = vmatmul.mubr.f32.gmra.mrb[24].mxu1 %v6457_v27 }
 0xda4   :  { %v2109_v58 = vpop.f32.mrb[22].mxu1 }
 0xda5   :  { %v2120_v51 = vadd.f32 %v2109_v58, %v6370_v59  ;;  %v2111_v62 = vpop.f32.mrb[23].mxu1 }
 0xda6   :  { %v2121_v2 = vadd.f32 %v2111_v62, %v6368_v16  ;;  %v2251_v16 = vld [vmem:[#allocation10 + $0x158] sm:$0xff] }
 0xda7   :  { %v6475_v63 = vadd.f32 %v6467_v57, %v2120_v51  ;;  %v5156_v10 = vpack.c.bf16 %v2251_v16, %v2249_v9 }
 0xda8   :  { %v6478_v4 = vadd.f32 %v6470_v61, %v2121_v2 }
 0xda9   :  { %v2150_v27 = vmul.f32 %v6475_v63, %v6475_v63  ;;  %5157 = vmatprep.subr.bf16.mxu0 %v5156_v10  ;;  %v2141_v10 = vld [vmem:[%s6857_s21] sm:$0x3] }
 0xdaa   :  { %v2142_v6 = vadd.f32 %v6478_v4, %v6475_v63  ;;  %v2151_v7 = vmul.f32 %v6478_v4, %v6478_v4  ;;  %5159 = vmatpush1.bf16.msra.mxu0 %v5158_v14  ;;  %v6514_v20 = vrot.slane %v2141_v10, %v6336_v49 }
 0xdab   :  { %5161 = vmatprep.subr.bf16.mxu0 %v5160_v11  ;;  %v6511_v11 = vrot.slane %v2141_v10, %v6330_v56  ;;  %v2389_v10 = vld [vmem:[#allocation11 + $0xc0] sm:$0xff] }
 0xdac   :  { %2143 = vadd.xlane.f32.xlu0 %v2142_v6  ;;  %v2154_v59 = vadd.f32 %v2151_v7, %v2150_v27 }
 0xdae   :  { %2155 = vadd.xlane.f32.xlu1 %v2154_v59  ;;  %5163 = vmatpush1.bf16.msra.mxu0 %v5162_v24 }
 0xdaf   :  { %5165 = vmatprep.subr.bf16.mxu0 %v5164_v25  ;;  %v2368_v25 = vld [vmem:[#allocation11 + $0x18] sm:$0xff] }
 0xdb0   :  { %v5180_v60 = vpack.c.bf16 %v2368_v25, %v2366_v18  ;;  %v2398_v18 = vld [vmem:[#allocation11 + $0x108] sm:$0xff]  ;;  %v2400_v25 = vld [vmem:[#allocation11 + $0x118] sm:$0xff] }
 0xdb2   :  { %5167 = vmatpush1.bf16.msra.mxu0 %v5166_v5  ;;  %v2370_v5 = vld [vmem:[#allocation11 + $0x28] sm:$0xff]  ;;  %5181 = vmatprep.subr.bf16.mxu1 %v5180_v60  ;;  %v5212_v60 = vpack.c.bf16 %v2400_v25, %v2398_v18  ;;  %v2427_v18 = vld [vmem:[#allocation11 + $0x1f0] sm:$0xff] }
 0xdb3   :  { %5169 = vmatprep.subr.bf16.mxu0 %v5168_v32  ;;  %v5184_v31 = vpack.c.bf16 %v2372_v29, %v2370_v5  ;;  %v2369_v32 = vld [vmem:[#allocation11 + $0x20] sm:$0xff]  ;;  %5183 = vmatpush1.bf16.msra.mxu1 %v5182_v30  ;;  %v2399_v5 = vld [vmem:[#allocation11 + $0x110] sm:$0xff]  ;;  %v2402_v29 = vld [vmem:[#allocation11 + $0x128] sm:$0xff] }
 0xdb4   :  { %v2404_v30 = vld [vmem:[#allocation11 + $0x138] sm:$0xff] }
 0xdb5   :  { %5185 = vmatprep.subr.bf16.mxu1 %v5184_v31  ;;  %v5214_v31 = vpack.c.bf16 %v2399_v5, %v2397_v28 }
 0xdb6   :  { %5171 = vmatpush1.bf16.msra.mxu0 %v5170_v21  ;;  %v2376_v21 = vld [vmem:[#allocation11 + $0x58] sm:$0xff] }
 0xdb7   :  { %5173 = vmatprep.subr.bf16.mxu0 %v5172_v22  ;;  %v5186_v22 = vpack.c.bf16 %v2371_v34, %v2369_v32  ;;  %v5188_v36 = vpack.c.bf16 %v2376_v21, %v2374_v35  ;;  %v5216_v32 = vpack.c.bf16 %v2404_v30, %v2402_v29  ;;  %v2401_v34 = vld [vmem:[#allocation11 + $0x120] sm:$0xff]  ;;  %v2403_v35 = vld [vmem:[#allocation11 + $0x130] sm:$0xff]  ;;  %v2406_v21 = vld [vmem:[#allocation11 + $0x148] sm:$0xff] }
 0xdb9   :  { %5187 = vmatpush1.bf16.msra.mxu1 %v5186_v22  ;;  %v2408_v22 = vld [vmem:[#allocation11 + $0x158] sm:$0xff] }
 0xdba   :  { %5175 = vmatpush1.bf16.msra.mxu0 %v5174_v41  ;;  %v2380_v41 = vld [vmem:[#allocation11 + $0x78] sm:$0xff]  ;;  %5189 = vmatprep.subr.bf16.mxu1 %v5188_v36  ;;  %v5218_v36 = vpack.c.bf16 %v2403_v35, %v2401_v34 }
 0xdbb   :  { %5177 = vmatprep.subr.bf16.mxu0 %v5176_v42  ;;  %v5190_v42 = vpack.c.bf16 %v2375_v38, %v2373_v37  ;;  %v5192_v40 = vpack.c.bf16 %v2380_v41, %v2378_v39  ;;  %v5220_v37 = vpack.c.bf16 %v2408_v22, %v2406_v21  ;;  %v2405_v38 = vld [vmem:[#allocation11 + $0x140] sm:$0xff]  ;;  %v2407_v39 = vld [vmem:[#allocation11 + $0x150] sm:$0xff]  ;;  %v2410_v41 = vld [vmem:[#allocation11 + $0x168] sm:$0xff] }
 0xdbd   :  { %5191 = vmatpush1.bf16.msra.mxu1 %v5190_v42  ;;  %v2412_v42 = vld [vmem:[#allocation11 + $0x178] sm:$0xff] }
 0xdbe   :  { %5179 = vmatpush1.bf16.msra.mxu0 %v5178_v45  ;;  %v2379_v45 = vld [vmem:[#allocation11 + $0x70] sm:$0xff]  ;;  %5193 = vmatprep.subr.bf16.mxu1 %v5192_v40  ;;  %v5222_v40 = vpack.c.bf16 %v2407_v39, %v2405_v38 }
 0xe39   :  { %v2144_v46 = vpop.xlane.xlu0 %2143  ;;  %v2115_v48 = vpop.f32.mrb[24].mxu1 }
 0xe3a   :  { %v2148_v50 = vmul.f32 0.005, %v2144_v46  ;;  %v2122_v54 = vadd.f32 %v2115_v48, %v6378_v26  ;;  %v2117_v55 = vpop.f32.mrb[25].mxu1  ;;  %v2382_v46 = vld [vmem:[#allocation11 + $0x88] sm:$0xff]  ;;  %v2384_v48 = vld [vmem:[#allocation11 + $0x98] sm:$0xff] }
 0xe3b   :  { %v2156_v58 = vpop.xlane.xlu1 %2155  ;;  %v2123_v51 = vadd.f32 %v2117_v55, %v6376_v8  ;;  %v2381_v55 = vld [vmem:[#allocation11 + $0x80] sm:$0xff] }
 0xe3c   :  { %v6489_v62 = vadd.f32 %v6467_v57, %v2122_v54  ;;  %v2160_v2 = vmul.f32 0.005, %v2156_v58  ;;  %v2162_v27 = vmul.f32 %v2148_v50, %v2148_v50  ;;  %v2140_v57 = vld [vmem:[%s6856_s13] sm:$0x3]  ;;  %v2167_v12 = vsub.f32 %v6478_v4, %v2148_v50  ;;  %v2383_v58 = vld [vmem:[#allocation11 + $0x90] sm:$0xff] }
 0xe3d   :  { %v6492_v6 = vadd.f32 %v6470_v61, %v2123_v51  ;;  %v2166_v61 = vsub.f32 %v6475_v63, %v2148_v50  ;;  %v6505_v13 = vrot.slane %v2140_v57, %v6330_v56  ;;  %v6508_v14 = vrot.slane %v2140_v57, %v6336_v49  ;;  %v2386_v51 = vld [vmem:[#allocation11 + $0xa8] sm:$0xff] }
 0xe3e   :  { %v2152_v7 = vmul.f32 %v6489_v62, %v6489_v62  ;;  %v2164_v59 = vsub.f32 %v2160_v2, %v2162_v27  ;;  %v5194_v50 = vpack.c.bf16 %v2379_v45, %v2377_v44  ;;  %v5196_v54 = vpack.c.bf16 %v2384_v48, %v2382_v46  ;;  %v2388_v2 = vld [vmem:[#allocation11 + $0xb8] sm:$0xff]  ;;  %v2409_v45 = vld [vmem:[#allocation11 + $0x160] sm:$0xff]  ;;  %v2411_v46 = vld [vmem:[#allocation11 + $0x170] sm:$0xff] }
 0xe3f   :  { %v2145_v26 = vadd.f32 %v6492_v6, %v6489_v62  ;;  %v2153_v9 = vmul.f32 %v6492_v6, %v6492_v6  ;;  %v5198_v27 = vpack.c.bf16 %v2383_v58, %v2381_v55  ;;  %v5224_v44 = vpack.c.bf16 %v2412_v42, %v2410_v41  ;;  %v2414_v48 = vld [vmem:[#allocation11 + $0x188] sm:$0xff]  ;;  %v2413_v58 = vld [vmem:[#allocation11 + $0x180] sm:$0xff] }
 0xe40   :  { %v2170_v16 = vadd.f32 1e-05, %v2164_v59  ;;  %5195 = vmatpush1.bf16.msra.mxu1 %v5194_v50  ;;  %v2385_v59 = vld [vmem:[#allocation11 + $0xa0] sm:$0xff]  ;;  %v2416_v50 = vld [vmem:[#allocation11 + $0x198] sm:$0xff] }
 0xe41   :  { %2146 = vadd.xlane.f32.xlu0 %v2145_v26  ;;  %v2157_v8 = vadd.f32 %v2153_v9, %v2152_v7  ;;  %5197 = vmatprep.subr.bf16.mxu1 %v5196_v54  ;;  %v5200_v7 = vpack.c.bf16 %v2388_v2, %v2386_v51  ;;  %v2387_v26 = vld [vmem:[#allocation11 + $0xb0] sm:$0xff]  ;;  %v2390_v9 = vld [vmem:[#allocation11 + $0xc8] sm:$0xff]  ;;  %v5226_v54 = vpack.c.bf16 %v2411_v46, %v2409_v45  ;;  %v2601_v45 = vld [vmem:[#allocation13 + $0x38] sm:$0xff] }
 0xe42   :  { %5736 = vrsqrt.f32 %v2170_v16  ;;  %v2392_v16 = vld [vmem:[#allocation11 + $0xd8] sm:$0xff]  ;;  %v5228_v55 = vpack.c.bf16 %v2416_v50, %v2414_v48  ;;  %v2415_v51 = vld [vmem:[#allocation11 + $0x190] sm:$0xff]  ;;  %v2418_v2 = vld [vmem:[#allocation11 + $0x1a8] sm:$0xff] }
 0xe43   :  { %2158 = vadd.xlane.f32.xlu1 %v2157_v8  ;;  %v5202_v8 = vpack.c.bf16 %v2387_v26, %v2385_v59  ;;  %v5204_v57 = vpack.c.bf16 %v2392_v16, %v2390_v9  ;;  %v2417_v26 = vld [vmem:[#allocation11 + $0x1a0] sm:$0xff]  ;;  %v2419_v9 = vld [vmem:[#allocation11 + $0x1b0] sm:$0xff]  ;;  %v2422_v16 = vld [vmem:[#allocation11 + $0x1c8] sm:$0xff] }
 0xe44   :  { %5199 = vmatpush1.bf16.msra.mxu1 %v5198_v27  ;;  %v2420_v27 = vld [vmem:[#allocation11 + $0x1b8] sm:$0xff]  ;;  %v2603_v50 = vld [vmem:[#allocation13 + $0x48] sm:$0xff] }
 0xe45   :  { %5201 = vmatprep.subr.bf16.mxu1 %v5200_v7  ;;  %v5230_v7 = vpack.c.bf16 %v2415_v51, %v2413_v58  ;;  %v5232_v59 = vpack.c.bf16 %v2420_v27, %v2418_v2  ;;  %v2597_v46 = vld [vmem:[#allocation13 + $0x18] sm:$0xff]  ;;  %v2596_v2 = vld [vmem:[#allocation13 + $0x10] sm:$0xff]  ;;  %v2602_v27 = vld [vmem:[#allocation13 + $0x40] sm:$0xff] }
 0xe46   :  { %v5308_v58 = vpack.c.bf16 %v2603_v50, %v2597_v46  ;;  %v2642_v50 = vld [vmem:[#allocation13 + $0x180] sm:$0xff] }
 0xe48   :  { %5203 = vmatpush1.bf16.msra.mxu1 %v5202_v8  ;;  %v2424_v8 = vld [vmem:[#allocation11 + $0x1d8] sm:$0xff] }
 0xe49   :  { %5205 = vmatprep.subr.bf16.mxu1 %v5204_v57  ;;  %v5234_v57 = vpack.c.bf16 %v2419_v9, %v2417_v26  ;;  %v2613_v26 = vld [vmem:[#allocation13 + $0x98] sm:$0xff] }
 0xe4a   :  { %v2609_v9 = vld [vmem:[#allocation13 + $0x78] sm:$0xff] }
 0xe4c   :  { %v5737_v15 = vpop.eup %5736 }
 0xe4d   :  { %v2175_v19 = vmul.f32 %v5737_v15, %v2167_v12  ;;  %v2174_v23 = vmul.f32 %v5737_v15, %v2166_v61  ;;  %v2391_v61 = vld [vmem:[#allocation11 + $0xd0] sm:$0xff]  ;;  %v2394_v12 = vld [vmem:[#allocation11 + $0xe8] sm:$0xff]  ;;  %v2396_v15 = vld [vmem:[#allocation11 + $0xf8] sm:$0xff] }
 0xe4f   :  { %v2190_v24 = vmul.f32 %v6508_v14, %v2175_v19  ;;  %v2189_v63 = vmul.f32 %v6505_v13, %v2174_v23  ;;  %v5206_v19 = vpack.c.bf16 %v2391_v61, %v2389_v10  ;;  %v5208_v23 = vpack.c.bf16 %v2396_v15, %v2394_v12  ;;  %v2421_v61 = vld [vmem:[#allocation11 + $0x1c0] sm:$0xff]  ;;  %v2423_v12 = vld [vmem:[#allocation11 + $0x1d0] sm:$0xff] }
 0xe50   :  { %v5236_v10 = vpack.c.bf16 %v2424_v8, %v2422_v16  ;;  %v5238_v15 = vpack.c.bf16 %v2423_v12, %v2421_v61  ;;  %v2615_v16 = vld [vmem:[#allocation13 + $0xa8] sm:$0xff]  ;;  %v2612_v61 = vld [vmem:[#allocation13 + $0x90] sm:$0xff] }
 0xe51   :  { %v6519_v4 = vadd.f32 %v6514_v20, %v2190_v24  ;;  %v6522_v17 = vadd.f32 %v6511_v11, %v2189_v63  ;;  %v2393_v24 = vld [vmem:[#allocation11 + $0xe0] sm:$0xff]  ;;  %v2395_v63 = vld [vmem:[#allocation11 + $0xf0] sm:$0xff]  ;;  %5207 = vmatpush1.bf16.msra.mxu1 %v5206_v19  ;;  %v2426_v19 = vld [vmem:[#allocation11 + $0x1e8] sm:$0xff] }
 0xe52   :  { %v5210_v52 = vpack.c.bf16 %v2395_v63, %v2393_v24  ;;  %5209 = vmatprep.subr.bf16.mxu1 %v5208_v23  ;;  %v2428_v23 = vld [vmem:[#allocation11 + $0x1f8] sm:$0xff]  ;;  %v2425_v63 = vld [vmem:[#allocation11 + $0x1e0] sm:$0xff]  ;;  %v2608_v12 = vld [vmem:[#allocation13 + $0x70] sm:$0xff] }
 0xe53   :  { %2348 = vmatprep.mubr.f32.mxu0 %v6519_v4  ;;  %v5240_v24 = vpack.c.bf16 %v2428_v23, %v2426_v19  ;;  %v5242_v25 = vpack.c.bf16 %v2427_v18, %v2425_v63  ;;  %v2614_v19 = vld [vmem:[#allocation13 + $0xa0] sm:$0xff]  ;;  %v2619_v23 = vld [vmem:[#allocation13 + $0xc8] sm:$0xff] }
 0xe54   :  { %2349 = vmatmul.mubr.f32.vlgmr.msra.gmra.mrb[18].mxu0 %v6522_v17  ;;  %v5314_v63 = vpack.c.bf16 %v2614_v19, %v2608_v12  ;;  %v2662_v12 = vld [vmem:[#allocation13 + $0x220] sm:$0xff]  ;;  %v2673_v19 = vld [vmem:[#allocation13 + $0x278] sm:$0xff] }
 0xe55   :  { %5211 = vmatpush1.bf16.msra.mxu1 %v5210_v52 }
 0xe56   :  { %5213 = vmatprep.subr.bf16.mxu1 %v5212_v60 }
 0xe59   :  { %5215 = vmatpush1.bf16.msra.mxu1 %v5214_v31 }
 0xe5a   :  { %5217 = vmatprep.subr.bf16.mxu1 %v5216_v32 }
 0xe5d   :  { %5219 = vmatpush1.bf16.msra.mxu1 %v5218_v36 }
 0xe5e   :  { %5221 = vmatprep.subr.bf16.mxu1 %v5220_v37 }
 0xe61   :  { %5223 = vmatpush1.bf16.msra.mxu1 %v5222_v40 }
 0xe62   :  { %5225 = vmatprep.subr.bf16.mxu1 %v5224_v44  ;;  %v2595_v44 = vld [vmem:[#allocation13 + $0x8] sm:$0xff] }
 0xe63   :  { %v5244_v48 = vpack.c.bf16 %v2601_v45, %v2595_v44  ;;  %v2651_v44 = vld [vmem:[#allocation13 + $0x1c8] sm:$0xff] }
 0xe65   :  { %5227 = vmatpush1.bf16.msra.mxu1 %v5226_v54  ;;  %v2594_v54 = vld [vmem:[#allocation13] sm:$0xff]  ;;  %5245 = vmatprep.subr.bf16.mxu0 %v5244_v48 }
 0xe66   :  { %5229 = vmatprep.subr.bf16.mxu1 %v5228_v55  ;;  %v2600_v55 = vld [vmem:[#allocation13 + $0x30] sm:$0xff] }
 0xe67   :  { %v5246_v51 = vpack.c.bf16 %v2600_v55, %v2594_v54  ;;  %v2648_v54 = vld [vmem:[#allocation13 + $0x1b0] sm:$0xff] }
 0xe68   :  { %v2644_v55 = vld [vmem:[#allocation13 + $0x190] sm:$0xff] }
 0xe69   :  { %5231 = vmatpush1.bf16.msra.mxu1 %v5230_v7  ;;  %v2607_v7 = vld [vmem:[#allocation13 + $0x68] sm:$0xff]  ;;  %5247 = vmatpush1.bf16.msra.mxu0 %v5246_v51  ;;  %v2650_v51 = vld [vmem:[#allocation13 + $0x1c0] sm:$0xff] }
 0xe6a   :  { %5233 = vmatprep.subr.bf16.mxu1 %v5232_v59  ;;  %v5310_v59 = vpack.c.bf16 %v2602_v27, %v2596_v2  ;;  %v5248_v8 = vpack.c.bf16 %v2613_v26, %v2607_v7  ;;  %v2655_v2 = vld [vmem:[#allocation13 + $0x1e8] sm:$0xff]  ;;  %v2661_v27 = vld [vmem:[#allocation13 + $0x218] sm:$0xff]  ;;  %v5262_v26 = vpack.c.bf16 %v2648_v54, %v2642_v50  ;;  %v2696_v50 = vld [vmem:[#allocation13 + $0x330] sm:$0xff] }
 0xe6b   :  { %v2657_v7 = vld [vmem:[#allocation13 + $0x1f8] sm:$0xff]  ;;  %v2692_v54 = vld [vmem:[#allocation13 + $0x310] sm:$0xff] }
 0xe6c   :  { %5249 = vmatprep.subr.bf16.mxu0 %v5248_v8  ;;  %v2654_v8 = vld [vmem:[#allocation13 + $0x1e0] sm:$0xff] }
 0xe6d   :  { %5235 = vmatpush1.bf16.msra.mxu1 %v5234_v57  ;;  %v5312_v57 = vpack.c.bf16 %v2615_v16, %v2609_v9  ;;  %v5326_v9 = vpack.c.bf16 %v2650_v51, %v2644_v55  ;;  %v5264_v16 = vpack.c.bf16 %v2661_v27, %v2655_v2  ;;  %v2703_v51 = vld [vmem:[#allocation13 + $0x368] sm:$0xff]  ;;  %v2709_v2 = vld [vmem:[#allocation13 + $0x398] sm:$0xff] }
 0xe6e   :  { %5237 = vmatprep.subr.bf16.mxu1 %v5236_v10  ;;  %v2606_v10 = vld [vmem:[#allocation13 + $0x60] sm:$0xff]  ;;  %v2705_v27 = vld [vmem:[#allocation13 + $0x378] sm:$0xff] }
 0xe71   :  { %5239 = vmatpush1.bf16.msra.mxu1 %v5238_v15  ;;  %v5250_v15 = vpack.c.bf16 %v2612_v61, %v2606_v10  ;;  %v2656_v10 = vld [vmem:[#allocation13 + $0x1f0] sm:$0xff] }
 0xe72   :  { %5241 = vmatprep.subr.bf16.mxu1 %v5240_v24  ;;  %v2625_v24 = vld [vmem:[#allocation13 + $0xf8] sm:$0xff] }
 0xe73   :  { %v5252_v18 = vpack.c.bf16 %v2625_v24, %v2619_v23  ;;  %5251 = vmatpush1.bf16.msra.mxu0 %v5250_v15  ;;  %v2667_v15 = vld [vmem:[#allocation13 + $0x248] sm:$0xff]  ;;  %v2669_v23 = vld [vmem:[#allocation13 + $0x258] sm:$0xff] }
 0xe74   :  { %v2675_v24 = vld [vmem:[#allocation13 + $0x288] sm:$0xff] }
 0xe75   :  { %5243 = vmatpush1.bf16.msra.mxu1 %v5242_v25  ;;  %v2621_v25 = vld [vmem:[#allocation13 + $0xd8] sm:$0xff]  ;;  %5253 = vmatprep.subr.bf16.mxu0 %v5252_v18  ;;  %v5330_v18 = vpack.c.bf16 %v2662_v12, %v2656_v10  ;;  %v2704_v10 = vld [vmem:[#allocation13 + $0x370] sm:$0xff] }
 0xe76   :  { %5309 = vmatprep.subr.bf16.mxu1 %v5308_v58 }
 0xece   :  { %v2147_v52 = vpop.xlane.xlu0 %2146 }
 0xecf   :  { %v2149_v60 = vmul.f32 0.005, %v2147_v52  ;;  %v2627_v52 = vld [vmem:[#allocation13 + $0x108] sm:$0xff] }
 0xed0   :  { %v2159_v28 = vpop.xlane.xlu1 %2158 }
 0xed1   :  { %v2161_v5 = vmul.f32 0.005, %v2159_v28  ;;  %v2163_v29 = vmul.f32 %v2149_v60, %v2149_v60  ;;  %v2168_v32 = vsub.f32 %v6489_v62, %v2149_v60  ;;  %v2169_v34 = vsub.f32 %v6492_v6, %v2149_v60  ;;  %v2272_v62 = vld [vmem:[%s6858_s29] sm:$0x3] }
 0xed2   :  { %v6540_v6 = vrot.slane %v2272_v62, %v6330_v56  ;;  %v6543_v41 = vrot.slane %v2272_v62, %v6336_v49  ;;  %v2618_v60 = vld [vmem:[#allocation13 + $0xc0] sm:$0xff]  ;;  %v5316_v28 = vpack.c.bf16 %v2627_v52, %v2621_v25  ;;  %v2636_v62 = vld [vmem:[#allocation13 + $0x150] sm:$0xff]  ;;  %v5268_v25 = vpack.c.bf16 %v2673_v19, %v2667_v15 }
 0xed3   :  { %v2165_v30 = vsub.f32 %v2161_v5, %v2163_v29  ;;  %v2624_v5 = vld [vmem:[#allocation13 + $0xf0] sm:$0xff]  ;;  %v2666_v52 = vld [vmem:[#allocation13 + $0x240] sm:$0xff] }
 0xed4   :  { %v2620_v29 = vld [vmem:[#allocation13 + $0xd0] sm:$0xff] }
 0xed5   :  { %v2171_v31 = vadd.f32 1e-05, %v2165_v30  ;;  %v2626_v30 = vld [vmem:[#allocation13 + $0x100] sm:$0xff] }
 0xed7   :  { %5738 = vrsqrt.f32 %v2171_v31  ;;  %v5254_v31 = vpack.c.bf16 %v2624_v5, %v2618_v60  ;;  %v2672_v60 = vld [vmem:[#allocation13 + $0x270] sm:$0xff]  ;;  %v5332_v5 = vpack.c.bf16 %v2675_v24, %v2669_v23 }
 0xed9   :  { %5255 = vmatpush1.bf16.msra.mxu0 %v5254_v31  ;;  %v2685_v31 = vld [vmem:[#allocation13 + $0x2d8] sm:$0xff] }
 0xee1   :  { %v5739_v35 = vpop.eup %5738 }
 0xee2   :  { %v2177_v21 = vmul.f32 %v5739_v35, %v2169_v34  ;;  %v2176_v22 = vmul.f32 %v5739_v35, %v2168_v32  ;;  %v2631_v32 = vld [vmem:[#allocation13 + $0x128] sm:$0xff]  ;;  %v2637_v34 = vld [vmem:[#allocation13 + $0x158] sm:$0xff] }
 0xee3   :  { %v2633_v35 = vld [vmem:[#allocation13 + $0x138] sm:$0xff] }
 0xee4   :  { %v2192_v36 = vmul.f32 %v6508_v14, %v2177_v21  ;;  %v2191_v37 = vmul.f32 %v6505_v13, %v2176_v22  ;;  %v5318_v21 = vpack.c.bf16 %v2626_v30, %v2620_v29  ;;  %v5256_v22 = vpack.c.bf16 %v2637_v34, %v2631_v32  ;;  %v2674_v29 = vld [vmem:[#allocation13 + $0x280] sm:$0xff]  ;;  %v2679_v30 = vld [vmem:[#allocation13 + $0x2a8] sm:$0xff]  ;;  %v2681_v32 = vld [vmem:[#allocation13 + $0x2b8] sm:$0xff] }
 0xee5   :  { %v2687_v34 = vld [vmem:[#allocation13 + $0x2e8] sm:$0xff] }
 0xee6   :  { %v6531_v38 = vadd.f32 %v6514_v20, %v2192_v36  ;;  %v6534_v39 = vadd.f32 %v6511_v11, %v2191_v37  ;;  %v2639_v36 = vld [vmem:[#allocation13 + $0x168] sm:$0xff]  ;;  %v2630_v37 = vld [vmem:[#allocation13 + $0x120] sm:$0xff]  ;;  %5257 = vmatprep.subr.bf16.mxu0 %v5256_v22  ;;  %v5272_v22 = vpack.c.bf16 %v2685_v31, %v2679_v30 }
 0xee7   :  { %v5258_v45 = vpack.c.bf16 %v2636_v62, %v2630_v37  ;;  %v2684_v37 = vld [vmem:[#allocation13 + $0x2d0] sm:$0xff] }
 0xee8   :  { %2354 = vmatprep.mubr.f32.mxu0 %v6531_v38  ;;  %v2680_v62 = vld [vmem:[#allocation13 + $0x2b0] sm:$0xff] }
 0xee9   :  { %2355 = vmatmul.mubr.f32.gmra.mrb[20].mxu0 %v6534_v39 }
 0xeea   :  { %5259 = vmatpush1.bf16.msra.mxu0 %v5258_v45 }
 0xf27   :  { %v2350_v14 = vpop.f32.mrb[18].mxu0 }
 0xf28   :  { %v2351_v13 = vadd.f32 %v2350_v14, %v6540_v6  ;;  %v2352_v42 = vpop.f32.mrb[19].mxu0  ;;  %v5320_v14 = vpack.c.bf16 %v2639_v36, %v2633_v35  ;;  %v5270_v35 = vpack.c.bf16 %v2672_v60, %v2666_v52  ;;  %v2678_v36 = vld [vmem:[#allocation13 + $0x2a0] sm:$0xff] }
 0xf29   :  { %v2353_v20 = vadd.f32 %v2352_v42, %v6543_v41  ;;  %v2638_v42 = vld [vmem:[#allocation13 + $0x160] sm:$0xff] }
 0xf2a   :  { %v2361_v11 = vmax.f32 %v2351_v13, 0.0  ;;  %v2632_v13 = vld [vmem:[#allocation13 + $0x130] sm:$0xff]  ;;  %v2510_v52 = vld [vmem:[%s6859_s8] sm:$0x3] }
 0xf2b   :  { %v2362_v40 = vmax.f32 %v2353_v20, 0.0  ;;  %v2643_v20 = vld [vmem:[#allocation13 + $0x188] sm:$0xff]  ;;  %v5322_v46 = vpack.c.bf16 %v2638_v42, %v2632_v13  ;;  %v2686_v13 = vld [vmem:[#allocation13 + $0x2e0] sm:$0xff]  ;;  %v6551_v60 = vrot.slane %v2510_v52, %v6330_v56 }
 0xf2c   :  { %v2691_v42 = vld [vmem:[#allocation13 + $0x308] sm:$0xff]  ;;  %v5338_v45 = vpack.c.bf16 %v2686_v13, %v2680_v62  ;;  %v2714_v62 = vld [vmem:[#allocation13 + $0x3c0] sm:$0xff] }
 0xf2d   :  { %2493 = vmatprep.mubr.f32.mxu1 %v2362_v40  ;;  %v2649_v40 = vld [vmem:[#allocation13 + $0x1b8] sm:$0xff] }
 0xf2e   :  { %2494 = vmatmul.mubr.f32.vlgmr.msra.gmra.mrb[26].mxu1 %v2361_v11  ;;  %v2645_v11 = vld [vmem:[#allocation13 + $0x198] sm:$0xff]  ;;  %v5260_v48 = vpack.c.bf16 %v2649_v40, %v2643_v20 }
 0xf2f   :  { %5311 = vmatpush1.bf16.msra.mxu1 %v5310_v59  ;;  %v5324_v58 = vpack.c.bf16 %v2651_v44, %v2645_v11  ;;  %v2663_v59 = vld [vmem:[#allocation13 + $0x228] sm:$0xff]  ;;  %v2697_v20 = vld [vmem:[#allocation13 + $0x338] sm:$0xff]  ;;  %v5274_v44 = vpack.c.bf16 %v2684_v37, %v2678_v36 }
 0xf30   :  { %5313 = vmatprep.subr.bf16.mxu1 %v5312_v57  ;;  %5261 = vmatprep.subr.bf16.mxu0 %v5260_v48  ;;  %v2660_v57 = vld [vmem:[#allocation13 + $0x210] sm:$0xff]  ;;  %v5328_v61 = vpack.c.bf16 %v2663_v59, %v2657_v7  ;;  %v2693_v40 = vld [vmem:[#allocation13 + $0x318] sm:$0xff]  ;;  %v2699_v11 = vld [vmem:[#allocation13 + $0x348] sm:$0xff] }
 0xf31   :  { %5263 = vmatpush1.bf16.msra.mxu0 %v5262_v26  ;;  %v2690_v48 = vld [vmem:[#allocation13 + $0x300] sm:$0xff]  ;;  %v5340_v55 = vpack.c.bf16 %v2699_v11, %v2693_v40  ;;  %v2711_v7 = vld [vmem:[#allocation13 + $0x3a8] sm:$0xff] }
 0xf32   :  { %5265 = vmatprep.subr.bf16.mxu0 %v5264_v16  ;;  %v5278_v59 = vpack.c.bf16 %v2696_v50, %v2690_v48  ;;  %v2702_v16 = vld [vmem:[#allocation13 + $0x360] sm:$0xff]  ;;  %v2723_v37 = vld [vmem:[#allocation13 + $0x408] sm:$0xff] }
 0xf33   :  { %5315 = vmatpush1.bf16.msra.mxu1 %v5314_v63  ;;  %v5266_v63 = vpack.c.bf16 %v2660_v57, %v2654_v8  ;;  %v2708_v8 = vld [vmem:[#allocation13 + $0x390] sm:$0xff]  ;;  %v5344_v57 = vpack.c.bf16 %v2711_v7, %v2705_v27  ;;  %v2722_v40 = vld [vmem:[#allocation13 + $0x400] sm:$0xff]  ;;  %v2735_v50 = vld [vmem:[#allocation13 + $0x468] sm:$0xff] }
 0xf34   :  { %5317 = vmatprep.subr.bf16.mxu1 %v5316_v28  ;;  %v2668_v28 = vld [vmem:[#allocation13 + $0x250] sm:$0xff]  ;;  %v5282_v12 = vpack.c.bf16 %v2708_v8, %v2702_v16  ;;  %v2734_v27 = vld [vmem:[#allocation13 + $0x460] sm:$0xff]  ;;  %v2747_v8 = vld [vmem:[#allocation13 + $0x4c8] sm:$0xff] }
 0xf35   :  { %5267 = vmatpush1.bf16.msra.mxu0 %v5266_v63 }
 0xf36   :  { %5269 = vmatprep.subr.bf16.mxu0 %v5268_v25 }
 0xf37   :  { %5319 = vmatpush1.bf16.msra.mxu1 %v5318_v21  ;;  %v5334_v21 = vpack.c.bf16 %v2674_v29, %v2668_v28 }
 0xf38   :  { %5321 = vmatprep.subr.bf16.mxu1 %v5320_v14  ;;  %v5336_v14 = vpack.c.bf16 %v2687_v34, %v2681_v32 }
 0xf39   :  { %5271 = vmatpush1.bf16.msra.mxu0 %v5270_v35 }
 0xf3a   :  { %5273 = vmatprep.subr.bf16.mxu0 %v5272_v22  ;;  %v2717_v22 = vld [vmem:[#allocation13 + $0x3d8] sm:$0xff] }
 0xf3b   :  { %5323 = vmatpush1.bf16.msra.mxu1 %v5322_v46  ;;  %v5276_v46 = vpack.c.bf16 %v2697_v20, %v2691_v42  ;;  %v5348_v13 = vpack.c.bf16 %v2723_v37, %v2717_v22  ;;  %v2716_v20 = vld [vmem:[#allocation13 + $0x3d0] sm:$0xff]  ;;  %v2762_v37 = vld [vmem:[#allocation13 + $0x540] sm:$0xff] }
 0xf3c   :  { %5325 = vmatprep.subr.bf16.mxu1 %v5324_v58  ;;  %v2698_v58 = vld [vmem:[#allocation13 + $0x340] sm:$0xff]  ;;  %v5350_v11 = vpack.c.bf16 %v2722_v40, %v2716_v20 }
 0xf3d   :  { %5275 = vmatpush1.bf16.msra.mxu0 %v5274_v44  ;;  %v5342_v26 = vpack.c.bf16 %v2698_v58, %v2692_v54  ;;  %v2727_v44 = vld [vmem:[#allocation13 + $0x428] sm:$0xff]  ;;  %v2726_v54 = vld [vmem:[#allocation13 + $0x420] sm:$0xff] }
 0xf3e   :  { %5277 = vmatprep.subr.bf16.mxu0 %v5276_v46  ;;  %v2729_v46 = vld [vmem:[#allocation13 + $0x438] sm:$0xff]  ;;  %v2770_v20 = vld [vmem:[#allocation13 + $0x580] sm:$0xff] }
 0xf3f   :  { %5327 = vmatpush1.bf16.msra.mxu1 %v5326_v9  ;;  %v5280_v9 = vpack.c.bf16 %v2709_v2, %v2703_v51  ;;  %v5352_v58 = vpack.c.bf16 %v2735_v50, %v2729_v46  ;;  %v2728_v2 = vld [vmem:[#allocation13 + $0x430] sm:$0xff]  ;;  %v2774_v50 = vld [vmem:[#allocation13 + $0x5a0] sm:$0xff] }
 0xf40   :  { %5329 = vmatprep.subr.bf16.mxu1 %v5328_v61  ;;  %v2710_v61 = vld [vmem:[#allocation13 + $0x3a0] sm:$0xff]  ;;  %v5354_v7 = vpack.c.bf16 %v2734_v27, %v2728_v2 }
 0xf41   :  { %5279 = vmatpush1.bf16.msra.mxu0 %v5278_v59  ;;  %v5346_v15 = vpack.c.bf16 %v2710_v61, %v2704_v10  ;;  %v2739_v59 = vld [vmem:[#allocation13 + $0x488] sm:$0xff]  ;;  %v2744_v10 = vld [vmem:[#allocation13 + $0x4b0] sm:$0xff]  ;;  %v2782_v2 = vld [vmem:[#allocation13 + $0x5e0] sm:$0xff] }
 0xf42   :  { %5281 = vmatprep.subr.bf16.mxu0 %v5280_v9  ;;  %v2741_v9 = vld [vmem:[#allocation13 + $0x498] sm:$0xff] }
 0xf43   :  { %5331 = vmatpush1.bf16.msra.mxu1 %v5330_v18  ;;  %v5356_v61 = vpack.c.bf16 %v2747_v8, %v2741_v9 }
 0xf44   :  { %5333 = vmatprep.subr.bf16.mxu1 %v5332_v5  ;;  %v6554_v5 = vrot.slane %v2510_v52, %v6336_v49  ;;  %v2759_v52 = vld [vmem:[#allocation13 + $0x528] sm:$0xff] }
 0xf45   :  { %5283 = vmatpush1.bf16.msra.mxu0 %v5282_v12 }
 0xf47   :  { %5335 = vmatpush1.bf16.msra.mxu1 %v5334_v21  ;;  %v2715_v21 = vld [vmem:[#allocation13 + $0x3c8] sm:$0xff] }
 0xf48   :  { %5337 = vmatprep.subr.bf16.mxu1 %v5336_v14  ;;  %v2720_v14 = vld [vmem:[#allocation13 + $0x3f0] sm:$0xff] }
 0xf49   :  { %v5286_v42 = vpack.c.bf16 %v2720_v14, %v2714_v62  ;;  %v2768_v62 = vld [vmem:[#allocation13 + $0x570] sm:$0xff] }
 0xf4b   :  { %5339 = vmatpush1.bf16.msra.mxu1 %v5338_v45  ;;  %v2733_v45 = vld [vmem:[#allocation13 + $0x458] sm:$0xff] }
 0xf4c   :  { %5341 = vmatprep.subr.bf16.mxu1 %v5340_v55  ;;  %v5288_v48 = vpack.c.bf16 %v2733_v45, %v2727_v44  ;;  %v2732_v55 = vld [vmem:[#allocation13 + $0x450] sm:$0xff]  ;;  %v2781_v44 = vld [vmem:[#allocation13 + $0x5d8] sm:$0xff] }
 0xf4d   :  { %v5290_v51 = vpack.c.bf16 %v2732_v55, %v2726_v54  ;;  %v2777_v45 = vld [vmem:[#allocation13 + $0x5b8] sm:$0xff]  ;;  %v2780_v54 = vld [vmem:[#allocation13 + $0x5d0] sm:$0xff] }
 0xf4f   :  { %5343 = vmatpush1.bf16.msra.mxu1 %v5342_v26  ;;  %v2745_v26 = vld [vmem:[#allocation13 + $0x4b8] sm:$0xff] }
 0xf50   :  { %5345 = vmatprep.subr.bf16.mxu1 %v5344_v57  ;;  %v5292_v16 = vpack.c.bf16 %v2745_v26, %v2739_v59  ;;  %v2738_v57 = vld [vmem:[#allocation13 + $0x480] sm:$0xff]  ;;  %v2605_v59 = vld [vmem:[#allocation13 + $0x58] sm:$0xff] }
 0xf51   :  { %v5294_v12 = vpack.c.bf16 %v2744_v10, %v2738_v57 }
 0xf53   :  { %5347 = vmatpush1.bf16.msra.mxu1 %v5346_v15  ;;  %v2740_v15 = vld [vmem:[#allocation13 + $0x490] sm:$0xff] }
 0xf54   :  { %5349 = vmatprep.subr.bf16.mxu1 %v5348_v13  ;;  %v5302_v13 = vpack.c.bf16 %v2768_v62, %v2762_v37  ;;  %v2617_v37 = vld [vmem:[#allocation13 + $0xb8] sm:$0xff] }
 0xf57   :  { %5351 = vmatpush1.bf16.msra.mxu1 %v5350_v11  ;;  %v2775_v11 = vld [vmem:[#allocation13 + $0x5a8] sm:$0xff] }
 0xf58   :  { %5353 = vmatprep.subr.bf16.mxu1 %v5352_v58  ;;  %v5304_v46 = vpack.c.bf16 %v2781_v44, %v2775_v11  ;;  %v5306_v58 = vpack.c.bf16 %v2780_v54, %v2774_v50  ;;  %v2623_v11 = vld [vmem:[#allocation13 + $0xe8] sm:$0xff]  ;;  %v2629_v44 = vld [vmem:[#allocation13 + $0x118] sm:$0xff]  ;;  %v2628_v50 = vld [vmem:[#allocation13 + $0x110] sm:$0xff] }
 0xf59   :  { %v2635_v54 = vld [vmem:[#allocation13 + $0x148] sm:$0xff] }
 0xf5b   :  { %5355 = vmatpush1.bf16.msra.mxu1 %v5354_v7  ;;  %v2599_v7 = vld [vmem:[#allocation13 + $0x28] sm:$0xff] }
 0xf5c   :  { %5357 = vmatprep.subr.bf16.mxu1 %v5356_v61  ;;  %v5372_v26 = vpack.c.bf16 %v2605_v59, %v2599_v7  ;;  %v2647_v7 = vld [vmem:[#allocation13 + $0x1a8] sm:$0xff]  ;;  %v2653_v59 = vld [vmem:[#allocation13 + $0x1d8] sm:$0xff] }
 0xfbc   :  { %v2356_v19 = vpop.f32.mrb[20].mxu0 }
 0xfbd   :  { %v2357_v23 = vadd.f32 %v2356_v19, %v6540_v6  ;;  %v2358_v24 = vpop.f32.mrb[21].mxu0  ;;  %v2746_v19 = vld [vmem:[#allocation13 + $0x4c0] sm:$0xff] }
 0xfbe   :  { %v2359_v63 = vadd.f32 %v2358_v24, %v6543_v41  ;;  %v2751_v24 = vld [vmem:[#allocation13 + $0x4e8] sm:$0xff] }
 0xfbf   :  { %v2363_v25 = vmax.f32 %v2357_v23, 0.0  ;;  %v5358_v23 = vpack.c.bf16 %v2746_v19, %v2740_v15 }
 0xfc0   :  { %v2364_v18 = vmax.f32 %v2359_v63, 0.0  ;;  %v2757_v63 = vld [vmem:[#allocation13 + $0x518] sm:$0xff] }
 0xfc1   :  { %5359 = vmatpush1.bf16.msra.mxu1 %v5358_v23 }
 0xfc2   :  { %2499 = vmatprep.mubr.f32.mxu1 %v2364_v18  ;;  %v2753_v18 = vld [vmem:[#allocation13 + $0x4f8] sm:$0xff] }
 0xfc3   :  { %2500 = vmatmul.mubr.f32.gmra.mrb[28].mxu1 %v2363_v25  ;;  %v5296_v25 = vpack.c.bf16 %v2757_v63, %v2751_v24 }
0x1001   :  { %v2495_v28 = vpop.f32.mrb[26].mxu1 }
0x1002   :  { %v2506_v29 = vadd.f32 %v2495_v28, %v6522_v17  ;;  %v2497_v30 = vpop.f32.mrb[27].mxu1  ;;  %v2750_v28 = vld [vmem:[#allocation13 + $0x4e0] sm:$0xff] }
0x1003   :  { %v2507_v6 = vadd.f32 %v2497_v30, %v6519_v4  ;;  %v2721_v4 = vld [vmem:[#allocation13 + $0x3f8] sm:$0xff]  ;;  %v5360_v30 = vpack.c.bf16 %v2759_v52, %v2753_v18  ;;  %v2526_v52 = vld [vmem:[%s6860_s19] sm:$0x3] }
0x1004   :  { %v6559_v31 = vadd.f32 %v6551_v60, %v2506_v29  ;;  %v5284_v36 = vpack.c.bf16 %v2721_v4, %v2715_v21  ;;  %v2756_v29 = vld [vmem:[#allocation13 + $0x510] sm:$0xff]  ;;  %v2769_v21 = vld [vmem:[#allocation13 + $0x578] sm:$0xff] }
0x1005   :  { %v6562_v41 = vadd.f32 %v6554_v5, %v2507_v6  ;;  %v5298_v6 = vpack.c.bf16 %v2756_v29, %v2750_v28  ;;  %5361 = vmatprep.subr.bf16.mxu1 %v5360_v30  ;;  %v2765_v4 = vld [vmem:[#allocation13 + $0x558] sm:$0xff]  ;;  %v2527_v28 = vld [vmem:[%s6861_s0] sm:$0x3]  ;;  %v6590_v30 = vrot.slane %v2526_v52, %v6330_v56 }
0x1006   :  { %v2536_v32 = vmul.f32 %v6559_v31, %v6559_v31  ;;  %5285 = vmatprep.subr.bf16.mxu0 %v5284_v36  ;;  %v2771_v36 = vld [vmem:[#allocation13 + $0x588] sm:$0xff] }
0x1007   :  { %v2528_v34 = vadd.f32 %v6562_v41, %v6559_v31  ;;  %v2537_v35 = vmul.f32 %v6562_v41, %v6562_v41  ;;  %5287 = vmatpush1.bf16.msra.mxu0 %v5286_v42  ;;  %v5364_v14 = vpack.c.bf16 %v2771_v36, %v2765_v4  ;;  %v2764_v42 = vld [vmem:[#allocation13 + $0x550] sm:$0xff]  ;;  %v2598_v4 = vld [vmem:[#allocation13 + $0x20] sm:$0xff]  ;;  %v2611_v36 = vld [vmem:[#allocation13 + $0x88] sm:$0xff] }
0x1008   :  { %5289 = vmatprep.subr.bf16.mxu0 %v5288_v48  ;;  %v5366_v40 = vpack.c.bf16 %v2770_v20, %v2764_v42  ;;  %v2783_v48 = vld [vmem:[#allocation13 + $0x5e8] sm:$0xff]  ;;  %v5376_v42 = vpack.c.bf16 %v2617_v37, %v2611_v36  ;;  %v2610_v20 = vld [vmem:[#allocation13 + $0x80] sm:$0xff]  ;;  %v2700_v36 = vld [vmem:[#allocation13 + $0x350] sm:$0xff] }
0x1009   :  { %2529 = vadd.xlane.f32.xlu0 %v2528_v34  ;;  %v2540_v17 = vadd.f32 %v2537_v35, %v2536_v32  ;;  %v2752_v32 = vld [vmem:[#allocation13 + $0x4f0] sm:$0xff]  ;;  %v2758_v34 = vld [vmem:[#allocation13 + $0x520] sm:$0xff]  ;;  %v5368_v55 = vpack.c.bf16 %v2783_v48, %v2777_v45  ;;  %v2707_v37 = vld [vmem:[#allocation13 + $0x388] sm:$0xff] }
0x100a   :  { %v5362_v35 = vpack.c.bf16 %v2758_v34, %v2752_v32  ;;  %v2622_v48 = vld [vmem:[#allocation13 + $0xe0] sm:$0xff] }
0x100b   :  { %2541 = vadd.xlane.f32.xlu1 %v2540_v17  ;;  %5291 = vmatpush1.bf16.msra.mxu0 %v5290_v51  ;;  %v2763_v17 = vld [vmem:[#allocation13 + $0x548] sm:$0xff]  ;;  %v2776_v51 = vld [vmem:[#allocation13 + $0x5b0] sm:$0xff] }
0x100c   :  { %5293 = vmatprep.subr.bf16.mxu0 %v5292_v16  ;;  %5363 = vmatpush1.bf16.msra.mxu1 %v5362_v35  ;;  %v5300_v22 = vpack.c.bf16 %v2769_v21, %v2763_v17  ;;  %v5370_v27 = vpack.c.bf16 %v2782_v2, %v2776_v51  ;;  %v6596_v17 = vrot.slane %v2527_v28, %v6330_v56  ;;  %v2634_v2 = vld [vmem:[#allocation13 + $0x140] sm:$0xff] }
0x100d   :  { %5365 = vmatprep.subr.bf16.mxu1 %v5364_v14  ;;  %v6599_v21 = vrot.slane %v2527_v28, %v6336_v49  ;;  %v2689_v28 = vld [vmem:[#allocation13 + $0x2f8] sm:$0xff] }
0x100f   :  { %5295 = vmatpush1.bf16.msra.mxu0 %v5294_v12 }
0x1010   :  { %5297 = vmatprep.subr.bf16.mxu0 %v5296_v25  ;;  %5367 = vmatpush1.bf16.msra.mxu1 %v5366_v40  ;;  %v2616_v40 = vld [vmem:[#allocation13 + $0xb0] sm:$0xff] }
0x1011   :  { %5369 = vmatprep.subr.bf16.mxu1 %v5368_v55  ;;  %v5378_v45 = vpack.c.bf16 %v2616_v40, %v2610_v20  ;;  %v2641_v55 = vld [vmem:[#allocation13 + $0x178] sm:$0xff]  ;;  %v2706_v40 = vld [vmem:[#allocation13 + $0x380] sm:$0xff] }
0x1012   :  { %v5384_v51 = vpack.c.bf16 %v2641_v55, %v2635_v54  ;;  %v2724_v54 = vld [vmem:[#allocation13 + $0x410] sm:$0xff]  ;;  %v2731_v55 = vld [vmem:[#allocation13 + $0x448] sm:$0xff] }
0x1013   :  { %5299 = vmatpush1.bf16.msra.mxu0 %v5298_v6  ;;  %v6593_v6 = vrot.slane %v2526_v52, %v6336_v49  ;;  %v2683_v52 = vld [vmem:[#allocation13 + $0x2c8] sm:$0xff] }
0x1014   :  { %5301 = vmatprep.subr.bf16.mxu0 %v5300_v22  ;;  %5371 = vmatpush1.bf16.msra.mxu1 %v5370_v27  ;;  %v2604_v22 = vld [vmem:[#allocation13 + $0x50] sm:$0xff] }
0x1015   :  { %4564 = vmatprep.subr.mxu1 %v6072_v0  ;;  %v2640_v27 = vld [vmem:[#allocation13 + $0x170] sm:$0xff] }
0x1017   :  { %5303 = vmatpush1.bf16.msra.mxu0 %v5302_v13  ;;  %v5374_v13 = vpack.c.bf16 %v2604_v22, %v2598_v4  ;;  %v2701_v4 = vld [vmem:[#allocation13 + $0x358] sm:$0xff] }
0x1018   :  { %5305 = vmatprep.subr.bf16.mxu0 %v5304_v46  ;;  %v5380_v46 = vpack.c.bf16 %v2629_v44, %v2623_v11  ;;  %v2712_v11 = vld [vmem:[#allocation13 + $0x3b0] sm:$0xff]  ;;  %v2719_v44 = vld [vmem:[#allocation13 + $0x3e8] sm:$0xff] }
0x101b   :  { %5307 = vmatpush1.bf16.msra.mxu0 %v5306_v58  ;;  %v5382_v58 = vpack.c.bf16 %v2628_v50, %v2622_v48  ;;  %v2718_v50 = vld [vmem:[#allocation13 + $0x3e0] sm:$0xff] }
0x101c   :  { %5373 = vmatprep.subr.bf16.mxu0 %v5372_v26  ;;  %v5386_v26 = vpack.c.bf16 %v2640_v27, %v2634_v2  ;;  %v2730_v27 = vld [vmem:[#allocation13 + $0x440] sm:$0xff] }
0x1096   :  { %v2501_v9 = vpop.f32.mrb[28].mxu1  ;;  %v2530_v16 = vpop.xlane.xlu0 %2529 }
0x1097   :  { %v2508_v8 = vadd.f32 %v2501_v9, %v6534_v39  ;;  %v2503_v57 = vpop.f32.mrb[29].mxu1  ;;  %v2534_v10 = vmul.f32 0.005, %v2530_v16  ;;  %v5388_v9 = vpack.c.bf16 %v2653_v59, %v2647_v7  ;;  %v2646_v16 = vld [vmem:[#allocation13 + $0x1a0] sm:$0xff]  ;;  %v2736_v7 = vld [vmem:[#allocation13 + $0x470] sm:$0xff]  ;;  %v2743_v59 = vld [vmem:[#allocation13 + $0x4a8] sm:$0xff] }
0x1098   :  { %v2509_v61 = vadd.f32 %v2503_v57, %v6531_v38  ;;  %v2542_v15 = vpop.xlane.xlu1 %2541  ;;  %v2659_v57 = vld [vmem:[#allocation13 + $0x208] sm:$0xff] }
0x1099   :  { %v6574_v12 = vadd.f32 %v6551_v60, %v2508_v8  ;;  %v2546_v19 = vmul.f32 0.005, %v2542_v15  ;;  %v2548_v23 = vmul.f32 %v2534_v10, %v2534_v10  ;;  %v2553_v29 = vsub.f32 %v6562_v41, %v2534_v10  ;;  %v2652_v8 = vld [vmem:[#allocation13 + $0x1d0] sm:$0xff] }
0x109a   :  { %v6577_v24 = vadd.f32 %v6554_v5, %v2509_v61  ;;  %v2552_v5 = vsub.f32 %v6559_v31, %v2534_v10  ;;  %v2665_v10 = vld [vmem:[#allocation13 + $0x238] sm:$0xff]  ;;  %v5390_v61 = vpack.c.bf16 %v2652_v8, %v2646_v16  ;;  %v2742_v8 = vld [vmem:[#allocation13 + $0x4a0] sm:$0xff] }
0x109b   :  { %v2538_v63 = vmul.f32 %v6574_v12, %v6574_v12  ;;  %v2550_v18 = vsub.f32 %v2546_v19, %v2548_v23  ;;  %v5392_v15 = vpack.c.bf16 %v2665_v10, %v2659_v57  ;;  %v2658_v19 = vld [vmem:[#allocation13 + $0x200] sm:$0xff]  ;;  %v2664_v23 = vld [vmem:[#allocation13 + $0x230] sm:$0xff]  ;;  %v2755_v10 = vld [vmem:[#allocation13 + $0x508] sm:$0xff] }
0x109c   :  { %v2531_v39 = vadd.f32 %v6577_v24, %v6574_v12  ;;  %v2539_v38 = vmul.f32 %v6577_v24, %v6577_v24  ;;  %v2748_v57 = vld [vmem:[#allocation13 + $0x4d0] sm:$0xff] }
0x109d   :  { %v2556_v25 = vadd.f32 1e-05, %v2550_v18  ;;  %v2677_v18 = vld [vmem:[#allocation13 + $0x298] sm:$0xff] }
0x109e   :  { %2532 = vadd.xlane.f32.xlu0 %v2531_v39  ;;  %v2543_v60 = vadd.f32 %v2539_v38, %v2538_v63  ;;  %v2671_v63 = vld [vmem:[#allocation13 + $0x268] sm:$0xff]  ;;  %v5394_v39 = vpack.c.bf16 %v2664_v23, %v2658_v19  ;;  %v2754_v23 = vld [vmem:[#allocation13 + $0x500] sm:$0xff] }
0x109f   :  { %5740 = vrsqrt.f32 %v2556_v25  ;;  %v5396_v38 = vpack.c.bf16 %v2677_v18, %v2671_v63  ;;  %v2670_v25 = vld [vmem:[#allocation13 + $0x260] sm:$0xff]  ;;  %v2760_v63 = vld [vmem:[#allocation13 + $0x530] sm:$0xff]  ;;  %v2767_v18 = vld [vmem:[#allocation13 + $0x568] sm:$0xff] }
0x10a0   :  { %2544 = vadd.xlane.f32.xlu1 %v2543_v60  ;;  %v2676_v60 = vld [vmem:[#allocation13 + $0x290] sm:$0xff] }
0x10a9   :  { %v5741_v32 = vpop.eup %5740 }
0x10aa   :  { %v2560_v34 = vmul.f32 %v5741_v32, %v2552_v5  ;;  %v2561_v35 = vmul.f32 %v5741_v32, %v2553_v29  ;;  %v5398_v5 = vpack.c.bf16 %v2676_v60, %v2670_v25  ;;  %v5400_v29 = vpack.c.bf16 %v2689_v28, %v2683_v52  ;;  %v2682_v32 = vld [vmem:[#allocation13 + $0x2c0] sm:$0xff]  ;;  %v2772_v52 = vld [vmem:[#allocation13 + $0x590] sm:$0xff]  ;;  %v2779_v28 = vld [vmem:[#allocation13 + $0x5c8] sm:$0xff] }
0x10ab   :  { %v2766_v60 = vld [vmem:[#allocation13 + $0x560] sm:$0xff] }
0x10ac   :  { %v2576_v31 = vmul.f32 %v6593_v6, %v2561_v35  ;;  %v2575_v41 = vmul.f32 %v6590_v30, %v2560_v34  ;;  %v2688_v34 = vld [vmem:[#allocation13 + $0x2f0] sm:$0xff]  ;;  %v2695_v35 = vld [vmem:[#allocation13 + $0x328] sm:$0xff] }
0x10ad   :  { %v5402_v22 = vpack.c.bf16 %v2688_v34, %v2682_v32  ;;  %v2778_v34 = vld [vmem:[#allocation13 + $0x5c0] sm:$0xff] }
0x10ae   :  { %v6604_v62 = vadd.f32 %v6599_v21, %v2576_v31  ;;  %v6607_v14 = vadd.f32 %v6596_v17, %v2575_v41  ;;  %v5404_v31 = vpack.c.bf16 %v2701_v4, %v2695_v35  ;;  %v2694_v41 = vld [vmem:[#allocation13 + $0x320] sm:$0xff]  ;;  %v2784_v35 = vld [vmem:[#allocation13 + $0x5f0] sm:$0xff] }
0x10af   :  { %v5434_v4 = vpack.c.bf16 %v2784_v35, %v2778_v34 }
0x10b0   :  { %2882 = vmatprep.mubr.f32.mxu0 %v6604_v62  ;;  %2959 = vmatprep.mubr.f32.mxu1 %v6604_v62 }
0x10b1   :  { %2883 = vmatmul.mubr.f32.vlgmr.msra.gmra.mrb[22].mxu0 %v6607_v14  ;;  %2960 = vmatmul.mubr.f32.vlgmr.msra.gmra.mrb[30].mxu1 %v6607_v14 }
0x10b2   :  { %5375 = vmatpush1.bf16.msra.mxu0 %v5374_v13  ;;  %v2713_v13 = vld [vmem:[#allocation13 + $0x3b8] sm:$0xff] }
0x10b3   :  { %5377 = vmatprep.subr.bf16.mxu0 %v5376_v42  ;;  %v5406_v42 = vpack.c.bf16 %v2700_v36, %v2694_v41  ;;  %v5408_v20 = vpack.c.bf16 %v2713_v13, %v2707_v37 }
0x10b6   :  { %5379 = vmatpush1.bf16.msra.mxu0 %v5378_v45  ;;  %v2725_v45 = vld [vmem:[#allocation13 + $0x418] sm:$0xff] }
0x10b7   :  { %5381 = vmatprep.subr.bf16.mxu0 %v5380_v46  ;;  %v5410_v46 = vpack.c.bf16 %v2712_v11, %v2706_v40  ;;  %v5412_v48 = vpack.c.bf16 %v2725_v45, %v2719_v44 }
0x10ba   :  { %5383 = vmatpush1.bf16.msra.mxu0 %v5382_v58  ;;  %v2737_v58 = vld [vmem:[#allocation13 + $0x478] sm:$0xff] }
0x10bb   :  { %5385 = vmatprep.subr.bf16.mxu0 %v5384_v51  ;;  %v5414_v51 = vpack.c.bf16 %v2724_v54, %v2718_v50  ;;  %v5416_v2 = vpack.c.bf16 %v2737_v58, %v2731_v55 }
0x10be   :  { %5387 = vmatpush1.bf16.msra.mxu0 %v5386_v26  ;;  %v2749_v26 = vld [vmem:[#allocation13 + $0x4d8] sm:$0xff] }
0x10bf   :  { %5389 = vmatprep.subr.bf16.mxu0 %v5388_v9  ;;  %v5418_v9 = vpack.c.bf16 %v2736_v7, %v2730_v27  ;;  %v5420_v16 = vpack.c.bf16 %v2749_v26, %v2743_v59 }
0x10c2   :  { %5391 = vmatpush1.bf16.msra.mxu0 %v5390_v61  ;;  %v2761_v61 = vld [vmem:[#allocation13 + $0x538] sm:$0xff] }
0x10c3   :  { %5393 = vmatprep.subr.bf16.mxu0 %v5392_v15  ;;  %v5422_v15 = vpack.c.bf16 %v2748_v57, %v2742_v8  ;;  %v5424_v19 = vpack.c.bf16 %v2761_v61, %v2755_v10 }
0x10c6   :  { %5395 = vmatpush1.bf16.msra.mxu0 %v5394_v39  ;;  %v2773_v39 = vld [vmem:[#allocation13 + $0x598] sm:$0xff] }
0x10c7   :  { %5397 = vmatprep.subr.bf16.mxu0 %v5396_v38  ;;  %v5426_v38 = vpack.c.bf16 %v2760_v63, %v2754_v23  ;;  %v5428_v25 = vpack.c.bf16 %v2773_v39, %v2767_v18 }
0x10ca   :  { %5399 = vmatpush1.bf16.msra.mxu0 %v5398_v5  ;;  %v2785_v5 = vld [vmem:[#allocation13 + $0x5f8] sm:$0xff] }
0x10cb   :  { %5401 = vmatprep.subr.bf16.mxu0 %v5400_v29  ;;  %v5430_v29 = vpack.c.bf16 %v2772_v52, %v2766_v60  ;;  %v5432_v32 = vpack.c.bf16 %v2785_v5, %v2779_v28 }
0x10ce   :  { %5403 = vmatpush1.bf16.msra.mxu0 %v5402_v22 }
0x10cf   :  { %5405 = vmatprep.subr.bf16.mxu0 %v5404_v31 }
0x10d2   :  { %5407 = vmatpush1.bf16.msra.mxu0 %v5406_v42 }
0x10d3   :  { %5409 = vmatprep.subr.bf16.mxu0 %v5408_v20 }
0x10d6   :  { %5411 = vmatpush1.bf16.msra.mxu0 %v5410_v46 }
0x10d7   :  { %5413 = vmatprep.subr.bf16.mxu0 %v5412_v48 }
0x10da   :  { %5415 = vmatpush1.bf16.msra.mxu0 %v5414_v51 }
0x10db   :  { %5417 = vmatprep.subr.bf16.mxu0 %v5416_v2 }
0x10de   :  { %5419 = vmatpush1.bf16.msra.mxu0 %v5418_v9 }
0x10df   :  { %5421 = vmatprep.subr.bf16.mxu0 %v5420_v16 }
0x10e2   :  { %5423 = vmatpush1.bf16.msra.mxu0 %v5422_v15 }
0x10e3   :  { %5425 = vmatprep.subr.bf16.mxu0 %v5424_v19 }
0x10e6   :  { %5427 = vmatpush1.bf16.msra.mxu0 %v5426_v38 }
0x10e7   :  { %5429 = vmatprep.subr.bf16.mxu0 %v5428_v25 }
0x10ea   :  { %5431 = vmatpush1.bf16.msra.mxu0 %v5430_v29 }
0x10eb   :  { %5433 = vmatprep.subr.bf16.mxu0 %v5432_v32 }
0x10ee   :  { %5435 = vmatpush1.bf16.msra.mxu0 %v5434_v4 }
0x10ef   :  { %4599 = vmatprep.subr.mxu0 %v6072_v0 }
0x112b   :  { %v2533_v22 = vpop.xlane.xlu0 %2532 }
0x112c   :  { %v2535_v31 = vmul.f32 0.005, %v2533_v22 }
0x112d   :  { %v2545_v41 = vpop.xlane.xlu1 %2544 }
0x112e   :  { %v2547_v36 = vmul.f32 0.005, %v2545_v41  ;;  %v2549_v37 = vmul.f32 %v2535_v31, %v2535_v31  ;;  %v2554_v20 = vsub.f32 %v6574_v12, %v2535_v31  ;;  %v2555_v40 = vsub.f32 %v6577_v24, %v2535_v31  ;;  %v2786_v12 = vld [vmem:[%s6862_s1] sm:$0x3f] }
0x112f   :  { %v6638_v24 = vrot.slane %v2786_v12, %v6357_v53  ;;  %v2807_v59 = vrot.slane %v2786_v12, %v1111_v3  ;;  %v2811_v26 = vrot.slane %v2786_v12, %v1115_v1  ;;  %v6663_v52 = vrot.slane %v2786_v12, %v6343_v43 }
0x1130   :  { %v2551_v13 = vsub.f32 %v2547_v36, %v2549_v37  ;;  %v6666_v5 = vrot.slane %v2786_v12, %v6336_v49 }
0x1132   :  { %v2557_v42 = vadd.f32 1e-05, %v2551_v13 }
0x1134   :  { %5742 = vrsqrt.f32 %v2557_v42 }
0x113e   :  { %v5743_v11 = vpop.eup %5742 }
0x113f   :  { %v2563_v44 = vmul.f32 %v5743_v11, %v2555_v40  ;;  %v2562_v45 = vmul.f32 %v5743_v11, %v2554_v20 }
0x1141   :  { %v2578_v46 = vmul.f32 %v6593_v6, %v2563_v44  ;;  %v2577_v48 = vmul.f32 %v6590_v30, %v2562_v45  ;;  %v6641_v30 = vrot.slane %v2786_v12, %v6330_v56 }
0x1143   :  { %v6619_v50 = vadd.f32 %v6599_v21, %v2578_v46  ;;  %v6622_v54 = vadd.f32 %v6596_v17, %v2577_v48 }
0x1145   :  { %2888 = vmatprep.mubr.f32.mxu0 %v6619_v50  ;;  %2965 = vmatprep.mubr.f32.mxu1 %v6619_v50 }
0x1146   :  { %2889 = vmatmul.mubr.f32.gmra.mrb[24].mxu0 %v6622_v54  ;;  %2966 = vmatmul.mubr.f32.gmra.mrb[32].mxu1 %v6622_v54 }
0x1147   :  { %3036 = vmatprep.mubr.f32.mxu0 %v6604_v62  ;;  %4566 = vmatprep.mubr.msk.f32.mxu1 %vm6073_vm0, %v6072_v0 }
0x114a   :  { %3037 = vmatmul.mubr.f32.vlgmr.msra.gmra.mrb[26].mxu0 %v6607_v14 }
0x114b   :  { %3042 = vmatprep.mubr.f32.mxu0 %v6619_v50 }
0x114e   :  { %3043 = vmatmul.mubr.f32.gmra.mrb[28].mxu0 %v6622_v54 }
0x114f   :  { %4601 = vmatprep.mubr.msk.f32.mxu0 %vm6073_vm0, %v6072_v0 }
0x1184   :  { %v2884_v6 = vpop.f32.mrb[22].mxu0  ;;  %v2961_v17 = vpop.f32.mrb[30].mxu1 }
0x1185   :  { %v2962_v21 = vadd.f32 %v2961_v17, %v6638_v24  ;;  %v2886_v55 = vpop.f32.mrb[23].mxu0  ;;  %v2963_v58 = vpop.f32.mrb[31].mxu1  ;;  %v2885_v51 = vadd.f32 %v2884_v6, %v6641_v30 }
0x1186   :  { %v2964_v32 = vadd.f32 %v2963_v58, %v6663_v52  ;;  %v2887_v34 = vadd.f32 %v2886_v55, %v6666_v5 }
0x1187   :  { %4565 = vmatpush3.xpose.msra.mxu1 %v2962_v21 }
0x1188   :  { %4569 = vmatprep.subr.mxu1 %v6072_v0 }
0x118a   :  { %4567 = vmatmul.mubr.f32.vlgmr.msra.gmra.mrb[34].mxu1 %v2885_v51 }
0x118b   :  { %4571 = vmatprep.mubr.msk.f32.mxu1 %vm6073_vm0, %v6072_v0 }
0x1219   :  { %v6648_v53 = vpop.f32.mrb[24].mxu0  ;;  %v2967_v2 = vpop.f32.mrb[32].mxu1 }
0x121a   :  { %v6650_v27 = vpop.f32.mrb[25].mxu0  ;;  %v6652_v7 = vpop.f32.mrb[33].mxu1  ;;  %v2968_v45 = vadd.f32 %v2967_v2, %v6638_v24  ;;  %v2891_v46 = vadd.f32 %v6648_v53, %v6641_v30 }
0x121d   :  { %v3038_v9 = vpop.f32.mrb[26].mxu0 }
0x121e   :  { %v3039_v16 = vadd.f32 %v3038_v9, %v2807_v59  ;;  %v3040_v8 = vpop.f32.mrb[27].mxu0 }
0x121f   :  { %v3041_v57 = vadd.f32 %v3040_v8, %v2811_v26 }
0x1220   :  { %4570 = vmatpush3.msra.mxu1 %v3039_v16 }
0x1221   :  { %v3044_v10 = vpop.f32.mrb[28].mxu0  ;;  %4574 = vmatprep.subr.mxu1 %v6072_v0 }
0x1222   :  { %v3045_v61 = vadd.f32 %v3044_v10, %v2807_v59  ;;  %v3046_v15 = vpop.f32.mrb[29].mxu0  ;;  %v3674_v59 = vld [vmem:[#allocation14 + $0x8] sm:$0xff]  ;;  %v3675_v10 = vld [vmem:[#allocation14 + $0x10] sm:$0xff] }
0x1223   :  { %v3047_v19 = vadd.f32 %v3046_v15, %v2811_v26  ;;  %v3676_v26 = vld [vmem:[#allocation14 + $0x18] sm:$0xff]  ;;  %v3678_v15 = vld [vmem:[#allocation14 + $0x28] sm:$0xff] }
0x1224   :  { %v5436_v8 = vpack.c.bf16 %v3676_v26, %v3674_v59  ;;  %v3707_v59 = vld [vmem:[#allocation14 + $0x110] sm:$0xff]  ;;  %v3710_v26 = vld [vmem:[#allocation14 + $0x128] sm:$0xff] }
0x1225   :  { %4600 = vmatpush3.msra.mxu0 %v3047_v19  ;;  %v3680_v19 = vld [vmem:[#allocation14 + $0x38] sm:$0xff] }
0x125d   :  { %v3115_v23 = vpop.f32.mrb[34].mxu1 }
0x125e   :  { %v3116_v63 = vadd.f32 %v3115_v23, %v6423_v33  ;;  %v4568_v18 = vpop.f32.mrb[35].mxu1 }
0x125f   :  { %v5440_v18 = vpack.c.bf16 %v3680_v19, %v3678_v15  ;;  %v3716_v15 = vld [vmem:[#allocation14 + $0x158] sm:$0xff] }
0x1260   :  { %v3119_v3 = vsel %vm1424_vm2, %v3116_v63, -inf }
0x1261   :  { %3120 = vmax.xlane.f32.xlu0 %v3119_v3  ;;  %v3677_v3 = vld [vmem:[#allocation14 + $0x20] sm:$0xff] }
0x12ee   :  { %v3121_v47 = vpop.xlane.xlu0 %3120 }
0x12ef   :  { %v3122_v1 = vsub.f32 %v3116_v63, %v3121_v47  ;;  %v2893_v63 = vadd.f32 %v6650_v27, %v6666_v5  ;;  %v3679_v47 = vld [vmem:[#allocation14 + $0x30] sm:$0xff]  ;;  %v3685_v5 = vld [vmem:[#allocation14 + $0x60] sm:$0xff] }
0x12f1   :  { %v3123_v39 = vmul.f32 1.442695, %v3122_v1  ;;  %v3682_v1 = vld [vmem:[#allocation14 + $0x48] sm:$0xff] }
0x12f3   :  { %5744 = vpow2.f32 %v3123_v39  ;;  %v3684_v39 = vld [vmem:[#allocation14 + $0x58] sm:$0xff] }
0x12fd   :  { %v5745_v38 = vpop.eup %5744 }
0x12fe   :  { %v3125_v25 = vsel %vm1424_vm2, %v5745_v38, 0.0 }
0x12ff   :  { %3126 = vadd.xlane.f32.xlu1 %v3125_v25  ;;  %v3681_v25 = vld [vmem:[#allocation14 + $0x40] sm:$0xff] }
0x138c   :  { %v3127_v60 = vpop.xlane.xlu1 %3126 }
0x138d   :  { %5746 = vrcp.f32 %v3127_v60  ;;  %v3683_v60 = vld [vmem:[#allocation14 + $0x50] sm:$0xff] }
0x1397   :  { %v5747_v28 = vpop.eup %5746 }
0x1398   :  { %v3129_v29 = vmul.f32 %v5747_v28, %v5745_v38  ;;  %v5444_v38 = vpack.c.bf16 %v3684_v39, %v3682_v1  ;;  %v5446_v28 = vpack.c.bf16 %v3683_v60, %v3681_v25  ;;  %v3722_v25 = vld [vmem:[#allocation14 + $0x188] sm:$0xff]  ;;  %v3724_v60 = vld [vmem:[#allocation14 + $0x198] sm:$0xff] }
0x139a   :  { %4572 = vmatmul.mubr.msk.f32.vlgmr.msra.gmra.mrb[36].mxu1 %vm1424_vm2, %v3129_v29  ;;  %v3687_v29 = vld [vmem:[#allocation14 + $0x70] sm:$0xff] }
0x139b   :  { %4575 = vmatpush3.xpose.msra.mxu1 %v2964_v32  ;;  %4576 = vmatprep.mubr.msk.f32.mxu1 %vm6073_vm0, %v6072_v0  ;;  %v3690_v32 = vld [vmem:[#allocation14 + $0x88] sm:$0xff] }
0x139c   :  { %4579 = vmatprep.subr.mxu1 %v6072_v0 }
0x139e   :  { %4577 = vmatmul.mubr.f32.vlgmr.msra.gmra.mrb[38].mxu1 %v2887_v34  ;;  %v3692_v34 = vld [vmem:[#allocation14 + $0x98] sm:$0xff] }
0x139f   :  { %4580 = vmatpush3.msra.mxu1 %v3041_v57  ;;  %4581 = vmatprep.mubr.msk.f32.mxu1 %vm6073_vm0, %v6072_v0  ;;  %v3673_v57 = vld [vmem:[#allocation14] sm:$0xff] }
0x13a0   :  { %4584 = vmatprep.subr.mxu1 %v6072_v0  ;;  %v5438_v23 = vpack.c.bf16 %v3675_v10, %v3673_v57  ;;  %v3709_v57 = vld [vmem:[#allocation14 + $0x120] sm:$0xff]  ;;  %v3711_v10 = vld [vmem:[#allocation14 + $0x130] sm:$0xff] }
0x13a1   :  { %v5474_v19 = vpack.c.bf16 %v3711_v10, %v3709_v57 }
0x146d   :  { %v6677_v43 = vpop.f32.mrb[36].mxu1 }
0x146e   :  { %v4573_v35 = vpop.f32.mrb[37].mxu1 }
0x146f   :  { %v5450_v35 = vpack.c.bf16 %v3687_v29, %v3685_v5  ;;  %v3726_v5 = vld [vmem:[#allocation14 + $0x1a8] sm:$0xff]  ;;  %v3728_v29 = vld [vmem:[#allocation14 + $0x1b8] sm:$0xff] }
0x1471   :  { %v3270_v4 = vpop.f32.mrb[38].mxu1 }
0x1472   :  { %v3271_v22 = vadd.f32 %v3270_v4, %v6423_v33  ;;  %v4578_v31 = vpop.f32.mrb[39].mxu1  ;;  %v5452_v4 = vpack.c.bf16 %v3692_v34, %v3690_v32  ;;  %v5488_v34 = vpack.c.bf16 %v3728_v29, %v3726_v5 }
0x1473   :  { %v3691_v31 = vld [vmem:[#allocation14 + $0x90] sm:$0xff] }
0x1474   :  { %v3274_v41 = vsel %vm1424_vm2, %v3271_v22, -inf }
0x1475   :  { %3275 = vmax.xlane.f32.xlu0 %v3274_v41  ;;  %v3694_v41 = vld [vmem:[#allocation14 + $0xa8] sm:$0xff] }
0x1502   :  { %v3276_v36 = vpop.xlane.xlu0 %3275 }
0x1503   :  { %v3277_v37 = vsub.f32 %v3271_v22, %v3276_v36  ;;  %v3689_v22 = vld [vmem:[#allocation14 + $0x80] sm:$0xff]  ;;  %v3696_v36 = vld [vmem:[#allocation14 + $0xb8] sm:$0xff] }
0x1505   :  { %v3278_v13 = vmul.f32 1.442695, %v3277_v37  ;;  %v5454_v37 = vpack.c.bf16 %v3691_v31, %v3689_v22  ;;  %v3730_v22 = vld [vmem:[#allocation14 + $0x1c8] sm:$0xff]  ;;  %v3732_v31 = vld [vmem:[#allocation14 + $0x1d8] sm:$0xff] }
0x1507   :  { %5748 = vpow2.f32 %v3278_v13  ;;  %v5456_v13 = vpack.c.bf16 %v3696_v36, %v3694_v41  ;;  %v5492_v36 = vpack.c.bf16 %v3732_v31, %v3730_v22 }
0x1511   :  { %v5749_v42 = vpop.eup %5748 }
0x1512   :  { %v3280_v20 = vsel %vm1424_vm2, %v5749_v42, 0.0 }
0x1513   :  { %3281 = vadd.xlane.f32.xlu1 %v3280_v20  ;;  %v3695_v20 = vld [vmem:[#allocation14 + $0xb0] sm:$0xff] }
0x15a0   :  { %v3282_v40 = vpop.xlane.xlu1 %3281 }
0x15a1   :  { %5750 = vrcp.f32 %v3282_v40  ;;  %v3698_v40 = vld [vmem:[#allocation14 + $0xc8] sm:$0xff] }
0x15ab   :  { %v5751_v11 = vpop.eup %5750 }
0x15ac   :  { %v3284_v44 = vmul.f32 %v5751_v11, %v5749_v42  ;;  %v3693_v42 = vld [vmem:[#allocation14 + $0xa0] sm:$0xff]  ;;  %v3700_v11 = vld [vmem:[#allocation14 + $0xd8] sm:$0xff] }
0x15ae   :  { %4582 = vmatmul.mubr.msk.f32.vlgmr.msra.gmra.mrb[40].mxu1 %vm1424_vm2, %v3284_v44  ;;  %v5458_v44 = vpack.c.bf16 %v3695_v20, %v3693_v42  ;;  %v3734_v42 = vld [vmem:[#allocation14 + $0x1e8] sm:$0xff]  ;;  %v3736_v20 = vld [vmem:[#allocation14 + $0x1f8] sm:$0xff] }
0x15af   :  { %4585 = vmatpush3.xpose.msra.mxu1 %v2968_v45  ;;  %4586 = vmatprep.mubr.msk.f32.mxu1 %vm6073_vm0, %v6072_v0  ;;  %v5460_v45 = vpack.c.bf16 %v3700_v11, %v3698_v40  ;;  %v5496_v11 = vpack.c.bf16 %v3736_v20, %v3734_v42  ;;  %v6735_v42 = vld [vmem:[%s6864_s9] sm:$0x3] }
0x15b0   :  { %4589 = vmatprep.subr.mxu1 %v6072_v0 }
0x15b2   :  { %4587 = vmatmul.mubr.f32.vlgmr.msra.gmra.mrb[42].mxu1 %v2891_v46  ;;  %v3697_v46 = vld [vmem:[#allocation14 + $0xc0] sm:$0xff] }
0x15b3   :  { %4590 = vmatpush3.msra.mxu1 %v3045_v61  ;;  %4591 = vmatprep.mubr.msk.f32.mxu1 %vm6073_vm0, %v6072_v0  ;;  %v2970_v61 = vadd.f32 %v6652_v7, %v6663_v52  ;;  %v5442_v7 = vpack.c.bf16 %v3679_v47, %v3677_v3  ;;  %v3686_v52 = vld [vmem:[#allocation14 + $0x68] sm:$0xff]  ;;  %v3720_v47 = vld [vmem:[#allocation14 + $0x178] sm:$0xff] }
0x15b4   :  { %4594 = vmatprep.subr.mxu1 %v6072_v0  ;;  %v3718_v3 = vld [vmem:[#allocation14 + $0x168] sm:$0xff] }
0x15b5   :  { %v5480_v39 = vpack.c.bf16 %v3720_v47, %v3718_v3 }
0x1681   :  { %v3354_v48 = vpop.f32.mrb[40].mxu1 }
0x1682   :  { %v4583_v12 = vpop.f32.mrb[41].mxu1 }
0x1683   :  { %v3702_v12 = vld [vmem:[#allocation14 + $0xe8] sm:$0xff] }
0x1685   :  { %v3425_v24 = vpop.f32.mrb[42].mxu1 }
0x1686   :  { %v3426_v6 = vadd.f32 %v3425_v24, %v6423_v33  ;;  %v4588_v17 = vpop.f32.mrb[43].mxu1  ;;  %v3704_v24 = vld [vmem:[#allocation14 + $0xf8] sm:$0xff] }
0x1687   :  { %v5464_v17 = vpack.c.bf16 %v3704_v24, %v3702_v12 }
0x1688   :  { %v3429_v21 = vsel %vm1424_vm2, %v3426_v6, -inf }
0x1689   :  { %3430 = vmax.xlane.f32.xlu0 %v3429_v21  ;;  %v3701_v21 = vld [vmem:[#allocation14 + $0xe0] sm:$0xff] }
0x1716   :  { %v3431_v55 = vpop.xlane.xlu0 %3430 }
0x1717   :  { %v3432_v30 = vsub.f32 %v3426_v6, %v3431_v55  ;;  %v3703_v55 = vld [vmem:[#allocation14 + $0xf0] sm:$0xff] }
0x1719   :  { %v3433_v58 = vmul.f32 1.442695, %v3432_v30  ;;  %v3706_v30 = vld [vmem:[#allocation14 + $0x108] sm:$0xff] }
0x171b   :  { %5752 = vpow2.f32 %v3433_v58  ;;  %v3708_v58 = vld [vmem:[#allocation14 + $0x118] sm:$0xff] }
0x1725   :  { %v5753_v51 = vpop.eup %5752 }
0x1726   :  { %v3435_v53 = vsel %vm1424_vm2, %v5753_v51, 0.0 }
0x1727   :  { %3436 = vadd.xlane.f32.xlu1 %v3435_v53  ;;  %v5468_v53 = vpack.c.bf16 %v3708_v58, %v3706_v30 }
0x17b4   :  { %v3437_v2 = vpop.xlane.xlu1 %3436 }
0x17b5   :  { %5754 = vrcp.f32 %v3437_v2  ;;  %v3705_v2 = vld [vmem:[#allocation14 + $0x100] sm:$0xff] }
0x17bf   :  { %v5755_v9 = vpop.eup %5754 }
0x17c0   :  { %v3439_v16 = vmul.f32 %v5755_v9, %v5753_v51  ;;  %v5466_v51 = vpack.c.bf16 %v3703_v55, %v3701_v21  ;;  %v3712_v9 = vld [vmem:[#allocation14 + $0x138] sm:$0xff]  ;;  %v3818_v55 = vld [vmem:[%s6863_s23] sm:$0x3] }
0x17c1   :  { %v6709_v30 = vrot.slane %v3818_v55, %v6330_v56 }
0x17c2   :  { %4592 = vmatmul.mubr.msk.f32.vlgmr.msra.gmra.mrb[44].mxu1 %vm1424_vm2, %v3439_v16  ;;  %v5470_v16 = vpack.c.bf16 %v3707_v59, %v3705_v2 }
0x17c3   :  { %4595 = vmatpush3.xpose.msra.mxu1 %v2970_v61  ;;  %4596 = vmatprep.mubr.msk.f32.mxu1 %vm6073_vm0, %v6072_v0  ;;  %v3688_v0 = vld [vmem:[#allocation14 + $0x78] sm:$0xff]  ;;  %v3714_v61 = vld [vmem:[#allocation14 + $0x148] sm:$0xff] }
0x17c4   :  { %5437 = vmatprep.subr.bf16.mxu1 %v5436_v8  ;;  %v5448_v27 = vpack.c.bf16 %v3688_v0, %v3686_v52  ;;  %v5472_v8 = vpack.c.bf16 %v3712_v9, %v3710_v26  ;;  %v5484_v0 = vpack.c.bf16 %v3724_v60, %v3722_v25  ;;  %v3904_v25 = vld [vmem:[#allocation16 + $0x10] sm:$0xff] }
0x17c6   :  { %4597 = vmatmul.mubr.f32.vlgmr.msra.gmra.mrb[46].mxu1 %v2893_v63  ;;  %v3713_v63 = vld [vmem:[#allocation14 + $0x140] sm:$0xff] }
0x17c7   :  { %5439 = vmatpush1.bf16.msra.mxu1 %v5438_v23  ;;  %3801 = vmatprep.mubr.f32.mxu1 %v3354_v48  ;;  %v3699_v48 = vld [vmem:[#allocation14 + $0xd0] sm:$0xff]  ;;  %v5476_v23 = vpack.c.bf16 %v3716_v15, %v3714_v61  ;;  %v3903_v15 = vld [vmem:[#allocation16 + $0x8] sm:$0xff] }
0x17c8   :  { %5441 = vmatprep.subr.bf16.mxu1 %v5440_v18  ;;  %v5462_v6 = vpack.c.bf16 %v3699_v48, %v3697_v46  ;;  %v3715_v18 = vld [vmem:[#allocation14 + $0x150] sm:$0xff] }
0x17c9   :  { %v5478_v1 = vpack.c.bf16 %v3715_v18, %v3713_v63 }
0x17cb   :  { %5443 = vmatpush1.bf16.msra.mxu1 %v5442_v7  ;;  %v3717_v7 = vld [vmem:[#allocation14 + $0x160] sm:$0xff] }
0x17cc   :  { %5445 = vmatprep.subr.bf16.mxu1 %v5444_v38  ;;  %v3719_v38 = vld [vmem:[#allocation14 + $0x170] sm:$0xff] }
0x17cd   :  { %v5482_v52 = vpack.c.bf16 %v3719_v38, %v3717_v7  ;;  %v3902_v38 = vld [vmem:[#allocation16] sm:$0xff] }
0x17cf   :  { %5447 = vmatpush1.bf16.msra.mxu1 %v5446_v28  ;;  %v3721_v28 = vld [vmem:[#allocation14 + $0x180] sm:$0xff] }
0x17d0   :  { %5449 = vmatprep.subr.bf16.mxu1 %v5448_v27  ;;  %v3723_v27 = vld [vmem:[#allocation14 + $0x190] sm:$0xff] }
0x17d1   :  { %v5486_v32 = vpack.c.bf16 %v3723_v27, %v3721_v28  ;;  %v5502_v27 = vpack.c.bf16 %v3904_v25, %v3902_v38  ;;  %v3932_v38 = vld [vmem:[#allocation16 + $0xf0] sm:$0xff]  ;;  %v3935_v25 = vld [vmem:[#allocation16 + $0x108] sm:$0xff] }
0x17d3   :  { %5451 = vmatpush1.bf16.msra.mxu1 %v5450_v35  ;;  %v3725_v35 = vld [vmem:[#allocation14 + $0x1a0] sm:$0xff] }
0x17d4   :  { %5453 = vmatprep.subr.bf16.mxu1 %v5452_v4  ;;  %v3727_v4 = vld [vmem:[#allocation14 + $0x1b0] sm:$0xff] }
0x17d5   :  { %v5490_v41 = vpack.c.bf16 %v3727_v4, %v3725_v35  ;;  %v3911_v35 = vld [vmem:[#allocation16 + $0x48] sm:$0xff]  ;;  %v3913_v4 = vld [vmem:[#allocation16 + $0x58] sm:$0xff] }
0x17d6   :  { %v5508_v31 = vpack.c.bf16 %v3913_v4, %v3911_v35  ;;  %v3938_v35 = vld [vmem:[#allocation16 + $0x120] sm:$0xff]  ;;  %v3940_v4 = vld [vmem:[#allocation16 + $0x130] sm:$0xff] }
0x17d7   :  { %5455 = vmatpush1.bf16.msra.mxu1 %v5454_v37  ;;  %v3729_v37 = vld [vmem:[#allocation14 + $0x1c0] sm:$0xff] }
0x17d8   :  { %5457 = vmatprep.subr.bf16.mxu1 %v5456_v13  ;;  %v3731_v13 = vld [vmem:[#allocation14 + $0x1d0] sm:$0xff] }
0x17d9   :  { %v5494_v40 = vpack.c.bf16 %v3731_v13, %v3729_v37  ;;  %v3915_v37 = vld [vmem:[#allocation16 + $0x68] sm:$0xff]  ;;  %v3917_v13 = vld [vmem:[#allocation16 + $0x78] sm:$0xff] }
0x17db   :  { %5459 = vmatpush1.bf16.msra.mxu1 %v5458_v44  ;;  %v3733_v44 = vld [vmem:[#allocation14 + $0x1e0] sm:$0xff] }
0x17dc   :  { %5461 = vmatprep.subr.bf16.mxu1 %v5460_v45  ;;  %v3735_v45 = vld [vmem:[#allocation14 + $0x1f0] sm:$0xff] }
0x17dd   :  { %v5498_v46 = vpack.c.bf16 %v3735_v45, %v3733_v44  ;;  %v5512_v44 = vpack.c.bf16 %v3917_v13, %v3915_v37  ;;  %v3914_v45 = vld [vmem:[#allocation16 + $0x60] sm:$0xff]  ;;  %v3944_v13 = vld [vmem:[#allocation16 + $0x150] sm:$0xff] }
0x17de   :  { %v3942_v37 = vld [vmem:[#allocation16 + $0x140] sm:$0xff] }
0x17df   :  { %5463 = vmatpush1.bf16.msra.mxu1 %v5462_v6 }
0x17e0   :  { %5465 = vmatprep.subr.bf16.mxu1 %v5464_v17 }
0x17e3   :  { %5467 = vmatpush1.bf16.msra.mxu1 %v5466_v51  ;;  %v6712_v51 = vrot.slane %v3818_v55, %v6336_v49 }
0x17e4   :  { %5469 = vmatprep.subr.bf16.mxu1 %v5468_v53 }
0x17e7   :  { %5471 = vmatpush1.bf16.msra.mxu1 %v5470_v16 }
0x17e8   :  { %5473 = vmatprep.subr.bf16.mxu1 %v5472_v8 }
0x17eb   :  { %5475 = vmatpush1.bf16.msra.mxu1 %v5474_v19  ;;  %v3905_v19 = vld [vmem:[#allocation16 + $0x18] sm:$0xff] }
0x17ec   :  { %5477 = vmatprep.subr.bf16.mxu1 %v5476_v23  ;;  %v5500_v23 = vpack.c.bf16 %v3905_v19, %v3903_v15 }
0x17ee   :  { %5501 = vmatprep.subr.bf16.mxu0 %v5500_v23  ;;  %v3926_v23 = vld [vmem:[#allocation16 + $0xc0] sm:$0xff] }
0x17ef   :  { %5479 = vmatpush1.bf16.msra.mxu1 %v5478_v1 }
0x17f0   :  { %5481 = vmatprep.subr.bf16.mxu1 %v5480_v39 }
0x17f3   :  { %5483 = vmatpush1.bf16.msra.mxu1 %v5482_v52  ;;  %v3907_v52 = vld [vmem:[#allocation16 + $0x28] sm:$0xff] }
0x17f4   :  { %5485 = vmatprep.subr.bf16.mxu1 %v5484_v0  ;;  %v3909_v0 = vld [vmem:[#allocation16 + $0x38] sm:$0xff] }
0x17f5   :  { %v5504_v29 = vpack.c.bf16 %v3909_v0, %v3907_v52 }
0x17f7   :  { %5487 = vmatpush1.bf16.msra.mxu1 %v5486_v32  ;;  %v3906_v32 = vld [vmem:[#allocation16 + $0x20] sm:$0xff] }
0x17f8   :  { %5489 = vmatprep.subr.bf16.mxu1 %v5488_v34  ;;  %v3908_v34 = vld [vmem:[#allocation16 + $0x30] sm:$0xff] }
0x17f9   :  { %v5506_v22 = vpack.c.bf16 %v3908_v34, %v3906_v32 }
0x17fb   :  { %5491 = vmatpush1.bf16.msra.mxu1 %v5490_v41  ;;  %v3910_v41 = vld [vmem:[#allocation16 + $0x40] sm:$0xff] }
0x17fc   :  { %5493 = vmatprep.subr.bf16.mxu1 %v5492_v36  ;;  %v3912_v36 = vld [vmem:[#allocation16 + $0x50] sm:$0xff] }
0x17fd   :  { %v5510_v20 = vpack.c.bf16 %v3912_v36, %v3910_v41  ;;  %v5538_v41 = vpack.c.bf16 %v3940_v4, %v3938_v35  ;;  %v4065_v4 = vld [vmem:[#allocation17 + $0x30] sm:$0xff] }
0x17ff   :  { %5495 = vmatpush1.bf16.msra.mxu1 %v5494_v40  ;;  %v6738_v40 = vld [vmem:[%s6865_s26] sm:$0x3] }
0x1800   :  { %5497 = vmatprep.subr.bf16.mxu1 %v5496_v11  ;;  %v6751_v55 = vrot.slane %v6738_v40, %v6336_v49 }
0x1803   :  { %5499 = vmatpush1.bf16.msra.mxu1 %v5498_v46  ;;  %v3916_v46 = vld [vmem:[#allocation16 + $0x70] sm:$0xff] }
0x1806   :  { %3802 = vmatmul.mubr.f32.vlgmr.msra.gmra.mrb[48].mxu1 %v6677_v43 }
0x1895   :  { %v6703_v48 = vpop.f32.mrb[44].mxu1 }
0x1896   :  { %v4593_v12 = vpop.f32.mrb[45].mxu1 }
0x1897   :  { %v6744_v12 = vrot.slane %v6735_v42, %v6336_v49 }
0x1899   :  { %v3580_v24 = vpop.f32.mrb[46].mxu1 }
0x189a   :  { %v3581_v6 = vadd.f32 %v3580_v24, %v6423_v33  ;;  %v4598_v17 = vpop.f32.mrb[47].mxu1 }
0x189b   :  { %v3921_v17 = vld [vmem:[#allocation16 + $0x98] sm:$0xff] }
0x189c   :  { %v3584_v21 = vsel %vm1424_vm2, %v3581_v6, -inf }
0x189d   :  { %3585 = vmax.xlane.f32.xlu0 %v3584_v21 }
0x18d9   :  { %v3803_v58 = vpop.f32.mrb[48].mxu1 }
0x18da   :  { %v3814_v43 = vadd.f32 %v3803_v58, %v6607_v14  ;;  %v3805_v53 = vpop.f32.mrb[49].mxu1  ;;  %v5514_v58 = vpack.c.bf16 %v3916_v46, %v3914_v45  ;;  %v3946_v46 = vld [vmem:[#allocation16 + $0x160] sm:$0xff] }
0x18db   :  { %v3815_v2 = vadd.f32 %v3805_v53, %v6604_v62 }
0x18dc   :  { %v6717_v59 = vadd.f32 %v6709_v30, %v3814_v43 }
0x18dd   :  { %v6720_v33 = vadd.f32 %v6712_v51, %v3815_v2  ;;  %v3918_v2 = vld [vmem:[#allocation16 + $0x80] sm:$0xff] }
0x18de   :  { %v3844_v14 = vmul.f32 %v6717_v59, %v6717_v59 }
0x18df   :  { %v3836_v26 = vadd.f32 %v6720_v33, %v6717_v59  ;;  %v3845_v62 = vmul.f32 %v6720_v33, %v6720_v33 }
0x18e1   :  { %3837 = vadd.xlane.f32.xlu0 %v3836_v26  ;;  %v3848_v61 = vadd.f32 %v3845_v62, %v3844_v14  ;;  %v3923_v26 = vld [vmem:[#allocation16 + $0xa8] sm:$0xff]  ;;  %v3922_v14 = vld [vmem:[#allocation16 + $0xa0] sm:$0xff]  ;;  %v3924_v62 = vld [vmem:[#allocation16 + $0xb0] sm:$0xff] }
0x18e2   :  { %v5522_v15 = vpack.c.bf16 %v3924_v62, %v3922_v14  ;;  %v3956_v14 = vld [vmem:[#allocation16 + $0x1b0] sm:$0xff]  ;;  %v3959_v62 = vld [vmem:[#allocation16 + $0x1c8] sm:$0xff] }
0x192a   :  { %v3586_v9 = vpop.xlane.xlu0 %3585 }
0x192b   :  { %v3587_v16 = vsub.f32 %v3581_v6, %v3586_v9  ;;  %v3919_v6 = vld [vmem:[#allocation16 + $0x88] sm:$0xff]  ;;  %v3925_v9 = vld [vmem:[#allocation16 + $0xb8] sm:$0xff] }
0x192c   :  { %v5516_v53 = vpack.c.bf16 %v3921_v17, %v3919_v6  ;;  %v3948_v6 = vld [vmem:[#allocation16 + $0x170] sm:$0xff]  ;;  %v3951_v17 = vld [vmem:[#allocation16 + $0x188] sm:$0xff] }
0x192d   :  { %v3588_v8 = vmul.f32 1.442695, %v3587_v16 }
0x192f   :  { %5756 = vpow2.f32 %v3588_v8 }
0x1939   :  { %v5757_v57 = vpop.eup %5756 }
0x193a   :  { %v3590_v10 = vsel %vm1424_vm2, %v5757_v57, 0.0 }
0x193b   :  { %3591 = vadd.xlane.f32.xlu1 %v3590_v10  ;;  %v3927_v10 = vld [vmem:[#allocation16 + $0xc8] sm:$0xff] }
0x193f   :  { %3849 = vadd.xlane.f32.xlu1 %v3848_v61  ;;  %v3929_v61 = vld [vmem:[#allocation16 + $0xd8] sm:$0xff] }
0x1940   :  { %v5524_v19 = vpack.c.bf16 %v3929_v61, %v3927_v10  ;;  %v3961_v10 = vld [vmem:[#allocation16 + $0x1d8] sm:$0xff] }
0x196e   :  { %v3838_v63 = vpop.xlane.xlu0 %3837 }
0x196f   :  { %v6729_v3 = vmul.f32 0.005, %v3838_v63  ;;  %v3928_v63 = vld [vmem:[#allocation16 + $0xd0] sm:$0xff] }
0x1971   :  { %v3856_v39 = vmul.f32 %v6729_v3, %v6729_v3  ;;  %v3861_v11 = vsub.f32 %v6720_v33, %v6729_v3  ;;  %v3920_v33 = vld [vmem:[#allocation16 + $0x90] sm:$0xff] }
0x1972   :  { %v5518_v8 = vpack.c.bf16 %v3920_v33, %v3918_v2  ;;  %v3952_v2 = vld [vmem:[#allocation16 + $0x190] sm:$0xff]  ;;  %v3955_v33 = vld [vmem:[#allocation16 + $0x1a8] sm:$0xff] }
0x19c8   :  { %v3592_v18 = vpop.xlane.xlu1 %3591 }
0x19c9   :  { %5758 = vrcp.f32 %v3592_v18  ;;  %v3931_v18 = vld [vmem:[#allocation16 + $0xe8] sm:$0xff] }
0x19cc   :  { %v3850_v47 = vpop.xlane.xlu1 %3849 }
0x19cd   :  { %v3854_v1 = vmul.f32 0.005, %v3850_v47  ;;  %v3933_v47 = vld [vmem:[#allocation16 + $0xf8] sm:$0xff] }
0x19cf   :  { %v3858_v7 = vsub.f32 %v3854_v1, %v3856_v39  ;;  %v5526_v1 = vpack.c.bf16 %v3928_v63, %v3926_v23  ;;  %v5528_v39 = vpack.c.bf16 %v3933_v47, %v3931_v18  ;;  %v3960_v23 = vld [vmem:[#allocation16 + $0x1d0] sm:$0xff]  ;;  %v3963_v63 = vld [vmem:[#allocation16 + $0x1e8] sm:$0xff]  ;;  %v3965_v18 = vld [vmem:[#allocation16 + $0x1f8] sm:$0xff]  ;;  %v3860_v47 = vsub.f32 %v6717_v59, %v6729_v3 }
0x19d1   :  { %v3864_v60 = vadd.f32 1e-05, %v3858_v7  ;;  %v3930_v7 = vld [vmem:[#allocation16 + $0xe0] sm:$0xff] }
0x19d2   :  { %v5530_v52 = vpack.c.bf16 %v3932_v38, %v3930_v7  ;;  %v5560_v7 = vpack.c.bf16 %v3965_v18, %v3963_v63  ;;  %v3962_v38 = vld [vmem:[#allocation16 + $0x1e0] sm:$0xff]  ;;  %v4088_v63 = vld [vmem:[#allocation17 + $0xe8] sm:$0xff]  ;;  %v4090_v18 = vld [vmem:[#allocation17 + $0xf8] sm:$0xff] }
0x19d3   :  { %v5759_v28 = vpop.eup %5758  ;;  %5760 = vrsqrt.f32 %v3864_v60  ;;  %v3937_v60 = vld [vmem:[#allocation16 + $0x118] sm:$0xff] }
0x19d4   :  { %v3594_v5 = vmul.f32 %v5759_v28, %v5757_v57  ;;  %v5520_v57 = vpack.c.bf16 %v3925_v9, %v3923_v26  ;;  %v5532_v0 = vpack.c.bf16 %v3937_v60, %v3935_v25  ;;  %v3934_v28 = vld [vmem:[#allocation16 + $0x100] sm:$0xff]  ;;  %v3957_v26 = vld [vmem:[#allocation16 + $0x1b8] sm:$0xff]  ;;  %v3964_v25 = vld [vmem:[#allocation16 + $0x1f0] sm:$0xff] }
0x19d6   :  { %4602 = vmatmul.mubr.msk.f32.vlgmr.msra.gmra.mrb[30].mxu0 %vm1424_vm2, %v3594_v5  ;;  %v3939_v5 = vld [vmem:[#allocation16 + $0x128] sm:$0xff] }
0x19d7   :  { %5503 = vmatpush1.bf16.msra.mxu0 %v5502_v27  ;;  %v3936_v27 = vld [vmem:[#allocation16 + $0x110] sm:$0xff] }
0x19d8   :  { %5505 = vmatprep.subr.bf16.mxu0 %v5504_v29  ;;  %v3941_v29 = vld [vmem:[#allocation16 + $0x138] sm:$0xff]  ;;  %v5534_v32 = vpack.c.bf16 %v3936_v27, %v3934_v28  ;;  %v4059_v27 = vld [vmem:[#allocation17] sm:$0xff] }
0x19d9   :  { %v5536_v34 = vpack.c.bf16 %v3941_v29, %v3939_v5  ;;  %v4062_v28 = vld [vmem:[#allocation17 + $0x18] sm:$0xff]  ;;  %v4064_v29 = vld [vmem:[#allocation17 + $0x28] sm:$0xff] }
0x19db   :  { %5507 = vmatpush1.bf16.msra.mxu0 %v5506_v22  ;;  %v3943_v22 = vld [vmem:[#allocation16 + $0x148] sm:$0xff] }
0x19dc   :  { %5509 = vmatprep.subr.bf16.mxu0 %v5508_v31  ;;  %v3945_v31 = vld [vmem:[#allocation16 + $0x158] sm:$0xff] }
0x19dd   :  { %v6746_v24 = vpop.eup %5760  ;;  %v5540_v36 = vpack.c.bf16 %v3945_v31, %v3943_v22  ;;  %v4068_v22 = vld [vmem:[#allocation17 + $0x48] sm:$0xff]  ;;  %v4070_v31 = vld [vmem:[#allocation17 + $0x58] sm:$0xff] }
0x19de   :  { %v3869_v21 = vmul.f32 %v6746_v24, %v3861_v11  ;;  %v3949_v11 = vld [vmem:[#allocation16 + $0x178] sm:$0xff]  ;;  %v3868_v60 = vmul.f32 %v6746_v24, %v3860_v47  ;;  %v4061_v24 = vld [vmem:[#allocation17 + $0x10] sm:$0xff] }
0x19df   :  { %5511 = vmatpush1.bf16.msra.mxu0 %v5510_v20  ;;  %v3947_v20 = vld [vmem:[#allocation16 + $0x168] sm:$0xff] }
0x19e0   :  { %5513 = vmatprep.subr.bf16.mxu0 %v5512_v44  ;;  %v3884_v43 = vmul.f32 %v6744_v12, %v3869_v21  ;;  %v5542_v44 = vpack.c.bf16 %v3944_v13, %v3942_v37  ;;  %v5544_v45 = vpack.c.bf16 %v3949_v11, %v3947_v20  ;;  %v3953_v21 = vld [vmem:[#allocation16 + $0x198] sm:$0xff]  ;;  %v4067_v37 = vld [vmem:[#allocation17 + $0x40] sm:$0xff]  ;;  %v4069_v13 = vld [vmem:[#allocation17 + $0x50] sm:$0xff] }
0x19e1   :  { %v4072_v20 = vld [vmem:[#allocation17 + $0x68] sm:$0xff]  ;;  %v4074_v11 = vld [vmem:[#allocation17 + $0x78] sm:$0xff] }
0x19e2   :  { %v6755_v16 = vadd.f32 %v6751_v55, %v3884_v43  ;;  %v5548_v43 = vpack.c.bf16 %v3953_v21, %v3951_v17  ;;  %v4076_v17 = vld [vmem:[#allocation17 + $0x88] sm:$0xff]  ;;  %v4078_v21 = vld [vmem:[#allocation17 + $0x98] sm:$0xff] }
0x19e3   :  { %5515 = vmatpush1.bf16.msra.mxu0 %v5514_v58  ;;  %v5546_v58 = vpack.c.bf16 %v3948_v6, %v3946_v46  ;;  %v4071_v46 = vld [vmem:[#allocation17 + $0x60] sm:$0xff]  ;;  %v4073_v6 = vld [vmem:[#allocation17 + $0x70] sm:$0xff] }
0x19e4   :  { %4042 = vmatprep.mubr.f32.mxu0 %v6755_v16  ;;  %5517 = vmatprep.subr.bf16.mxu0 %v5516_v53  ;;  %v3950_v53 = vld [vmem:[#allocation16 + $0x180] sm:$0xff] }
0x19e5   :  { %v5550_v9 = vpack.c.bf16 %v3952_v2, %v3950_v53  ;;  %v4075_v53 = vld [vmem:[#allocation17 + $0x80] sm:$0xff]  ;;  %v4077_v2 = vld [vmem:[#allocation17 + $0x90] sm:$0xff] }
0x19e7   :  { %5519 = vmatpush1.bf16.msra.mxu0 %v5518_v8  ;;  %v5552_v8 = vpack.c.bf16 %v3957_v26, %v3955_v33  ;;  %v4080_v33 = vld [vmem:[#allocation17 + $0xa8] sm:$0xff]  ;;  %v4082_v26 = vld [vmem:[#allocation17 + $0xb8] sm:$0xff] }
0x19e8   :  { %5521 = vmatprep.subr.bf16.mxu0 %v5520_v57  ;;  %v3954_v57 = vld [vmem:[#allocation16 + $0x1a0] sm:$0xff] }
0x19e9   :  { %v5554_v61 = vpack.c.bf16 %v3956_v14, %v3954_v57  ;;  %v4079_v57 = vld [vmem:[#allocation17 + $0xa0] sm:$0xff]  ;;  %v4081_v14 = vld [vmem:[#allocation17 + $0xb0] sm:$0xff] }
0x19eb   :  { %5523 = vmatpush1.bf16.msra.mxu0 %v5522_v15  ;;  %v5556_v15 = vpack.c.bf16 %v3961_v10, %v3959_v62  ;;  %v4084_v62 = vld [vmem:[#allocation17 + $0xc8] sm:$0xff]  ;;  %v4086_v10 = vld [vmem:[#allocation17 + $0xd8] sm:$0xff] }
0x19ec   :  { %5525 = vmatprep.subr.bf16.mxu0 %v5524_v19  ;;  %v3958_v19 = vld [vmem:[#allocation16 + $0x1c0] sm:$0xff] }
0x19ef   :  { %5527 = vmatpush1.bf16.msra.mxu0 %v5526_v1  ;;  %v5558_v1 = vpack.c.bf16 %v3960_v23, %v3958_v19  ;;  %v4083_v19 = vld [vmem:[#allocation17 + $0xc0] sm:$0xff]  ;;  %v4085_v23 = vld [vmem:[#allocation17 + $0xd0] sm:$0xff] }
0x19f0   :  { %5529 = vmatprep.subr.bf16.mxu0 %v5528_v39  ;;  %v6762_v39 = vrot.slane %v6735_v42, %v6330_v56  ;;  %v4060_v42 = vld [vmem:[#allocation17 + $0x8] sm:$0xff]  ;;  %v5590_v47 = vpack.c.bf16 %v4085_v23, %v4083_v19  ;;  %v4122_v23 = vld [vmem:[#allocation17 + $0x1f8] sm:$0xff] }
0x19f1   :  { %v5564_v5 = vpack.c.bf16 %v4062_v28, %v4060_v42  ;;  %v4091_v42 = vld [vmem:[#allocation17 + $0x100] sm:$0xff]  ;;  %v4093_v28 = vld [vmem:[#allocation17 + $0x110] sm:$0xff]  ;;  %v4120_v19 = vld [vmem:[#allocation17 + $0x1e8] sm:$0xff] }
0x19f2   :  { %v3883_v59 = vmul.f32 %v6762_v39, %v3868_v60  ;;  %v4094_v60 = vld [vmem:[#allocation17 + $0x118] sm:$0xff] }
0x19f3   :  { %5531 = vmatpush1.bf16.msra.mxu0 %v5530_v52  ;;  %v5562_v52 = vpack.c.bf16 %v3964_v25, %v3962_v38  ;;  %5565 = vmatprep.subr.bf16.mxu1 %v5564_v5  ;;  %v4089_v38 = vld [vmem:[#allocation17 + $0xf0] sm:$0xff]  ;;  %v4092_v25 = vld [vmem:[#allocation17 + $0x108] sm:$0xff]  ;;  %v4098_v5 = vld [vmem:[#allocation17 + $0x138] sm:$0xff] }
0x19f4   :  { %5533 = vmatprep.subr.bf16.mxu0 %v5532_v0  ;;  %v6767_v0 = vrot.slane %v6738_v40, %v6330_v56  ;;  %v4063_v40 = vld [vmem:[#allocation17 + $0x20] sm:$0xff] }
0x19f6   :  { %v6771_v3 = vadd.f32 %v6767_v0, %v3883_v59  ;;  %v5596_v59 = vpack.c.bf16 %v4094_v60, %v4092_v25  ;;  %v3966_v25 = vld [vmem:[%s6866_s28] sm:$0x3] }
0x19f7   :  { %5535 = vmatpush1.bf16.msra.mxu0 %v5534_v32  ;;  %v4066_v32 = vld [vmem:[#allocation17 + $0x38] sm:$0xff]  ;;  %v6777_v60 = vrot.slane %v3966_v25, %v6330_v56 }
0x19f8   :  { %5537 = vmatprep.subr.bf16.mxu0 %v5536_v34  ;;  %v5566_v34 = vpack.c.bf16 %v4061_v24, %v4059_v27  ;;  %v5568_v35 = vpack.c.bf16 %v4066_v32, %v4064_v29  ;;  %v4096_v27 = vld [vmem:[#allocation17 + $0x128] sm:$0xff]  ;;  %v5598_v24 = vpack.c.bf16 %v4093_v28, %v4091_v42  ;;  %v4095_v32 = vld [vmem:[#allocation17 + $0x120] sm:$0xff] }
0x19f9   :  { %v5600_v29 = vpack.c.bf16 %v4098_v5, %v4096_v27 }
0x19fa   :  { %5567 = vmatpush1.bf16.msra.mxu1 %v5566_v34  ;;  %v4097_v34 = vld [vmem:[#allocation17 + $0x130] sm:$0xff] }
0x19fb   :  { %5539 = vmatpush1.bf16.msra.mxu0 %v5538_v41  ;;  %v5570_v41 = vpack.c.bf16 %v4065_v4, %v4063_v40  ;;  %5569 = vmatprep.subr.bf16.mxu1 %v5568_v35  ;;  %v4100_v35 = vld [vmem:[#allocation17 + $0x148] sm:$0xff]  ;;  %v4102_v40 = vld [vmem:[#allocation17 + $0x158] sm:$0xff]  ;;  %v5602_v4 = vpack.c.bf16 %v4097_v34, %v4095_v32 }
0x19fc   :  { %5541 = vmatprep.subr.bf16.mxu0 %v5540_v36  ;;  %v5572_v36 = vpack.c.bf16 %v4070_v31, %v4068_v22  ;;  %v5604_v22 = vpack.c.bf16 %v4102_v40, %v4100_v35  ;;  %v4099_v31 = vld [vmem:[#allocation17 + $0x140] sm:$0xff] }
0x19fe   :  { %5571 = vmatpush1.bf16.msra.mxu1 %v5570_v41  ;;  %v4101_v41 = vld [vmem:[#allocation17 + $0x150] sm:$0xff] }
0x19ff   :  { %5543 = vmatpush1.bf16.msra.mxu0 %v5542_v44  ;;  %v5574_v44 = vpack.c.bf16 %v4069_v13, %v4067_v37  ;;  %5573 = vmatprep.subr.bf16.mxu1 %v5572_v36  ;;  %v4104_v36 = vld [vmem:[#allocation17 + $0x168] sm:$0xff]  ;;  %v4106_v37 = vld [vmem:[#allocation17 + $0x178] sm:$0xff]  ;;  %v5606_v13 = vpack.c.bf16 %v4101_v41, %v4099_v31  ;;  %v4304_v41 = vld [vmem:[#allocation19 + $0x80] sm:$0xff] }
0x1a00   :  { %5545 = vmatprep.subr.bf16.mxu0 %v5544_v45  ;;  %v5576_v45 = vpack.c.bf16 %v4074_v11, %v4072_v20  ;;  %v5608_v20 = vpack.c.bf16 %v4106_v37, %v4104_v36  ;;  %v4103_v11 = vld [vmem:[#allocation17 + $0x160] sm:$0xff]  ;;  %v4289_v37 = vld [vmem:[#allocation19 + $0x8] sm:$0xff] }
0x1a02   :  { %5575 = vmatpush1.bf16.msra.mxu1 %v5574_v44  ;;  %v4105_v44 = vld [vmem:[#allocation17 + $0x170] sm:$0xff] }
0x1a03   :  { %5547 = vmatpush1.bf16.msra.mxu0 %v5546_v58  ;;  %v5578_v58 = vpack.c.bf16 %v4073_v6, %v4071_v46  ;;  %5577 = vmatprep.subr.bf16.mxu1 %v5576_v45  ;;  %v4108_v45 = vld [vmem:[#allocation17 + $0x188] sm:$0xff]  ;;  %v4110_v46 = vld [vmem:[#allocation17 + $0x198] sm:$0xff]  ;;  %v5610_v6 = vpack.c.bf16 %v4105_v44, %v4103_v11  ;;  %v4290_v44 = vld [vmem:[#allocation19 + $0x10] sm:$0xff] }
0x1a04   :  { %5549 = vmatprep.subr.bf16.mxu0 %v5548_v43  ;;  %v5580_v43 = vpack.c.bf16 %v4078_v21, %v4076_v17  ;;  %v5612_v17 = vpack.c.bf16 %v4110_v46, %v4108_v45  ;;  %v4107_v21 = vld [vmem:[#allocation17 + $0x180] sm:$0xff]  ;;  %v4291_v45 = vld [vmem:[#allocation19 + $0x18] sm:$0xff] }
0x1a05   :  { %v5634_v46 = vpack.c.bf16 %v4291_v45, %v4290_v44 }
0x1a06   :  { %5579 = vmatpush1.bf16.msra.mxu1 %v5578_v58  ;;  %v4109_v58 = vld [vmem:[#allocation17 + $0x190] sm:$0xff] }
0x1a07   :  { %5551 = vmatpush1.bf16.msra.mxu0 %v5550_v9  ;;  %v5582_v9 = vpack.c.bf16 %v4077_v2, %v4075_v53  ;;  %5581 = vmatprep.subr.bf16.mxu1 %v5580_v43  ;;  %v4112_v43 = vld [vmem:[#allocation17 + $0x1a8] sm:$0xff]  ;;  %v4114_v53 = vld [vmem:[#allocation17 + $0x1b8] sm:$0xff]  ;;  %v5614_v2 = vpack.c.bf16 %v4109_v58, %v4107_v21 }
0x1a08   :  { %5553 = vmatprep.subr.bf16.mxu0 %v5552_v8  ;;  %v5584_v8 = vpack.c.bf16 %v4082_v26, %v4080_v33  ;;  %v5616_v33 = vpack.c.bf16 %v4114_v53, %v4112_v43  ;;  %v4111_v26 = vld [vmem:[#allocation17 + $0x1a0] sm:$0xff] }
0x1a0a   :  { %5583 = vmatpush1.bf16.msra.mxu1 %v5582_v9  ;;  %v4113_v9 = vld [vmem:[#allocation17 + $0x1b0] sm:$0xff] }
0x1a0b   :  { %5555 = vmatpush1.bf16.msra.mxu0 %v5554_v61  ;;  %v5586_v61 = vpack.c.bf16 %v4081_v14, %v4079_v57  ;;  %5585 = vmatprep.subr.bf16.mxu1 %v5584_v8  ;;  %v4116_v8 = vld [vmem:[#allocation17 + $0x1c8] sm:$0xff]  ;;  %v4118_v57 = vld [vmem:[#allocation17 + $0x1d8] sm:$0xff]  ;;  %v5618_v14 = vpack.c.bf16 %v4113_v9, %v4111_v26 }
0x1a0c   :  { %5557 = vmatprep.subr.bf16.mxu0 %v5556_v15  ;;  %v5588_v15 = vpack.c.bf16 %v4086_v10, %v4084_v62  ;;  %v5620_v62 = vpack.c.bf16 %v4118_v57, %v4116_v8  ;;  %v4115_v10 = vld [vmem:[#allocation17 + $0x1c0] sm:$0xff] }
0x1a0e   :  { %5587 = vmatpush1.bf16.msra.mxu1 %v5586_v61  ;;  %v4117_v61 = vld [vmem:[#allocation17 + $0x1d0] sm:$0xff] }
0x1a0f   :  { %5559 = vmatpush1.bf16.msra.mxu0 %v5558_v1  ;;  %5589 = vmatprep.subr.bf16.mxu1 %v5588_v15  ;;  %v5592_v1 = vpack.c.bf16 %v4090_v18, %v4088_v63  ;;  %v5622_v15 = vpack.c.bf16 %v4117_v61, %v4115_v10  ;;  %v5624_v63 = vpack.c.bf16 %v4122_v23, %v4120_v19  ;;  %v4119_v18 = vld [vmem:[#allocation17 + $0x1e0] sm:$0xff]  ;;  %v4293_v61 = vld [vmem:[#allocation19 + $0x28] sm:$0xff]  ;;  %v4310_v19 = vld [vmem:[#allocation19 + $0xb0] sm:$0xff] }
0x1a10   :  { %5561 = vmatprep.subr.bf16.mxu0 %v5560_v7  ;;  %v4087_v7 = vld [vmem:[#allocation17 + $0xe0] sm:$0xff]  ;;  %v4311_v23 = vld [vmem:[#allocation19 + $0xb8] sm:$0xff] }
0x1a11   :  { %v4292_v10 = vld [vmem:[#allocation19 + $0x20] sm:$0xff] }
0x1a12   :  { %5591 = vmatpush1.bf16.msra.mxu1 %v5590_v47  ;;  %v4121_v47 = vld [vmem:[#allocation17 + $0x1f0] sm:$0xff] }
0x1a13   :  { %5563 = vmatpush1.bf16.msra.mxu0 %v5562_v52  ;;  %v5594_v52 = vpack.c.bf16 %v4089_v38, %v4087_v7  ;;  %5593 = vmatprep.subr.bf16.mxu1 %v5592_v1  ;;  %v5626_v1 = vpack.c.bf16 %v4121_v47, %v4119_v18  ;;  %v4294_v18 = vld [vmem:[#allocation19 + $0x30] sm:$0xff]  ;;  %v4295_v47 = vld [vmem:[#allocation19 + $0x38] sm:$0xff] }
0x1a16   :  { %4043 = vmatmul.mubr.f32.vlgmr.msra.gmra.mrb[32].mxu0 %v6771_v3  ;;  %5595 = vmatpush1.bf16.msra.mxu1 %v5594_v52  ;;  %v6780_v52 = vrot.slane %v3966_v25, %v6336_v49 }
0x1a17   :  { %5597 = vmatprep.subr.bf16.mxu1 %v5596_v59 }
0x1a1a   :  { %5599 = vmatpush1.bf16.msra.mxu1 %v5598_v24 }
0x1a1b   :  { %5601 = vmatprep.subr.bf16.mxu1 %v5600_v29 }
0x1a1e   :  { %5603 = vmatpush1.bf16.msra.mxu1 %v5602_v4 }
0x1a1f   :  { %5605 = vmatprep.subr.bf16.mxu1 %v5604_v22 }
0x1a22   :  { %5607 = vmatpush1.bf16.msra.mxu1 %v5606_v13  ;;  %v4307_v13 = vld [vmem:[#allocation19 + $0x98] sm:$0xff] }
0x1a23   :  { %5609 = vmatprep.subr.bf16.mxu1 %v5608_v20 }
0x1a26   :  { %5611 = vmatpush1.bf16.msra.mxu1 %v5610_v6  ;;  %v4204_v6 = vld [vmem:[%s6867_s2] sm:$0x3] }
0x1a27   :  { %5613 = vmatprep.subr.bf16.mxu1 %v5612_v17  ;;  %v6800_v17 = vrot.slane %v4204_v6, %v6330_v56  ;;  %v6803_v58 = vrot.slane %v4204_v6, %v6336_v49 }
0x1a2a   :  { %5615 = vmatpush1.bf16.msra.mxu1 %v5614_v2 }
0x1a2b   :  { %5617 = vmatprep.subr.bf16.mxu1 %v5616_v33 }
0x1a2e   :  { %5619 = vmatpush1.bf16.msra.mxu1 %v5618_v14  ;;  %v4308_v14 = vld [vmem:[#allocation19 + $0xa0] sm:$0xff] }
0x1a2f   :  { %5621 = vmatprep.subr.bf16.mxu1 %v5620_v62 }
0x1a32   :  { %5623 = vmatpush1.bf16.msra.mxu1 %v5622_v15  ;;  %v5638_v15 = vpack.c.bf16 %v4293_v61, %v4292_v10 }
0x1a33   :  { %5625 = vmatprep.subr.bf16.mxu1 %v5624_v63  ;;  %v5640_v63 = vpack.c.bf16 %v4311_v23, %v4310_v19  ;;  %v4220_v23 = vld [vmem:[%s6868_s6] sm:$0x3] }
0x1a36   :  { %5627 = vmatpush1.bf16.msra.mxu1 %v5626_v1  ;;  %v5642_v1 = vpack.c.bf16 %v4295_v47, %v4294_v18 }
0x1aa9   :  { %v3664_v7 = vpop.f32.mrb[30].mxu0 }
0x1aaa   :  { %v4603_v38 = vpop.f32.mrb[31].mxu0  ;;  %3807 = vmatprep.mubr.f32.mxu1 %v3664_v7  ;;  %v4312_v7 = vld [vmem:[#allocation19 + $0xc0] sm:$0xff] }
0x1aab   :  { %3808 = vmatmul.mubr.f32.gmra.mrb[50].mxu1 %v6703_v48  ;;  %v4313_v38 = vld [vmem:[#allocation19 + $0xc8] sm:$0xff] }
0x1aac   :  { %v5644_v25 = vpack.c.bf16 %v4313_v38, %v4312_v7 }
0x1ae9   :  { %v4044_v59 = vpop.f32.mrb[32].mxu0 }
0x1aea   :  { %v4045_v42 = vadd.f32 %v4044_v59, %v6777_v60  ;;  %v4046_v28 = vpop.f32.mrb[33].mxu0  ;;  %v4296_v59 = vld [vmem:[#allocation19 + $0x40] sm:$0xff] }
0x1aeb   :  { %v4047_v27 = vadd.f32 %v4046_v28, %v6780_v52  ;;  %v4314_v28 = vld [vmem:[#allocation19 + $0xd0] sm:$0xff] }
0x1aec   :  { %v4055_v24 = vmax.f32 %v4045_v42, 0.0  ;;  %v4297_v42 = vld [vmem:[#allocation19 + $0x48] sm:$0xff] }
0x1aed   :  { %v4056_v5 = vmax.f32 %v4047_v27, 0.0  ;;  %v5646_v27 = vpack.c.bf16 %v4297_v42, %v4296_v59 }
0x1aef   :  { %4187 = vmatprep.mubr.f32.mxu1 %v4056_v5  ;;  %v4315_v5 = vld [vmem:[#allocation19 + $0xd8] sm:$0xff] }
0x1af0   :  { %4188 = vmatmul.mubr.f32.vlgmr.msra.gmra.mrb[52].mxu1 %v4055_v24  ;;  %v4298_v24 = vld [vmem:[#allocation19 + $0x50] sm:$0xff] }
0x1b7e   :  { %v3809_v29 = vpop.f32.mrb[50].mxu1 }
0x1b7f   :  { %v3816_v48 = vadd.f32 %v3809_v29, %v6622_v54  ;;  %v3811_v32 = vpop.f32.mrb[51].mxu1  ;;  %v4299_v29 = vld [vmem:[#allocation19 + $0x58] sm:$0xff] }
0x1b80   :  { %v3817_v34 = vadd.f32 %v3811_v32, %v6619_v50  ;;  %v4305_v50 = vld [vmem:[#allocation19 + $0x88] sm:$0xff]  ;;  %v4316_v32 = vld [vmem:[#allocation19 + $0xe0] sm:$0xff] }
0x1b81   :  { %v6787_v35 = vadd.f32 %v6709_v30, %v3816_v48  ;;  %v4288_v30 = vld [vmem:[#allocation19] sm:$0xff]  ;;  %v5628_v36 = vpack.c.bf16 %v4305_v50, %v4304_v41  ;;  %v5648_v48 = vpack.c.bf16 %v4315_v5, %v4314_v28  ;;  %v4318_v41 = vld [vmem:[#allocation19 + $0xf0] sm:$0xff]  ;;  %v4319_v50 = vld [vmem:[#allocation19 + $0xf8] sm:$0xff] }
0x1b82   :  { %v6790_v40 = vadd.f32 %v6712_v51, %v3817_v34  ;;  %v4306_v51 = vld [vmem:[#allocation19 + $0x90] sm:$0xff]  ;;  %v5630_v20 = vpack.c.bf16 %v4289_v37, %v4288_v30  ;;  %v4317_v34 = vld [vmem:[#allocation19 + $0xe8] sm:$0xff] }
0x1b83   :  { %v3846_v4 = vmul.f32 %v6787_v35, %v6787_v35  ;;  %v5632_v11 = vpack.c.bf16 %v4307_v13, %v4306_v51  ;;  %5629 = vmatprep.subr.bf16.mxu0 %v5628_v36  ;;  %v5656_v36 = vpack.c.bf16 %v4319_v50, %v4318_v41  ;;  %v4302_v37 = vld [vmem:[#allocation19 + $0x70] sm:$0xff]  ;;  %v4303_v51 = vld [vmem:[#allocation19 + $0x78] sm:$0xff] }
0x1b84   :  { %v3839_v22 = vadd.f32 %v6790_v40, %v6787_v35  ;;  %v3847_v31 = vmul.f32 %v6790_v40, %v6790_v40  ;;  %5631 = vmatpush3.bf16.msra.mxu0 %v5630_v20  ;;  %v5658_v13 = vpack.c.bf16 %v4303_v51, %v4302_v37 }
0x1b85   :  { %5633 = vmatprep.subr.bf16.mxu0 %v5632_v11 }
0x1b86   :  { %3840 = vadd.xlane.f32.xlu0 %v3839_v22  ;;  %v3851_v54 = vadd.f32 %v3847_v31, %v3846_v4  ;;  %v5650_v4 = vpack.c.bf16 %v4299_v29, %v4298_v24  ;;  %v5652_v22 = vpack.c.bf16 %v4317_v34, %v4316_v32  ;;  %v4300_v31 = vld [vmem:[#allocation19 + $0x60] sm:$0xff] }
0x1b88   :  { %3852 = vadd.xlane.f32.xlu1 %v3851_v54  ;;  %5635 = vmatpush3.bf16.msra.mxu0 %v5634_v46  ;;  %v4301_v54 = vld [vmem:[#allocation19 + $0x68] sm:$0xff] }
0x1b89   :  { %v5654_v30 = vpack.c.bf16 %v4301_v54, %v4300_v31 }
0x1bc3   :  { %v4189_v21 = vpop.f32.mrb[52].mxu1 }
0x1bc4   :  { %v4200_v43 = vadd.f32 %v4189_v21, %v6771_v3  ;;  %v4191_v53 = vpop.f32.mrb[53].mxu1 }
0x1bc5   :  { %v4201_v2 = vadd.f32 %v4191_v53, %v6755_v16  ;;  %v4309_v16 = vld [vmem:[#allocation19 + $0xa8] sm:$0xff] }
0x1bc6   :  { %v6808_v33 = vadd.f32 %v6800_v17, %v4200_v43  ;;  %v5636_v62 = vpack.c.bf16 %v4309_v16, %v4308_v14 }
0x1bc7   :  { %v6811_v26 = vadd.f32 %v6803_v58, %v4201_v2 }
0x1bc8   :  { %v4230_v9 = vmul.f32 %v6808_v33, %v6808_v33  ;;  %5637 = vmatprep.subr.bf16.mxu0 %v5636_v62 }
0x1bc9   :  { %v4222_v8 = vadd.f32 %v6811_v26, %v6808_v33  ;;  %v4231_v57 = vmul.f32 %v6811_v26, %v6811_v26  ;;  %5639 = vmatpush3.bf16.msra.mxu0 %v5638_v15 }
0x1bca   :  { %5641 = vmatprep.subr.bf16.mxu0 %v5640_v63  ;;  %v4221_v63 = vld [vmem:[%s6222_s27] sm:$0x3] }
0x1bcb   :  { %4223 = vadd.xlane.f32.xlu0 %v4222_v8  ;;  %v4234_v3 = vadd.f32 %v4231_v57, %v4230_v9  ;;  %v4277_v7 = vrot.slane %v4221_v63, %v6330_v56  ;;  %v4281_v38 = vrot.slane %v4221_v63, %v6336_v49 }
0x1bcd   :  { %4235 = vadd.xlane.f32.xlu1 %v4234_v3  ;;  %5643 = vmatpush3.bf16.msra.mxu0 %v5642_v1 }
0x1bce   :  { %5645 = vmatprep.subr.bf16.mxu0 %v5644_v25 }
0x1bd1   :  { %5647 = vmatpush3.bf16.msra.mxu0 %v5646_v27 }
0x1bd2   :  { %5649 = vmatprep.subr.bf16.mxu0 %v5648_v48 }
0x1bd5   :  { %5651 = vmatpush3.bf16.msra.mxu0 %v5650_v4 }
0x1bd6   :  { %5653 = vmatprep.subr.bf16.mxu0 %v5652_v22 }
0x1bd9   :  { %5655 = vmatpush3.bf16.msra.mxu0 %v5654_v30 }
0x1bda   :  { %5657 = vmatprep.subr.bf16.mxu0 %v5656_v36 }
0x1bdd   :  { %5659 = vmatpush3.bf16.msra.mxu0 %v5658_v13 }
0x1c13   :  { %v3841_v20 = vpop.xlane.xlu0 %3840 }
0x1c14   :  { %v3843_v11 = vmul.f32 0.005, %v3841_v20 }
0x1c15   :  { %v3853_v44 = vpop.xlane.xlu1 %3852 }
0x1c16   :  { %v3855_v45 = vmul.f32 0.005, %v3853_v44  ;;  %v3857_v46 = vmul.f32 %v3843_v11, %v3843_v11  ;;  %v3862_v43 = vsub.f32 %v6787_v35, %v3843_v11  ;;  %v3863_v53 = vsub.f32 %v6790_v40, %v3843_v11 }
0x1c18   :  { %v3859_v6 = vsub.f32 %v3855_v45, %v3857_v46 }
0x1c1a   :  { %v3865_v21 = vadd.f32 1e-05, %v3859_v6 }
0x1c1c   :  { %5762 = vrsqrt.f32 %v3865_v21 }
0x1c26   :  { %v5763_v2 = vpop.eup %5762 }
0x1c27   :  { %v3871_v9 = vmul.f32 %v5763_v2, %v3863_v53  ;;  %v3870_v8 = vmul.f32 %v5763_v2, %v3862_v43 }
0x1c29   :  { %v3886_v57 = vmul.f32 %v6744_v12, %v3871_v9  ;;  %v3885_v3 = vmul.f32 %v6762_v39, %v3870_v8 }
0x1c2b   :  { %v3901_v14 = vadd.f32 %v6751_v55, %v3886_v57  ;;  %v3900_v16 = vadd.f32 %v6767_v0, %v3885_v3  ;;  %v4262_v55 = vrot.slane %v4220_v23, %v6330_v56  ;;  %v4266_v0 = vrot.slane %v4220_v23, %v6336_v49  ;;  %v4453_v49 = vld [vmem:[%s6232_s12] ss:$0 sm:$0xff] }
0x1c2d   :  { %4048 = vmatprep.mubr.f32.mxu0 %v3901_v14 }
0x1c2e   :  { %4049 = vmatmul.mubr.f32.gmra.mrb[34].mxu0 %v3900_v16 }
0x1c58   :  { %v4224_v62 = vpop.xlane.xlu0 %4223 }
0x1c59   :  { %v4228_v10 = vmul.f32 0.005, %v4224_v62 }
0x1c5a   :  { %v4236_v35 = vpop.xlane.xlu1 %4235 }
0x1c5b   :  { %v4240_v61 = vmul.f32 0.005, %v4236_v35  ;;  %v4242_v40 = vmul.f32 %v4228_v10, %v4228_v10  ;;  %v4246_v12 = vsub.f32 %v6808_v33, %v4228_v10  ;;  %v4247_v39 = vsub.f32 %v6811_v26, %v4228_v10 }
0x1c5d   :  { %v4244_v15 = vsub.f32 %v4240_v61, %v4242_v40 }
0x1c5f   :  { %v4250_v19 = vadd.f32 1e-05, %v4244_v15 }
0x1c61   :  { %5764 = vrsqrt.f32 %v4250_v19 }
0x1c6b   :  { %v5765_v18 = vpop.eup %5764 }
0x1c6c   :  { %v4254_v47 = vmul.f32 %v5765_v18, %v4246_v12  ;;  %v4255_v1 = vmul.f32 %v5765_v18, %v4247_v39 }
0x1c6e   :  { %v4269_v25 = vmul.f32 %v4262_v55, %v4254_v47  ;;  %v4270_v59 = vmul.f32 %v4266_v0, %v4255_v1 }
0x1c70   :  { %v4284_v42 = vadd.f32 %v4277_v7, %v4269_v25  ;;  %v4285_v28 = vadd.f32 %v4281_v38, %v4270_v59 }
0x1c72   :  { %4391 = vmatprep.mubr.f32.mxu0 %v4285_v28 }
0x1c73   :  { %4392 = vmatmul.mubr.f32.vlgmr.msra.gmra.mrb[36].mxu0 %v4284_v42 }
0x1d01   :  { %v4050_v33 = vpop.f32.mrb[34].mxu0 }
0x1d02   :  { %v4051_v26 = vadd.f32 %v4050_v33, %v6777_v60  ;;  %v4052_v27 = vpop.f32.mrb[35].mxu0 }
0x1d03   :  { %v4053_v5 = vadd.f32 %v4052_v27, %v6780_v52 }
0x1d04   :  { %v4057_v29 = vmax.f32 %v4051_v26, 0.0 }
0x1d05   :  { %v4058_v24 = vmax.f32 %v4053_v5, 0.0 }
0x1d07   :  { %4193 = vmatprep.mubr.f32.mxu1 %v4058_v24 }
0x1d08   :  { %4194 = vmatmul.mubr.f32.gmra.mrb[54].mxu1 %v4057_v29 }
0x1d46   :  { %v4518_v56 = vpop.f32.mrb[36].mxu0 }
0x1d47   :  { %v4519_v48 = vpop.f32.mrb[37].mxu0 }
0x1d48   :  { %v4520_v32 = vadd.f32 %v4519_v48, %v4518_v56 }
0x1d4a   :  { %v4394_v34 = vadd.f32 %v4520_v32, %v4453_v49 }
0x1d4c   :  { %4402 = vst [vmem:[%s6237_s14] sm:$0xff] %v4394_v34 }
0x1ddb   :  { %v4195_v4 = vpop.f32.mrb[54].mxu1 }
0x1ddc   :  { %v4202_v22 = vadd.f32 %v4195_v4, %v3900_v16  ;;  %v4197_v31 = vpop.f32.mrb[55].mxu1 }
0x1ddd   :  { %v4203_v54 = vadd.f32 %v4197_v31, %v3901_v14 }
0x1dde   :  { %v4218_v41 = vadd.f32 %v6800_v17, %v4202_v22 }
0x1ddf   :  { %v4219_v60 = vadd.f32 %v6803_v58, %v4203_v54 }
0x1de0   :  { %v4232_v50 = vmul.f32 %v4218_v41, %v4218_v41 }
0x1de1   :  { %v4225_v52 = vadd.f32 %v4219_v60, %v4218_v41  ;;  %v4233_v30 = vmul.f32 %v4219_v60, %v4219_v60 }
0x1de3   :  { %4226 = vadd.xlane.f32.xlu0 %v4225_v52  ;;  %v4237_v36 = vadd.f32 %v4233_v30, %v4232_v50 }
0x1de5   :  { %4238 = vadd.xlane.f32.xlu1 %v4237_v36 }
0x1e70   :  { %v4227_v37 = vpop.xlane.xlu0 %4226 }
0x1e71   :  { %v4229_v51 = vmul.f32 0.005, %v4227_v37 }
0x1e72   :  { %v4239_v13 = vpop.xlane.xlu1 %4238 }
0x1e73   :  { %v4241_v20 = vmul.f32 0.005, %v4239_v13  ;;  %v4243_v11 = vmul.f32 %v4229_v51, %v4229_v51  ;;  %v4248_v46 = vsub.f32 %v4218_v41, %v4229_v51  ;;  %v4249_v6 = vsub.f32 %v4219_v60, %v4229_v51 }
0x1e75   :  { %v4245_v44 = vsub.f32 %v4241_v20, %v4243_v11 }
0x1e77   :  { %v4251_v45 = vadd.f32 1e-05, %v4245_v44 }
0x1e79   :  { %5766 = vrsqrt.f32 %v4251_v45 }
0x1e83   :  { %v5767_v17 = vpop.eup %5766 }
0x1e84   :  { %v4257_v21 = vmul.f32 %v5767_v17, %v4249_v6  ;;  %v4256_v58 = vmul.f32 %v5767_v17, %v4248_v46 }
0x1e86   :  { %v4272_v43 = vmul.f32 %v4266_v0, %v4257_v21  ;;  %v4271_v53 = vmul.f32 %v4262_v55, %v4256_v58 }
0x1e88   :  { %v4287_v2 = vadd.f32 %v4281_v38, %v4272_v43  ;;  %v4286_v9 = vadd.f32 %v4277_v7, %v4271_v53 }
0x1e8a   :  { %4396 = vmatprep.mubr.f32.mxu0 %v4287_v2 }
0x1e8b   :  { %4397 = vmatmul.mubr.f32.gmra.mrb[38].mxu0 %v4286_v9 }
0x1f5e   :  { %v4521_v8 = vpop.f32.mrb[38].mxu0 }
0x1f5f   :  { %v4522_v57 = vpop.f32.mrb[39].mxu0 }
0x1f60   :  { %v4523_v3 = vadd.f32 %v4522_v57, %v4521_v8 }
0x1f62   :  { %v4399_v14 = vadd.f32 %v4523_v3, %v4453_v49 }
0x1f64   :  { %4403 = vst [vmem:[%s6237_s14 + $0x8] sm:$0xff] %v4399_v14 }
0x1f65   :  { %4408 = vsyncpa [#allocation4], 1 }
0x1f66   :  { %4409 = vsyncpa [#allocation6], 1 }
0x1f67   :  { %4410 = vsyncpa [#allocation9], 1 }
0x1f68   :  { %4411 = vsyncpa [#allocation12], 1 }
0x1f69   :  { %4412 = vsyncpa [#allocation15], 1 }
0x1f6a   :  { %4413 = vsyncpa [#allocation18], 1 }

</bundles_post_ra>
